<compile_context>
chip_gen: v7x
topology: tpu7x:2x2x1
jax: 0.10.0
libtpu: 0.0.40
codegen_flags: <defaults>
</compile_context>

<pallas_src>
import functools

import jax
import jax.numpy as jnp
from jax.experimental import pallas as pl
from jax.experimental.pallas import tpu as pltpu


# ----------------------------- kernel body -----------------------------------

def _block_ca_kernel(xp_ref, xc_ref,
                     ln1_w_ref, ln1_b_ref,
                     wqkv_ref, hid_col_ref, hid_row_ref,
                     wp_ref, bp_ref,
                     ln2_w_ref, ln2_b_ref,
                     w1_ref, b1_ref, w2_ref, b2_ref,
                     g1_ref, g2_ref,
                     out_ref,
                     *, eps, scale):
    f32, bf16 = jnp.float32, jnp.bfloat16
    tb = xc_ref.shape[0]                  # batch tile
    n_tok = xp_ref.shape[0] // tb         # patch tokens per batch element
    C = xc_ref.shape[-1]

    xp = xp_ref[...].astype(f32)          # (tb*N, C) patch tokens (bf16 in HBM)
    xc = xc_ref[...].astype(f32)          # (tb,   C) class tokens (f32 residual)

    def layernorm(t, w, b):
        # one-pass variance: E[x^2] - mu^2 (single sweep over the slab)
        mu = jnp.mean(t, axis=-1, keepdims=True)
        var = jnp.mean(t * t, axis=-1, keepdims=True) - mu * mu
        return (t - mu) * jax.lax.rsqrt(var + eps) * w + b

    ln1_w = ln1_w_ref[...]
    ln1_b = ln1_b_ref[...]
    un_p = layernorm(xp, ln1_w, ln1_b).astype(bf16)    # (tb*N, C)
    un_c = layernorm(xc, ln1_w, ln1_b).astype(bf16)    # (tb,   C)

    # ---- Class attention: q from class token, k/v from class + patch tokens ----
    wqkv = wqkv_ref[...]                                # (C, 3C) bf16 = [Wq|Wk|Wv]
    qkv_c = jnp.dot(un_c, wqkv, preferred_element_type=f32)         # (tb,   3C)
    kv_p = jnp.dot(un_p, wqkv[:, C:], preferred_element_type=f32)   # (tb*N, 2C)

    q = qkv_c[:, :C] * scale                            # (tb, C) f32
    k_c = qkv_c[:, C:2 * C]
    v_c = qkv_c[:, 2 * C:]
    kv_p3 = kv_p.reshape(tb, n_tok, 2 * C)              # free view when N % 8 == 0
    k_p3 = kv_p3[:, :, :C]
    v_p3 = kv_p3[:, :, C:]

    # Block-diagonal 0/1 "segment" matrix built from tiny head-id vectors:
    # dot(q*k, seg) sums q*k within each head and broadcasts that head's logit to
    # every one of its channels, so every tensor stays lane-dense at width C.
    seg = (hid_col_ref[...] == hid_row_ref[...]).astype(bf16)       # (C, C)

    qk_c = (q * k_c).astype(bf16)                                   # (tb,   C)
    qk_p = (q[:, None, :] * k_p3).reshape(tb * n_tok, C).astype(bf16)
    l_c = jnp.dot(qk_c, seg, preferred_element_type=f32)            # (tb,   C)
    l_p3 = jnp.dot(qk_p, seg, preferred_element_type=f32).reshape(tb, n_tok, C)

    # Numerically stable softmax over the N+1 tokens of each (batch, head).
    m = jnp.maximum(l_c, jnp.max(l_p3, axis=1))         # (tb, C)
    e_c = jnp.exp(l_c - m)
    e_p3 = jnp.exp(l_p3 - m[:, None, :])
    denom = e_c + jnp.sum(e_p3, axis=1)
    inv = pl.reciprocal(denom, approx=True)             # EUP slot
    attn = (e_c * v_c + jnp.sum(e_p3 * v_p3, axis=1)) * inv         # (tb, C) f32

    attn_out = jnp.dot(attn.astype(bf16), wp_ref[...],
                       preferred_element_type=f32) + bp_ref[...]

    # ---- residual 1 with layer-scale gamma_1 ----
    x1 = xc + g1_ref[...] * attn_out                    # (tb, C) f32

    # ---- norm2 + MLP (tanh GELU -> EUP) ----
    xn = layernorm(x1, ln2_w_ref[...], ln2_b_ref[...]).astype(bf16)
    h = jnp.dot(xn, w1_ref[...], preferred_element_type=f32) + b1_ref[...]
    h = jax.nn.gelu(h, approximate=True).astype(bf16)
    h = jnp.dot(h, w2_ref[...], preferred_element_type=f32) + b2_ref[...]

    # ---- residual 2 with layer-scale gamma_2 ----
    out_ref[...] = (x1 + g2_ref[...] * h).astype(out_ref.dtype)


# ----------------------------- wrapper ----------------------------------------

_VMEM_TARGET = 48 << 20     # conservative per-core target (v7x has only 64 MiB / TC)


def _pick_batch_tile(B, N, C, tile_budget_bytes):
    """Largest sublane-aligned batch tile that fits the VMEM budget while leaving
    >= 2 grid steps (pipelining + megacore sharding) whenever B allows it."""
    # per-batch-element VMEM: double-buffered bf16 patch tile + ~10 f32 work slabs
    per_b = N * C * (2 * 2 + 10 * 4)
    cap = max(1, tile_budget_bytes // per_b)
    aligned = [d for d in range(1, B + 1)
               if B % d == 0 and (d % 8 == 0 or d == B)]
    fits = [d for d in aligned if d <= cap]
    multi = [d for d in fits if B // d >= 2]
    if multi:
        return max(multi)
    if fits:
        return max(fits)
    return min(aligned)


def block_ca_forward(x, x_cls, params, *, num_heads, eps=1e-5):
    """Pallas implementation of Block_CA.forward(x, x_cls) (eval mode)."""
    B, N, C = x.shape
    Hm = params["w1"].shape[1]
    Dh = C // num_heads
    scale = Dh ** (-0.5)
    bf16 = jnp.bfloat16

    # --- bf16 weight packing (accumulation stays f32 inside the kernel) ---
    wqkv = jnp.concatenate(
        [params["wq"], params["wk"], params["wv"]], axis=1).astype(bf16)  # (C, 3C)
    wp = params["wp"].astype(bf16)
    w1 = params["w1"].astype(bf16)
    w2 = params["w2"].astype(bf16)
    weight_bytes = 2 * (3 * C * C + C * C + 2 * C * Hm)

    tb = _pick_batch_tile(B, N, C, max(_VMEM_TARGET - 2 * weight_bytes, 8 << 20))
    grid = (B // tb,)

    # Layout plumbing only (free reshapes / tiny constants) — no big HBM copies.
    xp2 = x.reshape(B * N, C).astype(bf16)     # patch tokens -> bf16 in HBM
    xc2 = x_cls.reshape(B, C)                  # class tokens stay f32 (residual path)
    head_id = (jnp.arange(C, dtype=jnp.int32) // Dh).astype(jnp.float32)
    hid_row = head_id.reshape(1, C)
    hid_col = head_id.reshape(C, 1)

    # Explicit scoped-VMEM limit (defaults 16/32 MiB are far below physical).
    tile_bytes = 2 * (tb * N * C * 2) + 4 * (tb * C * 4)
    work_bytes = 12 * tb * N * C * 4 + 2 * C * C + 8 * tb * max(C, Hm) * 4
    vmem_limit = int(min(max(2 * (2 * weight_bytes + tile_bytes + work_bytes),
                             32 << 20), 64 << 20))

    kernel = functools.partial(_block_ca_kernel, eps=eps, scale=scale)

    def build(single_buffer_weights):
        def wspec(shape):
            idx = lambda i: (0,) * len(shape)
            if single_buffer_weights:
                # grid-invariant operands: DMA'd once, keep a single VMEM buffer
                return pl.BlockSpec(shape, idx, pipeline_mode=pl.Buffered(1))
            return pl.BlockSpec(shape, idx)

        return pl.pallas_call(
            kernel,
            out_shape=jax.ShapeDtypeStruct((B, C), x_cls.dtype),
            grid_spec=pltpu.PrefetchScalarGridSpec(
                num_scalar_prefetch=0,
                grid=grid,
                in_specs=[
                    pl.BlockSpec((tb * N, C), lambda i: (i, 0)),   # patch tokens
                    pl.BlockSpec((tb, C), lambda i: (i, 0)),       # class tokens
                    wspec((1, C)), wspec((1, C)),                  # ln1 w, b
                    wspec((C, 3 * C)),                             # fused Wq|Wk|Wv
                    wspec((C, 1)), wspec((1, C)),                  # head-id col / row
                    wspec((C, C)), wspec((1, C)),                  # Wproj, bproj
                    wspec((1, C)), wspec((1, C)),                  # ln2 w, b
                    wspec((C, Hm)), wspec((1, Hm)),                # fc1 W, b
                    wspec((Hm, C)), wspec((1, C)),                 # fc2 W, b
                    wspec((1, C)), wspec((1, C)),                  # gamma_1, gamma_2
                ],
                out_specs=pl.BlockSpec((tb, C), lambda i: (i, 0)),
            ),
            compiler_params=pltpu.CompilerParams(
                dimension_semantics=("parallel",),
                vmem_limit_bytes=vmem_limit),
        )

    args = (xp2, xc2,
            params["ln1_w"], params["ln1_b"],
            wqkv, hid_col, hid_row,
            wp, params["bp"],
            params["ln2_w"], params["ln2_b"],
            w1, params["b1"], w2, params["b2"],
            params["g1"], params["g2"])

    last_err = None
    for single in (True, False):
        try:
            out2 = jax.block_until_ready(build(single)(*args))
            break
        except Exception as err:   # noqa: BLE001 — fall back to double-buffered weights
            last_err = err
    else:
        raise last_err
    return out2.reshape(B, 1, C)


# ----------------------------- pure-JAX reference ------------------------------

def block_ca_reference(x, x_cls, params, *, num_heads, eps=1e-5):
    B, N, C = x.shape
    Dh = C // num_heads
    scale = Dh ** (-0.5)

    def ln(t, w, b):
        mu = jnp.mean(t, axis=-1, keepdims=True)
        var = jnp.mean((t - mu) ** 2, axis=-1, keepdims=True)
        return (t - mu) / jnp.sqrt(var + eps) * w + b

    u = jnp.concatenate([x_cls, x], axis=1)
    un = ln(u, params["ln1_w"][0], params["ln1_b"][0])
    q = un[:, 0:1] @ params["wq"]
    k = un @ params["wk"]
    v = un @ params["wv"]
    qh = q.reshape(B, 1, num_heads, Dh).transpose(0, 2, 1, 3) * scale
    kh = k.reshape(B, N + 1, num_heads, Dh).transpose(0, 2, 1, 3)
    vh = v.reshape(B, N + 1, num_heads, Dh).transpose(0, 2, 1, 3)
    attn = jax.nn.softmax(qh @ kh.transpose(0, 1, 3, 2), axis=-1)
    o = (attn @ vh).transpose(0, 2, 1, 3).reshape(B, 1, C)
    o = o @ params["wp"] + params["bp"][0]
    xc = x_cls + params["g1"][0] * o
    xn = ln(xc, params["ln2_w"][0], params["ln2_b"][0])
    m = jax.nn.gelu(xn @ params["w1"] + params["b1"][0], approximate=False)
    m = m @ params["w2"] + params["b2"][0]
    return xc + params["g2"][0] * m


# ----------------------------- main --------------------------------------------

if __name__ == "__main__":
    B, N, C = 16, 8, 128         # batch, patch tokens, embedding dim
    num_heads = 4
    mlp_ratio = 4.0
    Hm = int(C * mlp_ratio)
    init_values = 1e-4

    key = jax.random.PRNGKey(0)
    ks = jax.random.split(key, 16)
    f32 = jnp.float32

    x = jax.random.normal(ks[0], (B, N, C), f32)
    x_cls = jax.random.normal(ks[1], (B, 1, C), f32)

    params = {
        "ln1_w": (1.0 + 0.1 * jax.random.normal(ks[2], (1, C), f32)),
        "ln1_b": 0.1 * jax.random.normal(ks[3], (1, C), f32),
        "wq": 0.02 * jax.random.normal(ks[4], (C, C), f32),
        "wk": 0.02 * jax.random.normal(ks[5], (C, C), f32),
        "wv": 0.02 * jax.random.normal(ks[6], (C, C), f32),
        "wp": 0.02 * jax.random.normal(ks[7], (C, C), f32),
        "bp": 0.02 * jax.random.normal(ks[8], (1, C), f32),
        "ln2_w": (1.0 + 0.1 * jax.random.normal(ks[9], (1, C), f32)),
        "ln2_b": 0.1 * jax.random.normal(ks[10], (1, C), f32),
        "w1": 0.02 * jax.random.normal(ks[11], (C, Hm), f32),
        "b1": 0.02 * jax.random.normal(ks[12], (1, Hm), f32),
        "w2": 0.02 * jax.random.normal(ks[13], (Hm, C), f32),
        "b2": 0.02 * jax.random.normal(ks[14], (1, C), f32),
        "g1": jnp.full((1, C), init_values, f32),
        "g2": jnp.full((1, C), init_values, f32),
    }

    out = block_ca_forward(x, x_cls, params, num_heads=num_heads)
    out = jax.block_until_ready(out)

    ref = block_ca_reference(x, x_cls, params, num_heads=num_heads)
    ref = jax.block_until_ready(ref)

    assert out.shape == (B, 1, C), out.shape
    max_err = float(jnp.max(jnp.abs(out - ref)))
    assert jnp.allclose(out, ref, atol=3e-3, rtol=2e-2), max_err

    print("KERNEL_OK")
</pallas_src>

<mosaic_0001>
module attributes {stable_mosaic.version = 11 : i64} {
  func.func @_block_ca_kernel(%arg0: i32, %arg1: memref<64x128xbf16, #tpu.memory_space<vmem>>, %arg2: memref<8x128xf32, #tpu.memory_space<vmem>>, %arg3: memref<1x128xf32, #tpu.memory_space<vmem>>, %arg4: memref<1x128xf32, #tpu.memory_space<vmem>>, %arg5: memref<128x384xbf16, #tpu.memory_space<vmem>>, %arg6: memref<128x1xf32, #tpu.memory_space<vmem>>, %arg7: memref<1x128xf32, #tpu.memory_space<vmem>>, %arg8: memref<128x128xbf16, #tpu.memory_space<vmem>>, %arg9: memref<1x128xf32, #tpu.memory_space<vmem>>, %arg10: memref<1x128xf32, #tpu.memory_space<vmem>>, %arg11: memref<1x128xf32, #tpu.memory_space<vmem>>, %arg12: memref<128x512xbf16, #tpu.memory_space<vmem>>, %arg13: memref<1x512xf32, #tpu.memory_space<vmem>>, %arg14: memref<512x128xbf16, #tpu.memory_space<vmem>>, %arg15: memref<1x128xf32, #tpu.memory_space<vmem>>, %arg16: memref<1x128xf32, #tpu.memory_space<vmem>>, %arg17: memref<1x128xf32, #tpu.memory_space<vmem>>, %arg18: memref<8x128xf32, #tpu.memory_space<vmem>>) attributes {dimension_semantics = [#tpu.dimension_semantics<parallel>], iteration_bounds = array<i64: 2>, scalar_prefetch = 0 : i64, scratch_operands = 0 : i64, tpu.core_type = #tpu.core_type<tc>, window_params = [{transform_indices = @transform_0, window_bounds = array<i64: 64, 128>}, {transform_indices = @transform_1, window_bounds = array<i64: 8, 128>}, {pipeline_mode = #tpu.pipeline_mode<synchronous>, transform_indices = @transform_2, window_bounds = array<i64: 1, 128>}, {pipeline_mode = #tpu.pipeline_mode<synchronous>, transform_indices = @transform_3, window_bounds = array<i64: 1, 128>}, {pipeline_mode = #tpu.pipeline_mode<synchronous>, transform_indices = @transform_4, window_bounds = array<i64: 128, 384>}, {pipeline_mode = #tpu.pipeline_mode<synchronous>, transform_indices = @transform_5, window_bounds = array<i64: 128, 1>}, {pipeline_mode = #tpu.pipeline_mode<synchronous>, transform_indices = @transform_6, window_bounds = array<i64: 1, 128>}, {pipeline_mode = #tpu.pipeline_mode<synchronous>, transform_indices = @transform_7, window_bounds = array<i64: 128, 128>}, {pipeline_mode = #tpu.pipeline_mode<synchronous>, transform_indices = @transform_8, window_bounds = array<i64: 1, 128>}, {pipeline_mode = #tpu.pipeline_mode<synchronous>, transform_indices = @transform_9, window_bounds = array<i64: 1, 128>}, {pipeline_mode = #tpu.pipeline_mode<synchronous>, transform_indices = @transform_10, window_bounds = array<i64: 1, 128>}, {pipeline_mode = #tpu.pipeline_mode<synchronous>, transform_indices = @transform_11, window_bounds = array<i64: 128, 512>}, {pipeline_mode = #tpu.pipeline_mode<synchronous>, transform_indices = @transform_12, window_bounds = array<i64: 1, 512>}, {pipeline_mode = #tpu.pipeline_mode<synchronous>, transform_indices = @transform_13, window_bounds = array<i64: 512, 128>}, {pipeline_mode = #tpu.pipeline_mode<synchronous>, transform_indices = @transform_14, window_bounds = array<i64: 1, 128>}, {pipeline_mode = #tpu.pipeline_mode<synchronous>, transform_indices = @transform_15, window_bounds = array<i64: 1, 128>}, {pipeline_mode = #tpu.pipeline_mode<synchronous>, transform_indices = @transform_16, window_bounds = array<i64: 1, 128>}, {transform_indices = @transform_17, window_bounds = array<i64: 8, 128>}]} {
    %c0 = arith.constant 0 : index
    %c0_0 = arith.constant 0 : index
    %0 = vector.load %arg1[%c0, %c0_0] : memref<64x128xbf16, #tpu.memory_space<vmem>>, vector<64x128xbf16>
    %1 = arith.extf %0 : vector<64x128xbf16> to vector<64x128xf32>
    %c0_1 = arith.constant 0 : index
    %c0_2 = arith.constant 0 : index
    %2 = vector.load %arg2[%c0_1, %c0_2] : memref<8x128xf32, #tpu.memory_space<vmem>>, vector<8x128xf32>
    %c0_3 = arith.constant 0 : index
    %c0_4 = arith.constant 0 : index
    %3 = vector.load %arg3[%c0_3, %c0_4] : memref<1x128xf32, #tpu.memory_space<vmem>>, vector<1x128xf32>
    %c0_5 = arith.constant 0 : index
    %c0_6 = arith.constant 0 : index
    %4 = vector.load %arg4[%c0_5, %c0_6] : memref<1x128xf32, #tpu.memory_space<vmem>>, vector<1x128xf32>
    %cst = arith.constant dense<0.000000e+00> : vector<64xf32>
    %5 = vector.multi_reduction <add>, %1, %cst [1] : vector<64x128xf32> to vector<64xf32>
    %6 = vector.shape_cast %5 : vector<64xf32> to vector<64x1xf32>
    %cst_7 = arith.constant 1.280000e+02 : f32
    %7 = vector.broadcast %cst_7 : f32 to vector<64x1xf32>
    %8 = arith.divf %6, %7 : vector<64x1xf32>
    %9 = arith.mulf %1, %1 : vector<64x128xf32>
    %cst_8 = arith.constant dense<0.000000e+00> : vector<64xf32>
    %10 = vector.multi_reduction <add>, %9, %cst_8 [1] : vector<64x128xf32> to vector<64xf32>
    %11 = vector.shape_cast %10 : vector<64xf32> to vector<64x1xf32>
    %cst_9 = arith.constant 1.280000e+02 : f32
    %12 = vector.broadcast %cst_9 : f32 to vector<64x1xf32>
    %13 = arith.divf %11, %12 : vector<64x1xf32>
    %14 = arith.mulf %8, %8 : vector<64x1xf32>
    %15 = arith.subf %13, %14 : vector<64x1xf32>
    %16 = vector.broadcast %8 : vector<64x1xf32> to vector<64x128xf32>
    %17 = arith.subf %1, %16 : vector<64x128xf32>
    %cst_10 = arith.constant 9.99999974E-6 : f32
    %18 = vector.broadcast %cst_10 : f32 to vector<64x1xf32>
    %19 = arith.addf %15, %18 : vector<64x1xf32>
    %20 = math.rsqrt %19 : vector<64x1xf32>
    %21 = vector.broadcast %20 : vector<64x1xf32> to vector<64x128xf32>
    %22 = arith.mulf %17, %21 : vector<64x128xf32>
    %23 = vector.broadcast %3 : vector<1x128xf32> to vector<64x128xf32>
    %24 = arith.mulf %22, %23 : vector<64x128xf32>
    %25 = vector.broadcast %4 : vector<1x128xf32> to vector<64x128xf32>
    %26 = arith.addf %24, %25 : vector<64x128xf32>
    %27 = arith.truncf %26 : vector<64x128xf32> to vector<64x128xbf16>
    %cst_11 = arith.constant dense<0.000000e+00> : vector<8xf32>
    %28 = vector.multi_reduction <add>, %2, %cst_11 [1] : vector<8x128xf32> to vector<8xf32>
    %29 = vector.shape_cast %28 : vector<8xf32> to vector<8x1xf32>
    %cst_12 = arith.constant 1.280000e+02 : f32
    %30 = vector.broadcast %cst_12 : f32 to vector<8x1xf32>
    %31 = arith.divf %29, %30 : vector<8x1xf32>
    %32 = arith.mulf %2, %2 : vector<8x128xf32>
    %cst_13 = arith.constant dense<0.000000e+00> : vector<8xf32>
    %33 = vector.multi_reduction <add>, %32, %cst_13 [1] : vector<8x128xf32> to vector<8xf32>
    %34 = vector.shape_cast %33 : vector<8xf32> to vector<8x1xf32>
    %cst_14 = arith.constant 1.280000e+02 : f32
    %35 = vector.broadcast %cst_14 : f32 to vector<8x1xf32>
    %36 = arith.divf %34, %35 : vector<8x1xf32>
    %37 = arith.mulf %31, %31 : vector<8x1xf32>
    %38 = arith.subf %36, %37 : vector<8x1xf32>
    %39 = vector.broadcast %31 : vector<8x1xf32> to vector<8x128xf32>
    %40 = arith.subf %2, %39 : vector<8x128xf32>
    %cst_15 = arith.constant 9.99999974E-6 : f32
    %41 = vector.broadcast %cst_15 : f32 to vector<8x1xf32>
    %42 = arith.addf %38, %41 : vector<8x1xf32>
    %43 = math.rsqrt %42 : vector<8x1xf32>
    %44 = vector.broadcast %43 : vector<8x1xf32> to vector<8x128xf32>
    %45 = arith.mulf %40, %44 : vector<8x128xf32>
    %46 = vector.broadcast %3 : vector<1x128xf32> to vector<8x128xf32>
    %47 = arith.mulf %45, %46 : vector<8x128xf32>
    %48 = vector.broadcast %4 : vector<1x128xf32> to vector<8x128xf32>
    %49 = arith.addf %47, %48 : vector<8x128xf32>
    %50 = arith.truncf %49 : vector<8x128xf32> to vector<8x128xbf16>
    %c0_16 = arith.constant 0 : index
    %c0_17 = arith.constant 0 : index
    %51 = vector.load %arg5[%c0_16, %c0_17] : memref<128x384xbf16, #tpu.memory_space<vmem>>, vector<128x384xbf16>
    %cst_18 = arith.constant dense<0.000000e+00> : vector<8x384xf32>
    %52 = tpu.matmul %50, %51, %cst_18 {dimension_numbers = #tpu.dot_dimension_numbers<[1], [0], [0], [1], [0, 0, 1, 1], [], []>} : vector<8x128xbf16>, vector<128x384xbf16>, vector<8x384xf32> -> vector<8x384xf32>
    %53 = vector.extract_strided_slice %51 {offsets = [0, 128], sizes = [128, 256], strides = [1, 1]} : vector<128x384xbf16> to vector<128x256xbf16>
    %cst_19 = arith.constant dense<0.000000e+00> : vector<64x256xf32>
    %54 = tpu.matmul %27, %53, %cst_19 {dimension_numbers = #tpu.dot_dimension_numbers<[1], [0], [0], [1], [0, 0, 1, 1], [], []>} : vector<64x128xbf16>, vector<128x256xbf16>, vector<64x256xf32> -> vector<64x256xf32>
    %55 = vector.extract_strided_slice %52 {offsets = [0, 0], sizes = [8, 128], strides = [1, 1]} : vector<8x384xf32> to vector<8x128xf32>
    %cst_20 = arith.constant 0.176776692 : f32
    %56 = vector.broadcast %cst_20 : f32 to vector<8x128xf32>
    %57 = arith.mulf %55, %56 : vector<8x128xf32>
    %58 = vector.extract_strided_slice %52 {offsets = [0, 128], sizes = [8, 128], strides = [1, 1]} : vector<8x384xf32> to vector<8x128xf32>
    %59 = vector.extract_strided_slice %52 {offsets = [0, 256], sizes = [8, 128], strides = [1, 1]} : vector<8x384xf32> to vector<8x128xf32>
    %60 = vector.shape_cast %54 : vector<64x256xf32> to vector<8x8x256xf32>
    %61 = vector.extract_strided_slice %60 {offsets = [0, 0, 0], sizes = [8, 8, 128], strides = [1, 1, 1]} : vector<8x8x256xf32> to vector<8x8x128xf32>
    %62 = vector.extract_strided_slice %60 {offsets = [0, 0, 128], sizes = [8, 8, 128], strides = [1, 1, 1]} : vector<8x8x256xf32> to vector<8x8x128xf32>
    %c0_21 = arith.constant 0 : index
    %c0_22 = arith.constant 0 : index
    %63 = vector.load %arg6[%c0_21, %c0_22] : memref<128x1xf32, #tpu.memory_space<vmem>>, vector<128x1xf32>
    %c0_23 = arith.constant 0 : index
    %c0_24 = arith.constant 0 : index
    %64 = vector.load %arg7[%c0_23, %c0_24] : memref<1x128xf32, #tpu.memory_space<vmem>>, vector<1x128xf32>
    %65 = vector.broadcast %63 : vector<128x1xf32> to vector<128x128xf32>
    %66 = vector.broadcast %64 : vector<1x128xf32> to vector<128x128xf32>
    %67 = arith.cmpf oeq, %65, %66 : vector<128x128xf32>
    %68 = arith.extui %67 : vector<128x128xi1> to vector<128x128xi32>
    %69 = arith.sitofp %68 : vector<128x128xi32> to vector<128x128xf32>
    %70 = arith.truncf %69 : vector<128x128xf32> to vector<128x128xbf16>
    %71 = arith.mulf %57, %58 : vector<8x128xf32>
    %72 = arith.truncf %71 : vector<8x128xf32> to vector<8x128xbf16>
    %73 = vector.shape_cast %57 : vector<8x128xf32> to vector<8x1x128xf32>
    %74 = vector.broadcast %73 : vector<8x1x128xf32> to vector<8x8x128xf32>
    %75 = arith.mulf %74, %61 : vector<8x8x128xf32>
    %76 = vector.shape_cast %75 : vector<8x8x128xf32> to vector<64x128xf32>
    %77 = arith.truncf %76 : vector<64x128xf32> to vector<64x128xbf16>
    %cst_25 = arith.constant dense<0.000000e+00> : vector<8x128xf32>
    %78 = tpu.matmul %72, %70, %cst_25 {dimension_numbers = #tpu.dot_dimension_numbers<[1], [0], [0], [1], [0, 0, 1, 1], [], []>} : vector<8x128xbf16>, vector<128x128xbf16>, vector<8x128xf32> -> vector<8x128xf32>
    %cst_26 = arith.constant dense<0.000000e+00> : vector<64x128xf32>
    %79 = tpu.matmul %77, %70, %cst_26 {dimension_numbers = #tpu.dot_dimension_numbers<[1], [0], [0], [1], [0, 0, 1, 1], [], []>} : vector<64x128xbf16>, vector<128x128xbf16>, vector<64x128xf32> -> vector<64x128xf32>
    %80 = vector.shape_cast %79 : vector<64x128xf32> to vector<8x8x128xf32>
    %cst_27 = arith.constant dense<0xFF800000> : vector<8x128xf32>
    %81 = vector.multi_reduction <maximumf>, %80, %cst_27 [1] : vector<8x8x128xf32> to vector<8x128xf32>
    %82 = arith.maximumf %78, %81 : vector<8x128xf32>
    %83 = arith.subf %78, %82 : vector<8x128xf32>
    %84 = math.exp %83 : vector<8x128xf32>
    %85 = vector.shape_cast %82 : vector<8x128xf32> to vector<8x1x128xf32>
    %86 = vector.broadcast %85 : vector<8x1x128xf32> to vector<8x8x128xf32>
    %87 = arith.subf %80, %86 : vector<8x8x128xf32>
    %88 = math.exp %87 : vector<8x8x128xf32>
    %cst_28 = arith.constant dense<0.000000e+00> : vector<8x128xf32>
    %89 = vector.multi_reduction <add>, %88, %cst_28 [1] : vector<8x8x128xf32> to vector<8x128xf32>
    %90 = arith.addf %84, %89 : vector<8x128xf32>
    %91 = tpu.reciprocal %90 {approx = true} : vector<8x128xf32> -> vector<8x128xf32>
    %92 = arith.mulf %84, %59 : vector<8x128xf32>
    %93 = arith.mulf %88, %62 : vector<8x8x128xf32>
    %cst_29 = arith.constant dense<0.000000e+00> : vector<8x128xf32>
    %94 = vector.multi_reduction <add>, %93, %cst_29 [1] : vector<8x8x128xf32> to vector<8x128xf32>
    %95 = arith.addf %92, %94 : vector<8x128xf32>
    %96 = arith.mulf %95, %91 : vector<8x128xf32>
    %97 = arith.truncf %96 : vector<8x128xf32> to vector<8x128xbf16>
    %c0_30 = arith.constant 0 : index
    %c0_31 = arith.constant 0 : index
    %98 = vector.load %arg8[%c0_30, %c0_31] : memref<128x128xbf16, #tpu.memory_space<vmem>>, vector<128x128xbf16>
    %cst_32 = arith.constant dense<0.000000e+00> : vector<8x128xf32>
    %99 = tpu.matmul %97, %98, %cst_32 {dimension_numbers = #tpu.dot_dimension_numbers<[1], [0], [0], [1], [0, 0, 1, 1], [], []>} : vector<8x128xbf16>, vector<128x128xbf16>, vector<8x128xf32> -> vector<8x128xf32>
    %c0_33 = arith.constant 0 : index
    %c0_34 = arith.constant 0 : index
    %100 = vector.load %arg9[%c0_33, %c0_34] : memref<1x128xf32, #tpu.memory_space<vmem>>, vector<1x128xf32>
    %101 = vector.broadcast %100 : vector<1x128xf32> to vector<8x128xf32>
    %102 = arith.addf %99, %101 : vector<8x128xf32>
    %c0_35 = arith.constant 0 : index
    %c0_36 = arith.constant 0 : index
    %103 = vector.load %arg16[%c0_35, %c0_36] : memref<1x128xf32, #tpu.memory_space<vmem>>, vector<1x128xf32>
    %104 = vector.broadcast %103 : vector<1x128xf32> to vector<8x128xf32>
    %105 = arith.mulf %104, %102 : vector<8x128xf32>
    %106 = arith.addf %2, %105 : vector<8x128xf32>
    %c0_37 = arith.constant 0 : index
    %c0_38 = arith.constant 0 : index
    %107 = vector.load %arg10[%c0_37, %c0_38] : memref<1x128xf32, #tpu.memory_space<vmem>>, vector<1x128xf32>
    %c0_39 = arith.constant 0 : index
    %c0_40 = arith.constant 0 : index
    %108 = vector.load %arg11[%c0_39, %c0_40] : memref<1x128xf32, #tpu.memory_space<vmem>>, vector<1x128xf32>
    %cst_41 = arith.constant dense<0.000000e+00> : vector<8xf32>
    %109 = vector.multi_reduction <add>, %106, %cst_41 [1] : vector<8x128xf32> to vector<8xf32>
    %110 = vector.shape_cast %109 : vector<8xf32> to vector<8x1xf32>
    %cst_42 = arith.constant 1.280000e+02 : f32
    %111 = vector.broadcast %cst_42 : f32 to vector<8x1xf32>
    %112 = arith.divf %110, %111 : vector<8x1xf32>
    %113 = arith.mulf %106, %106 : vector<8x128xf32>
    %cst_43 = arith.constant dense<0.000000e+00> : vector<8xf32>
    %114 = vector.multi_reduction <add>, %113, %cst_43 [1] : vector<8x128xf32> to vector<8xf32>
    %115 = vector.shape_cast %114 : vector<8xf32> to vector<8x1xf32>
    %cst_44 = arith.constant 1.280000e+02 : f32
    %116 = vector.broadcast %cst_44 : f32 to vector<8x1xf32>
    %117 = arith.divf %115, %116 : vector<8x1xf32>
    %118 = arith.mulf %112, %112 : vector<8x1xf32>
    %119 = arith.subf %117, %118 : vector<8x1xf32>
    %120 = vector.broadcast %112 : vector<8x1xf32> to vector<8x128xf32>
    %121 = arith.subf %106, %120 : vector<8x128xf32>
    %cst_45 = arith.constant 9.99999974E-6 : f32
    %122 = vector.broadcast %cst_45 : f32 to vector<8x1xf32>
    %123 = arith.addf %119, %122 : vector<8x1xf32>
    %124 = math.rsqrt %123 : vector<8x1xf32>
    %125 = vector.broadcast %124 : vector<8x1xf32> to vector<8x128xf32>
    %126 = arith.mulf %121, %125 : vector<8x128xf32>
    %127 = vector.broadcast %107 : vector<1x128xf32> to vector<8x128xf32>
    %128 = arith.mulf %126, %127 : vector<8x128xf32>
    %129 = vector.broadcast %108 : vector<1x128xf32> to vector<8x128xf32>
    %130 = arith.addf %128, %129 : vector<8x128xf32>
    %131 = arith.truncf %130 : vector<8x128xf32> to vector<8x128xbf16>
    %c0_46 = arith.constant 0 : index
    %c0_47 = arith.constant 0 : index
    %132 = vector.load %arg12[%c0_46, %c0_47] : memref<128x512xbf16, #tpu.memory_space<vmem>>, vector<128x512xbf16>
    %cst_48 = arith.constant dense<0.000000e+00> : vector<8x512xf32>
    %133 = tpu.matmul %131, %132, %cst_48 {dimension_numbers = #tpu.dot_dimension_numbers<[1], [0], [0], [1], [0, 0, 1, 1], [], []>} : vector<8x128xbf16>, vector<128x512xbf16>, vector<8x512xf32> -> vector<8x512xf32>
    %c0_49 = arith.constant 0 : index
    %c0_50 = arith.constant 0 : index
    %134 = vector.load %arg13[%c0_49, %c0_50] : memref<1x512xf32, #tpu.memory_space<vmem>>, vector<1x512xf32>
    %135 = vector.broadcast %134 : vector<1x512xf32> to vector<8x512xf32>
    %136 = arith.addf %133, %135 : vector<8x512xf32>
    %137 = arith.mulf %136, %136 : vector<8x512xf32>
    %138 = arith.mulf %136, %137 : vector<8x512xf32>
    %cst_51 = arith.constant 4.471500e-02 : f32
    %139 = vector.broadcast %cst_51 : f32 to vector<8x512xf32>
    %140 = arith.mulf %139, %138 : vector<8x512xf32>
    %141 = arith.addf %136, %140 : vector<8x512xf32>
    %cst_52 = arith.constant 0.797884583 : f32
    %142 = vector.broadcast %cst_52 : f32 to vector<8x512xf32>
    %143 = arith.mulf %142, %141 : vector<8x512xf32>
    %144 = math.tanh %143 : vector<8x512xf32>
    %cst_53 = arith.constant 1.000000e+00 : f32
    %145 = vector.broadcast %cst_53 : f32 to vector<8x512xf32>
    %146 = arith.addf %145, %144 : vector<8x512xf32>
    %cst_54 = arith.constant 5.000000e-01 : f32
    %147 = vector.broadcast %cst_54 : f32 to vector<8x512xf32>
    %148 = arith.mulf %147, %146 : vector<8x512xf32>
    %149 = arith.mulf %136, %148 : vector<8x512xf32>
    %150 = arith.truncf %149 : vector<8x512xf32> to vector<8x512xbf16>
    %c0_55 = arith.constant 0 : index
    %c0_56 = arith.constant 0 : index
    %151 = vector.load %arg14[%c0_55, %c0_56] : memref<512x128xbf16, #tpu.memory_space<vmem>>, vector<512x128xbf16>
    %cst_57 = arith.constant dense<0.000000e+00> : vector<8x128xf32>
    %152 = tpu.matmul %150, %151, %cst_57 {dimension_numbers = #tpu.dot_dimension_numbers<[1], [0], [0], [1], [0, 0, 1, 1], [], []>} : vector<8x512xbf16>, vector<512x128xbf16>, vector<8x128xf32> -> vector<8x128xf32>
    %c0_58 = arith.constant 0 : index
    %c0_59 = arith.constant 0 : index
    %153 = vector.load %arg15[%c0_58, %c0_59] : memref<1x128xf32, #tpu.memory_space<vmem>>, vector<1x128xf32>
    %154 = vector.broadcast %153 : vector<1x128xf32> to vector<8x128xf32>
    %155 = arith.addf %152, %154 : vector<8x128xf32>
    %c0_60 = arith.constant 0 : index
    %c0_61 = arith.constant 0 : index
    %156 = vector.load %arg17[%c0_60, %c0_61] : memref<1x128xf32, #tpu.memory_space<vmem>>, vector<1x128xf32>
    %157 = vector.broadcast %156 : vector<1x128xf32> to vector<8x128xf32>
    %158 = arith.mulf %157, %155 : vector<8x128xf32>
    %159 = arith.addf %106, %158 : vector<8x128xf32>
    %c0_62 = arith.constant 0 : index
    %c0_63 = arith.constant 0 : index
    %160 = vector.load %arg18[%c0_62, %c0_63] : memref<8x128xf32, #tpu.memory_space<vmem>>, vector<8x128xf32>
    tpu.vector_store %arg18[%c0_62, %c0_63], %159 {strides = array<i32>} : memref<8x128xf32, #tpu.memory_space<vmem>>, vector<8x128xf32>,
    return
  }
  func.func @transform_0(%arg0: i32) -> (i32, i32) {
    %c0_i32 = arith.constant 0 : i32
    %c0_i32_0 = arith.constant 0 : i32
    return %arg0, %c0_i32 : i32, i32
  }
  func.func @transform_1(%arg0: i32) -> (i32, i32) {
    %c0_i32 = arith.constant 0 : i32
    %c0_i32_0 = arith.constant 0 : i32
    return %arg0, %c0_i32 : i32, i32
  }
  func.func @transform_2(%arg0: i32) -> (i32, i32) {
    %c0_i32 = arith.constant 0 : i32
    %c0_i32_0 = arith.constant 0 : i32
    %c0_i32_1 = arith.constant 0 : i32
    return %c0_i32, %c0_i32_0 : i32, i32
  }
  func.func @transform_3(%arg0: i32) -> (i32, i32) {
    %c0_i32 = arith.constant 0 : i32
    %c0_i32_0 = arith.constant 0 : i32
    %c0_i32_1 = arith.constant 0 : i32
    return %c0_i32, %c0_i32_0 : i32, i32
  }
  func.func @transform_4(%arg0: i32) -> (i32, i32) {
    %c0_i32 = arith.constant 0 : i32
    %c0_i32_0 = arith.constant 0 : i32
    %c0_i32_1 = arith.constant 0 : i32
    return %c0_i32, %c0_i32_0 : i32, i32
  }
  func.func @transform_5(%arg0: i32) -> (i32, i32) {
    %c0_i32 = arith.constant 0 : i32
    %c0_i32_0 = arith.constant 0 : i32
    %c0_i32_1 = arith.constant 0 : i32
    return %c0_i32, %c0_i32_0 : i32, i32
  }
  func.func @transform_6(%arg0: i32) -> (i32, i32) {
    %c0_i32 = arith.constant 0 : i32
    %c0_i32_0 = arith.constant 0 : i32
    %c0_i32_1 = arith.constant 0 : i32
    return %c0_i32, %c0_i32_0 : i32, i32
  }
  func.func @transform_7(%arg0: i32) -> (i32, i32) {
    %c0_i32 = arith.constant 0 : i32
    %c0_i32_0 = arith.constant 0 : i32
    %c0_i32_1 = arith.constant 0 : i32
    return %c0_i32, %c0_i32_0 : i32, i32
  }
  func.func @transform_8(%arg0: i32) -> (i32, i32) {
    %c0_i32 = arith.constant 0 : i32
    %c0_i32_0 = arith.constant 0 : i32
    %c0_i32_1 = arith.constant 0 : i32
    return %c0_i32, %c0_i32_0 : i32, i32
  }
  func.func @transform_9(%arg0: i32) -> (i32, i32) {
    %c0_i32 = arith.constant 0 : i32
    %c0_i32_0 = arith.constant 0 : i32
    %c0_i32_1 = arith.constant 0 : i32
    return %c0_i32, %c0_i32_0 : i32, i32
  }
  func.func @transform_10(%arg0: i32) -> (i32, i32) {
    %c0_i32 = arith.constant 0 : i32
    %c0_i32_0 = arith.constant 0 : i32
    %c0_i32_1 = arith.constant 0 : i32
    return %c0_i32, %c0_i32_0 : i32, i32
  }
  func.func @transform_11(%arg0: i32) -> (i32, i32) {
    %c0_i32 = arith.constant 0 : i32
    %c0_i32_0 = arith.constant 0 : i32
    %c0_i32_1 = arith.constant 0 : i32
    return %c0_i32, %c0_i32_0 : i32, i32
  }
  func.func @transform_12(%arg0: i32) -> (i32, i32) {
    %c0_i32 = arith.constant 0 : i32
    %c0_i32_0 = arith.constant 0 : i32
    %c0_i32_1 = arith.constant 0 : i32
    return %c0_i32, %c0_i32_0 : i32, i32
  }
  func.func @transform_13(%arg0: i32) -> (i32, i32) {
    %c0_i32 = arith.constant 0 : i32
    %c0_i32_0 = arith.constant 0 : i32
    %c0_i32_1 = arith.constant 0 : i32
    return %c0_i32, %c0_i32_0 : i32, i32
  }
  func.func @transform_14(%arg0: i32) -> (i32, i32) {
    %c0_i32 = arith.constant 0 : i32
    %c0_i32_0 = arith.constant 0 : i32
    %c0_i32_1 = arith.constant 0 : i32
    return %c0_i32, %c0_i32_0 : i32, i32
  }
  func.func @transform_15(%arg0: i32) -> (i32, i32) {
    %c0_i32 = arith.constant 0 : i32
    %c0_i32_0 = arith.constant 0 : i32
    %c0_i32_1 = arith.constant 0 : i32
    return %c0_i32, %c0_i32_0 : i32, i32
  }
  func.func @transform_16(%arg0: i32) -> (i32, i32) {
    %c0_i32 = arith.constant 0 : i32
    %c0_i32_0 = arith.constant 0 : i32
    %c0_i32_1 = arith.constant 0 : i32
    return %c0_i32, %c0_i32_0 : i32, i32
  }
  func.func @transform_17(%arg0: i32) -> (i32, i32) {
    %c0_i32 = arith.constant 0 : i32
    %c0_i32_0 = arith.constant 0 : i32
    return %arg0, %c0_i32 : i32, i32
  }
}

module attributes {stable_mosaic.version = 11 : i64} {
  func.func @_block_ca_kernel(%arg0: i32, %arg1: memref<64x128xbf16, #tpu.memory_space<vmem>>, %arg2: memref<8x128xf32, #tpu.memory_space<vmem>>, %arg3: memref<1x128xf32, #tpu.memory_space<vmem>>, %arg4: memref<1x128xf32, #tpu.memory_space<vmem>>, %arg5: memref<128x384xbf16, #tpu.memory_space<vmem>>, %arg6: memref<128x1xf32, #tpu.memory_space<vmem>>, %arg7: memref<1x128xf32, #tpu.memory_space<vmem>>, %arg8: memref<128x128xbf16, #tpu.memory_space<vmem>>, %arg9: memref<1x128xf32, #tpu.memory_space<vmem>>, %arg10: memref<1x128xf32, #tpu.memory_space<vmem>>, %arg11: memref<1x128xf32, #tpu.memory_space<vmem>>, %arg12: memref<128x512xbf16, #tpu.memory_space<vmem>>, %arg13: memref<1x512xf32, #tpu.memory_space<vmem>>, %arg14: memref<512x128xbf16, #tpu.memory_space<vmem>>, %arg15: memref<1x128xf32, #tpu.memory_space<vmem>>, %arg16: memref<1x128xf32, #tpu.memory_space<vmem>>, %arg17: memref<1x128xf32, #tpu.memory_space<vmem>>, %arg18: memref<8x128xf32, #tpu.memory_space<vmem>>) attributes {dimension_semantics = [#tpu.dimension_semantics<parallel>], iteration_bounds = array<i64: 2>, scalar_prefetch = 0 : i64, scratch_operands = 0 : i64, tpu.core_type = #tpu.core_type<tc>, window_params = [{transform_indices = @transform_0, window_bounds = array<i64: 64, 128>}, {transform_indices = @transform_1, window_bounds = array<i64: 8, 128>}, {pipeline_mode = #tpu.pipeline_mode<synchronous>, transform_indices = @transform_2, window_bounds = array<i64: 1, 128>}, {pipeline_mode = #tpu.pipeline_mode<synchronous>, transform_indices = @transform_3, window_bounds = array<i64: 1, 128>}, {pipeline_mode = #tpu.pipeline_mode<synchronous>, transform_indices = @transform_4, window_bounds = array<i64: 128, 384>}, {pipeline_mode = #tpu.pipeline_mode<synchronous>, transform_indices = @transform_5, window_bounds = array<i64: 128, 1>}, {pipeline_mode = #tpu.pipeline_mode<synchronous>, transform_indices = @transform_6, window_bounds = array<i64: 1, 128>}, {pipeline_mode = #tpu.pipeline_mode<synchronous>, transform_indices = @transform_7, window_bounds = array<i64: 128, 128>}, {pipeline_mode = #tpu.pipeline_mode<synchronous>, transform_indices = @transform_8, window_bounds = array<i64: 1, 128>}, {pipeline_mode = #tpu.pipeline_mode<synchronous>, transform_indices = @transform_9, window_bounds = array<i64: 1, 128>}, {pipeline_mode = #tpu.pipeline_mode<synchronous>, transform_indices = @transform_10, window_bounds = array<i64: 1, 128>}, {pipeline_mode = #tpu.pipeline_mode<synchronous>, transform_indices = @transform_11, window_bounds = array<i64: 128, 512>}, {pipeline_mode = #tpu.pipeline_mode<synchronous>, transform_indices = @transform_12, window_bounds = array<i64: 1, 512>}, {pipeline_mode = #tpu.pipeline_mode<synchronous>, transform_indices = @transform_13, window_bounds = array<i64: 512, 128>}, {pipeline_mode = #tpu.pipeline_mode<synchronous>, transform_indices = @transform_14, window_bounds = array<i64: 1, 128>}, {pipeline_mode = #tpu.pipeline_mode<synchronous>, transform_indices = @transform_15, window_bounds = array<i64: 1, 128>}, {pipeline_mode = #tpu.pipeline_mode<synchronous>, transform_indices = @transform_16, window_bounds = array<i64: 1, 128>}, {transform_indices = @transform_17, window_bounds = array<i64: 8, 128>}]} {
    %c0 = arith.constant 0 : index
    %c0_0 = arith.constant 0 : index
    %0 = vector.load %arg1[%c0, %c0_0] : memref<64x128xbf16, #tpu.memory_space<vmem>>, vector<64x128xbf16>
    %1 = arith.extf %0 : vector<64x128xbf16> to vector<64x128xf32>
    %c0_1 = arith.constant 0 : index
    %c0_2 = arith.constant 0 : index
    %2 = vector.load %arg2[%c0_1, %c0_2] : memref<8x128xf32, #tpu.memory_space<vmem>>, vector<8x128xf32>
    %c0_3 = arith.constant 0 : index
    %c0_4 = arith.constant 0 : index
    %3 = vector.load %arg3[%c0_3, %c0_4] : memref<1x128xf32, #tpu.memory_space<vmem>>, vector<1x128xf32>
    %c0_5 = arith.constant 0 : index
    %c0_6 = arith.constant 0 : index
    %4 = vector.load %arg4[%c0_5, %c0_6] : memref<1x128xf32, #tpu.memory_space<vmem>>, vector<1x128xf32>
    %cst = arith.constant dense<0.000000e+00> : vector<64xf32>
    %5 = vector.multi_reduction <add>, %1, %cst [1] : vector<64x128xf32> to vector<64xf32>
    %6 = vector.shape_cast %5 : vector<64xf32> to vector<64x1xf32>
    %cst_7 = arith.constant 1.280000e+02 : f32
    %7 = vector.broadcast %cst_7 : f32 to vector<64x1xf32>
    %8 = arith.divf %6, %7 : vector<64x1xf32>
    %9 = arith.mulf %1, %1 : vector<64x128xf32>
    %cst_8 = arith.constant dense<0.000000e+00> : vector<64xf32>
    %10 = vector.multi_reduction <add>, %9, %cst_8 [1] : vector<64x128xf32> to vector<64xf32>
    %11 = vector.shape_cast %10 : vector<64xf32> to vector<64x1xf32>
    %cst_9 = arith.constant 1.280000e+02 : f32
    %12 = vector.broadcast %cst_9 : f32 to vector<64x1xf32>
    %13 = arith.divf %11, %12 : vector<64x1xf32>
    %14 = arith.mulf %8, %8 : vector<64x1xf32>
    %15 = arith.subf %13, %14 : vector<64x1xf32>
    %16 = vector.broadcast %8 : vector<64x1xf32> to vector<64x128xf32>
    %17 = arith.subf %1, %16 : vector<64x128xf32>
    %cst_10 = arith.constant 9.99999974E-6 : f32
    %18 = vector.broadcast %cst_10 : f32 to vector<64x1xf32>
    %19 = arith.addf %15, %18 : vector<64x1xf32>
    %20 = math.rsqrt %19 : vector<64x1xf32>
    %21 = vector.broadcast %20 : vector<64x1xf32> to vector<64x128xf32>
    %22 = arith.mulf %17, %21 : vector<64x128xf32>
    %23 = vector.broadcast %3 : vector<1x128xf32> to vector<64x128xf32>
    %24 = arith.mulf %22, %23 : vector<64x128xf32>
    %25 = vector.broadcast %4 : vector<1x128xf32> to vector<64x128xf32>
    %26 = arith.addf %24, %25 : vector<64x128xf32>
    %27 = arith.truncf %26 : vector<64x128xf32> to vector<64x128xbf16>
    %cst_11 = arith.constant dense<0.000000e+00> : vector<8xf32>
    %28 = vector.multi_reduction <add>, %2, %cst_11 [1] : vector<8x128xf32> to vector<8xf32>
    %29 = vector.shape_cast %28 : vector<8xf32> to vector<8x1xf32>
    %cst_12 = arith.constant 1.280000e+02 : f32
    %30 = vector.broadcast %cst_12 : f32 to vector<8x1xf32>
    %31 = arith.divf %29, %30 : vector<8x1xf32>
    %32 = arith.mulf %2, %2 : vector<8x128xf32>
    %cst_13 = arith.constant dense<0.000000e+00> : vector<8xf32>
    %33 = vector.multi_reduction <add>, %32, %cst_13 [1] : vector<8x128xf32> to vector<8xf32>
    %34 = vector.shape_cast %33 : vector<8xf32> to vector<8x1xf32>
    %cst_14 = arith.constant 1.280000e+02 : f32
    %35 = vector.broadcast %cst_14 : f32 to vector<8x1xf32>
    %36 = arith.divf %34, %35 : vector<8x1xf32>
    %37 = arith.mulf %31, %31 : vector<8x1xf32>
    %38 = arith.subf %36, %37 : vector<8x1xf32>
    %39 = vector.broadcast %31 : vector<8x1xf32> to vector<8x128xf32>
    %40 = arith.subf %2, %39 : vector<8x128xf32>
    %cst_15 = arith.constant 9.99999974E-6 : f32
    %41 = vector.broadcast %cst_15 : f32 to vector<8x1xf32>
    %42 = arith.addf %38, %41 : vector<8x1xf32>
    %43 = math.rsqrt %42 : vector<8x1xf32>
    %44 = vector.broadcast %43 : vector<8x1xf32> to vector<8x128xf32>
    %45 = arith.mulf %40, %44 : vector<8x128xf32>
    %46 = vector.broadcast %3 : vector<1x128xf32> to vector<8x128xf32>
    %47 = arith.mulf %45, %46 : vector<8x128xf32>
    %48 = vector.broadcast %4 : vector<1x128xf32> to vector<8x128xf32>
    %49 = arith.addf %47, %48 : vector<8x128xf32>
    %50 = arith.truncf %49 : vector<8x128xf32> to vector<8x128xbf16>
    %c0_16 = arith.constant 0 : index
    %c0_17 = arith.constant 0 : index
    %51 = vector.load %arg5[%c0_16, %c0_17] : memref<128x384xbf16, #tpu.memory_space<vmem>>, vector<128x384xbf16>
    %cst_18 = arith.constant dense<0.000000e+00> : vector<8x384xf32>
    %52 = tpu.matmul %50, %51, %cst_18 {dimension_numbers = #tpu.dot_dimension_numbers<[1], [0], [0], [1], [0, 0, 1, 1], [], []>} : vector<8x128xbf16>, vector<128x384xbf16>, vector<8x384xf32> -> vector<8x384xf32>
    %53 = vector.extract_strided_slice %51 {offsets = [0, 128], sizes = [128, 256], strides = [1, 1]} : vector<128x384xbf16> to vector<128x256xbf16>
    %cst_19 = arith.constant dense<0.000000e+00> : vector<64x256xf32>
    %54 = tpu.matmul %27, %53, %cst_19 {dimension_numbers = #tpu.dot_dimension_numbers<[1], [0], [0], [1], [0, 0, 1, 1], [], []>} : vector<64x128xbf16>, vector<128x256xbf16>, vector<64x256xf32> -> vector<64x256xf32>
    %55 = vector.extract_strided_slice %52 {offsets = [0, 0], sizes = [8, 128], strides = [1, 1]} : vector<8x384xf32> to vector<8x128xf32>
    %cst_20 = arith.constant 0.176776692 : f32
    %56 = vector.broadcast %cst_20 : f32 to vector<8x128xf32>
    %57 = arith.mulf %55, %56 : vector<8x128xf32>
    %58 = vector.extract_strided_slice %52 {offsets = [0, 128], sizes = [8, 128], strides = [1, 1]} : vector<8x384xf32> to vector<8x128xf32>
    %59 = vector.extract_strided_slice %52 {offsets = [0, 256], sizes = [8, 128], strides = [1, 1]} : vector<8x384xf32> to vector<8x128xf32>
    %60 = vector.shape_cast %54 : vector<64x256xf32> to vector<8x8x256xf32>
    %61 = vector.extract_strided_slice %60 {offsets = [0, 0, 0], sizes = [8, 8, 128], strides = [1, 1, 1]} : vector<8x8x256xf32> to vector<8x8x128xf32>
    %62 = vector.extract_strided_slice %60 {offsets = [0, 0, 128], sizes = [8, 8, 128], strides = [1, 1, 1]} : vector<8x8x256xf32> to vector<8x8x128xf32>
    %c0_21 = arith.constant 0 : index
    %c0_22 = arith.constant 0 : index
    %63 = vector.load %arg6[%c0_21, %c0_22] : memref<128x1xf32, #tpu.memory_space<vmem>>, vector<128x1xf32>
    %c0_23 = arith.constant 0 : index
    %c0_24 = arith.constant 0 : index
    %64 = vector.load %arg7[%c0_23, %c0_24] : memref<1x128xf32, #tpu.memory_space<vmem>>, vector<1x128xf32>
    %65 = vector.broadcast %63 : vector<128x1xf32> to vector<128x128xf32>
    %66 = vector.broadcast %64 : vector<1x128xf32> to vector<128x128xf32>
    %67 = arith.cmpf oeq, %65, %66 : vector<128x128xf32>
    %68 = arith.extui %67 : vector<128x128xi1> to vector<128x128xi32>
    %69 = arith.sitofp %68 : vector<128x128xi32> to vector<128x128xf32>
    %70 = arith.truncf %69 : vector<128x128xf32> to vector<128x128xbf16>
    %71 = arith.mulf %57, %58 : vector<8x128xf32>
    %72 = arith.truncf %71 : vector<8x128xf32> to vector<8x128xbf16>
    %73 = vector.shape_cast %57 : vector<8x128xf32> to vector<8x1x128xf32>
    %74 = vector.broadcast %73 : vector<8x1x128xf32> to vector<8x8x128xf32>
    %75 = arith.mulf %74, %61 : vector<8x8x128xf32>
    %76 = vector.shape_cast %75 : vector<8x8x128xf32> to vector<64x128xf32>
    %77 = arith.truncf %76 : vector<64x128xf32> to vector<64x128xbf16>
    %cst_25 = arith.constant dense<0.000000e+00> : vector<8x128xf32>
    %78 = tpu.matmul %72, %70, %cst_25 {dimension_numbers = #tpu.dot_dimension_numbers<[1], [0], [0], [1], [0, 0, 1, 1], [], []>} : vector<8x128xbf16>, vector<128x128xbf16>, vector<8x128xf32> -> vector<8x128xf32>
    %cst_26 = arith.constant dense<0.000000e+00> : vector<64x128xf32>
    %79 = tpu.matmul %77, %70, %cst_26 {dimension_numbers = #tpu.dot_dimension_numbers<[1], [0], [0], [1], [0, 0, 1, 1], [], []>} : vector<64x128xbf16>, vector<128x128xbf16>, vector<64x128xf32> -> vector<64x128xf32>
    %80 = vector.shape_cast %79 : vector<64x128xf32> to vector<8x8x128xf32>
    %cst_27 = arith.constant dense<0xFF800000> : vector<8x128xf32>
    %81 = vector.multi_reduction <maximumf>, %80, %cst_27 [1] : vector<8x8x128xf32> to vector<8x128xf32>
    %82 = arith.maximumf %78, %81 : vector<8x128xf32>
    %83 = arith.subf %78, %82 : vector<8x128xf32>
    %84 = math.exp %83 : vector<8x128xf32>
    %85 = vector.shape_cast %82 : vector<8x128xf32> to vector<8x1x128xf32>
    %86 = vector.broadcast %85 : vector<8x1x128xf32> to vector<8x8x128xf32>
    %87 = arith.subf %80, %86 : vector<8x8x128xf32>
    %88 = math.exp %87 : vector<8x8x128xf32>
    %cst_28 = arith.constant dense<0.000000e+00> : vector<8x128xf32>
    %89 = vector.multi_reduction <add>, %88, %cst_28 [1] : vector<8x8x128xf32> to vector<8x128xf32>
    %90 = arith.addf %84, %89 : vector<8x128xf32>
    %91 = tpu.reciprocal %90 {approx = true} : vector<8x128xf32> -> vector<8x128xf32>
    %92 = arith.mulf %84, %59 : vector<8x128xf32>
    %93 = arith.mulf %88, %62 : vector<8x8x128xf32>
    %cst_29 = arith.constant dense<0.000000e+00> : vector<8x128xf32>
    %94 = vector.multi_reduction <add>, %93, %cst_29 [1] : vector<8x8x128xf32> to vector<8x128xf32>
    %95 = arith.addf %92, %94 : vector<8x128xf32>
    %96 = arith.mulf %95, %91 : vector<8x128xf32>
    %97 = arith.truncf %96 : vector<8x128xf32> to vector<8x128xbf16>
    %c0_30 = arith.constant 0 : index
    %c0_31 = arith.constant 0 : index
    %98 = vector.load %arg8[%c0_30, %c0_31] : memref<128x128xbf16, #tpu.memory_space<vmem>>, vector<128x128xbf16>
    %cst_32 = arith.constant dense<0.000000e+00> : vector<8x128xf32>
    %99 = tpu.matmul %97, %98, %cst_32 {dimension_numbers = #tpu.dot_dimension_numbers<[1], [0], [0], [1], [0, 0, 1, 1], [], []>} : vector<8x128xbf16>, vector<128x128xbf16>, vector<8x128xf32> -> vector<8x128xf32>
    %c0_33 = arith.constant 0 : index
    %c0_34 = arith.constant 0 : index
    %100 = vector.load %arg9[%c0_33, %c0_34] : memref<1x128xf32, #tpu.memory_space<vmem>>, vector<1x128xf32>
    %101 = vector.broadcast %100 : vector<1x128xf32> to vector<8x128xf32>
    %102 = arith.addf %99, %101 : vector<8x128xf32>
    %c0_35 = arith.constant 0 : index
    %c0_36 = arith.constant 0 : index
    %103 = vector.load %arg16[%c0_35, %c0_36] : memref<1x128xf32, #tpu.memory_space<vmem>>, vector<1x128xf32>
    %104 = vector.broadcast %103 : vector<1x128xf32> to vector<8x128xf32>
    %105 = arith.mulf %104, %102 : vector<8x128xf32>
    %106 = arith.addf %2, %105 : vector<8x128xf32>
    %c0_37 = arith.constant 0 : index
    %c0_38 = arith.constant 0 : index
    %107 = vector.load %arg10[%c0_37, %c0_38] : memref<1x128xf32, #tpu.memory_space<vmem>>, vector<1x128xf32>
    %c0_39 = arith.constant 0 : index
    %c0_40 = arith.constant 0 : index
    %108 = vector.load %arg11[%c0_39, %c0_40] : memref<1x128xf32, #tpu.memory_space<vmem>>, vector<1x128xf32>
    %cst_41 = arith.constant dense<0.000000e+00> : vector<8xf32>
    %109 = vector.multi_reduction <add>, %106, %cst_41 [1] : vector<8x128xf32> to vector<8xf32>
    %110 = vector.shape_cast %109 : vector<8xf32> to vector<8x1xf32>
    %cst_42 = arith.constant 1.280000e+02 : f32
    %111 = vector.broadcast %cst_42 : f32 to vector<8x1xf32>
    %112 = arith.divf %110, %111 : vector<8x1xf32>
    %113 = arith.mulf %106, %106 : vector<8x128xf32>
    %cst_43 = arith.constant dense<0.000000e+00> : vector<8xf32>
    %114 = vector.multi_reduction <add>, %113, %cst_43 [1] : vector<8x128xf32> to vector<8xf32>
    %115 = vector.shape_cast %114 : vector<8xf32> to vector<8x1xf32>
    %cst_44 = arith.constant 1.280000e+02 : f32
    %116 = vector.broadcast %cst_44 : f32 to vector<8x1xf32>
    %117 = arith.divf %115, %116 : vector<8x1xf32>
    %118 = arith.mulf %112, %112 : vector<8x1xf32>
    %119 = arith.subf %117, %118 : vector<8x1xf32>
    %120 = vector.broadcast %112 : vector<8x1xf32> to vector<8x128xf32>
    %121 = arith.subf %106, %120 : vector<8x128xf32>
    %cst_45 = arith.constant 9.99999974E-6 : f32
    %122 = vector.broadcast %cst_45 : f32 to vector<8x1xf32>
    %123 = arith.addf %119, %122 : vector<8x1xf32>
    %124 = math.rsqrt %123 : vector<8x1xf32>
    %125 = vector.broadcast %124 : vector<8x1xf32> to vector<8x128xf32>
    %126 = arith.mulf %121, %125 : vector<8x128xf32>
    %127 = vector.broadcast %107 : vector<1x128xf32> to vector<8x128xf32>
    %128 = arith.mulf %126, %127 : vector<8x128xf32>
    %129 = vector.broadcast %108 : vector<1x128xf32> to vector<8x128xf32>
    %130 = arith.addf %128, %129 : vector<8x128xf32>
    %131 = arith.truncf %130 : vector<8x128xf32> to vector<8x128xbf16>
    %c0_46 = arith.constant 0 : index
    %c0_47 = arith.constant 0 : index
    %132 = vector.load %arg12[%c0_46, %c0_47] : memref<128x512xbf16, #tpu.memory_space<vmem>>, vector<128x512xbf16>
    %cst_48 = arith.constant dense<0.000000e+00> : vector<8x512xf32>
    %133 = tpu.matmul %131, %132, %cst_48 {dimension_numbers = #tpu.dot_dimension_numbers<[1], [0], [0], [1], [0, 0, 1, 1], [], []>} : vector<8x128xbf16>, vector<128x512xbf16>, vector<8x512xf32> -> vector<8x512xf32>
    %c0_49 = arith.constant 0 : index
    %c0_50 = arith.constant 0 : index
    %134 = vector.load %arg13[%c0_49, %c0_50] : memref<1x512xf32, #tpu.memory_space<vmem>>, vector<1x512xf32>
    %135 = vector.broadcast %134 : vector<1x512xf32> to vector<8x512xf32>
    %136 = arith.addf %133, %135 : vector<8x512xf32>
    %137 = arith.mulf %136, %136 : vector<8x512xf32>
    %138 = arith.mulf %136, %137 : vector<8x512xf32>
    %cst_51 = arith.constant 4.471500e-02 : f32
    %139 = vector.broadcast %cst_51 : f32 to vector<8x512xf32>
    %140 = arith.mulf %139, %138 : vector<8x512xf32>
    %141 = arith.addf %136, %140 : vector<8x512xf32>
    %cst_52 = arith.constant 0.797884583 : f32
    %142 = vector.broadcast %cst_52 : f32 to vector<8x512xf32>
    %143 = arith.mulf %142, %141 : vector<8x512xf32>
    %144 = math.tanh %143 : vector<8x512xf32>
    %cst_53 = arith.constant 1.000000e+00 : f32
    %145 = vector.broadcast %cst_53 : f32 to vector<8x512xf32>
    %146 = arith.addf %145, %144 : vector<8x512xf32>
    %cst_54 = arith.constant 5.000000e-01 : f32
    %147 = vector.broadcast %cst_54 : f32 to vector<8x512xf32>
    %148 = arith.mulf %147, %146 : vector<8x512xf32>
    %149 = arith.mulf %136, %148 : vector<8x512xf32>
    %150 = arith.truncf %149 : vector<8x512xf32> to vector<8x512xbf16>
    %c0_55 = arith.constant 0 : index
    %c0_56 = arith.constant 0 : index
    %151 = vector.load %arg14[%c0_55, %c0_56] : memref<512x128xbf16, #tpu.memory_space<vmem>>, vector<512x128xbf16>
    %cst_57 = arith.constant dense<0.000000e+00> : vector<8x128xf32>
    %152 = tpu.matmul %150, %151, %cst_57 {dimension_numbers = #tpu.dot_dimension_numbers<[1], [0], [0], [1], [0, 0, 1, 1], [], []>} : vector<8x512xbf16>, vector<512x128xbf16>, vector<8x128xf32> -> vector<8x128xf32>
    %c0_58 = arith.constant 0 : index
    %c0_59 = arith.constant 0 : index
    %153 = vector.load %arg15[%c0_58, %c0_59] : memref<1x128xf32, #tpu.memory_space<vmem>>, vector<1x128xf32>
    %154 = vector.broadcast %153 : vector<1x128xf32> to vector<8x128xf32>
    %155 = arith.addf %152, %154 : vector<8x128xf32>
    %c0_60 = arith.constant 0 : index
    %c0_61 = arith.constant 0 : index
    %156 = vector.load %arg17[%c0_60, %c0_61] : memref<1x128xf32, #tpu.memory_space<vmem>>, vector<1x128xf32>
    %157 = vector.broadcast %156 : vector<1x128xf32> to vector<8x128xf32>
    %158 = arith.mulf %157, %155 : vector<8x128xf32>
    %159 = arith.addf %106, %158 : vector<8x128xf32>
    %c0_62 = arith.constant 0 : index
    %c0_63 = arith.constant 0 : index
    %160 = vector.load %arg18[%c0_62, %c0_63] : memref<8x128xf32, #tpu.memory_space<vmem>>, vector<8x128xf32>
    tpu.vector_store %arg18[%c0_62, %c0_63], %159 {strides = array<i32>} : memref<8x128xf32, #tpu.memory_space<vmem>>, vector<8x128xf32>,
    return
  }
  func.func @transform_0(%arg0: i32) -> (i32, i32) {
    %c0_i32 = arith.constant 0 : i32
    %c0_i32_0 = arith.constant 0 : i32
    return %arg0, %c0_i32 : i32, i32
  }
  func.func @transform_1(%arg0: i32) -> (i32, i32) {
    %c0_i32 = arith.constant 0 : i32
    %c0_i32_0 = arith.constant 0 : i32
    return %arg0, %c0_i32 : i32, i32
  }
  func.func @transform_2(%arg0: i32) -> (i32, i32) {
    %c0_i32 = arith.constant 0 : i32
    %c0_i32_0 = arith.constant 0 : i32
    %c0_i32_1 = arith.constant 0 : i32
    return %c0_i32, %c0_i32_0 : i32, i32
  }
  func.func @transform_3(%arg0: i32) -> (i32, i32) {
    %c0_i32 = arith.constant 0 : i32
    %c0_i32_0 = arith.constant 0 : i32
    %c0_i32_1 = arith.constant 0 : i32
    return %c0_i32, %c0_i32_0 : i32, i32
  }
  func.func @transform_4(%arg0: i32) -> (i32, i32) {
    %c0_i32 = arith.constant 0 : i32
    %c0_i32_0 = arith.constant 0 : i32
    %c0_i32_1 = arith.constant 0 : i32
    return %c0_i32, %c0_i32_0 : i32, i32
  }
  func.func @transform_5(%arg0: i32) -> (i32, i32) {
    %c0_i32 = arith.constant 0 : i32
    %c0_i32_0 = arith.constant 0 : i32
    %c0_i32_1 = arith.constant 0 : i32
    return %c0_i32, %c0_i32_0 : i32, i32
  }
  func.func @transform_6(%arg0: i32) -> (i32, i32) {
    %c0_i32 = arith.constant 0 : i32
    %c0_i32_0 = arith.constant 0 : i32
    %c0_i32_1 = arith.constant 0 : i32
    return %c0_i32, %c0_i32_0 : i32, i32
  }
  func.func @transform_7(%arg0: i32) -> (i32, i32) {
    %c0_i32 = arith.constant 0 : i32
    %c0_i32_0 = arith.constant 0 : i32
    %c0_i32_1 = arith.constant 0 : i32
    return %c0_i32, %c0_i32_0 : i32, i32
  }
  func.func @transform_8(%arg0: i32) -> (i32, i32) {
    %c0_i32 = arith.constant 0 : i32
    %c0_i32_0 = arith.constant 0 : i32
    %c0_i32_1 = arith.constant 0 : i32
    return %c0_i32, %c0_i32_0 : i32, i32
  }
  func.func @transform_9(%arg0: i32) -> (i32, i32) {
    %c0_i32 = arith.constant 0 : i32
    %c0_i32_0 = arith.constant 0 : i32
    %c0_i32_1 = arith.constant 0 : i32
    return %c0_i32, %c0_i32_0 : i32, i32
  }
  func.func @transform_10(%arg0: i32) -> (i32, i32) {
    %c0_i32 = arith.constant 0 : i32
    %c0_i32_0 = arith.constant 0 : i32
    %c0_i32_1 = arith.constant 0 : i32
    return %c0_i32, %c0_i32_0 : i32, i32
  }
  func.func @transform_11(%arg0: i32) -> (i32, i32) {
    %c0_i32 = arith.constant 0 : i32
    %c0_i32_0 = arith.constant 0 : i32
    %c0_i32_1 = arith.constant 0 : i32
    return %c0_i32, %c0_i32_0 : i32, i32
  }
  func.func @transform_12(%arg0: i32) -> (i32, i32) {
    %c0_i32 = arith.constant 0 : i32
    %c0_i32_0 = arith.constant 0 : i32
    %c0_i32_1 = arith.constant 0 : i32
    return %c0_i32, %c0_i32_0 : i32, i32
  }
  func.func @transform_13(%arg0: i32) -> (i32, i32) {
    %c0_i32 = arith.constant 0 : i32
    %c0_i32_0 = arith.constant 0 : i32
    %c0_i32_1 = arith.constant 0 : i32
    return %c0_i32, %c0_i32_0 : i32, i32
  }
  func.func @transform_14(%arg0: i32) -> (i32, i32) {
    %c0_i32 = arith.constant 0 : i32
    %c0_i32_0 = arith.constant 0 : i32
    %c0_i32_1 = arith.constant 0 : i32
    return %c0_i32, %c0_i32_0 : i32, i32
  }
  func.func @transform_15(%arg0: i32) -> (i32, i32) {
    %c0_i32 = arith.constant 0 : i32
    %c0_i32_0 = arith.constant 0 : i32
    %c0_i32_1 = arith.constant 0 : i32
    return %c0_i32, %c0_i32_0 : i32, i32
  }
  func.func @transform_16(%arg0: i32) -> (i32, i32) {
    %c0_i32 = arith.constant 0 : i32
    %c0_i32_0 = arith.constant 0 : i32
    %c0_i32_1 = arith.constant 0 : i32
    return %c0_i32, %c0_i32_0 : i32, i32
  }
  func.func @transform_17(%arg0: i32) -> (i32, i32) {
    %c0_i32 = arith.constant 0 : i32
    %c0_i32_0 = arith.constant 0 : i32
    return %arg0, %c0_i32 : i32, i32
  }
}

</mosaic_0001>

<bundles_post_ra>
// kernel: tpu_custom_call.1
= control target key start
LH: loop header
LB: loop body
LE: loop exit
PB: predicated region body
PF: predicated region fallthrough
CT: control target
= control target key end

     0   :  { %s4455_s0 = inlined_call_operand.vmem [shape: bf16[128,128], index: 0, kind: input, shape index: {}]   ;;  %s4456_s1 = inlined_call_operand.hbm [shape: f32[16,128], index: 1, kind: input, shape index: {}]   ;;  %s4457_s2 = inlined_call_operand.vmem [shape: f32[1,128], index: 2, kind: input, shape index: {}]   ;;  %s4458_s3 = inlined_call_operand.vmem [shape: f32[1,128], index: 3, kind: input, shape index: {}]   ;;  %s4459_s4 = inlined_call_operand.hbm [shape: bf16[128,384], index: 4, kind: input, shape index: {}]   ;;  %s4460_s5 = inlined_call_operand.vmem [shape: f32[128,1], index: 5, kind: input, shape index: {}]   ;;  %s4461_s6 = inlined_call_operand.vmem [shape: f32[1,128], index: 6, kind: input, shape index: {}]   ;;  %s4462_s7 = inlined_call_operand.vmem [shape: bf16[128,128], index: 7, kind: input, shape index: {}]   ;;  %s4463_s8 = inlined_call_operand.vmem [shape: f32[1,128], index: 8, kind: input, shape index: {}]   ;;  %s4464_s9 = inlined_call_operand.vmem [shape: f32[1,128], index: 9, kind: input, shape index: {}]   ;;  %s4465_s10 = inlined_call_operand.vmem [shape: f32[1,128], index: 10, kind: input, shape index: {}]   ;;  %s4466_s11 = inlined_call_operand.hbm [shape: bf16[128,512], index: 11, kind: input, shape index: {}]   ;;  %s4467_s12 = inlined_call_operand.vmem [shape: f32[1,512], index: 12, kind: input, shape index: {}]   ;;  %s4468_s13 = inlined_call_operand.hbm [shape: bf16[512,128], index: 13, kind: input, shape index: {}]   ;;  %s4469_s14 = inlined_call_operand.vmem [shape: f32[1,128], index: 14, kind: input, shape index: {}]   ;;  %s4470_s15 = inlined_call_operand.vmem [shape: f32[1,128], index: 15, kind: input, shape index: {}]   ;;  %s4471_s16 = inlined_call_operand.vmem [shape: f32[1,128], index: 16, kind: input, shape index: {}]   ;;  %s4472_s17 = inlined_call_operand.hbm [shape: f32[16,128], index: 17, kind: output, shape index: {}]  }
   0x1   :  { %4480 = sst [smem:[#allocation17_spill]] %s4455_s0 }
   0x2   :  { %4481 = sst [smem:[#allocation18_spill]] %s4456_s1 }
   0x3   :  { %4482 = sst [smem:[#allocation19_spill]] %s4459_s4 }
   0x4   :  { %4483 = sst [smem:[#allocation20_spill]] %s4464_s9 }
   0x5   :  { %4484 = sst [smem:[#allocation21_spill]] %s4465_s10 }
   0x6   :  { %4485 = sst [smem:[#allocation22_spill]] %s4467_s12 }
   0x7   :  { %4486 = sst [smem:[#allocation23_spill]] %s4469_s14 }
   0x8   :  { %4487 = sst [smem:[#allocation24_spill]] %s4471_s16 }
   0x9   :  { %4488 = sst [smem:[#allocation25_spill]] %s4472_s17 }
   0xa   :  { %22 = vsyncpa [#allocation3], 0 }
   0xb   :  { %24 = vsyncpa [#allocation3 + $0x1], 0 }
   0xc   :  { %25 = vsyncpa [#allocation6], 0 }
   0xd   :  { %26 = vsyncpa [#allocation9], 0 }
   0xe   :  { %27 = vsyncpa [#allocation4], 0 }
   0xf   :  { %29 = vsyncpa [#allocation4 + $0x1], 0  ;;  %s3695_s24 = smov 0   ;;  %s3697_s25 = smov 0  }
  0x10   :  { %s3699_s26 = smov 0   ;;  %s3701_s27 = smov 0  }
  0x11 LB: > { %4489 = sst [smem:[#allocation15_spill]] %s3575_s24  ;;  %s3716_s28 = sadd.s32 4294967295, %s3587_s27   ;;  %s3587_s27 = sphi %s3701_s27, %s4521_s27   ;;  %s3583_s26 = sphi %s3699_s26, %s4520_s26   ;;  %s3579_s25 = sphi %s3697_s25, %s4519_s25   ;;  %s3575_s24 = sphi %s3695_s24, %s4518_s24  }
  0x12   : > { %s2781_s29 = sadd.s32 4294967294, %s3587_s27   ;;  %p81_p0 = scmp.ne.s32.totalorder %s3579_s25, %s3575_s24 }
  0x13   : > { %p4477_p1 = scmp.eq.s32.totalorder %s3716_s28, 0  ;;  %p426_p3 = scmp.eq.s32.totalorder %s2781_s29, 1 }
  0x14   : > { %p2782_p5 = scmp.ge.s32.totalorder %s3587_s27, 1  ;;  %p433_p7 = scmp.lt.s32.totalorder %s3587_s27, 3 }
  0x15   : > { %p3725_p4 = por %p4477_p1, %p81_p0  ;;  %p3730_p6 = por %p426_p3, %p81_p0 }
  0x16   : > { %p3735_p8 = pnand %p2782_p5, %p433_p7  ;;  %s3589_s19 = smov [#allocation5]  }
  0x17   : > { %s4490_s0 = scalar_select %p3725_p4, 1, 0 }
  0x18   : > { %s4491_s30 = scalar_select %p3730_p6, 1, 0 }
  0x19   : > { %s4493_s18 = scalar_select %p3735_p8, 1, 0 }
  0x1a   : > { %4492 = sst [smem:[#allocation16_spill]] %s4491_s30  ;;  %s451_s1 = sshll.u32 %s3589_s19, 4  ;;  %s3739_s1 = int_to_ptr.vmem [resolvable:$true] %s451_s1 }
  0x1b   : > { %p3156_p9 = pneg %p3735_p8  ;;  %s3590_s21 = smov [#allocation7]  }
  0x1c   : > { %s482_s22 = sshll.u32 %s3590_s21, 4  ;;  %s4495_s4 = sld [smem:[#allocation19_spill]]  ;;  %s3750_s22 = int_to_ptr.vmem [resolvable:$true] %s482_s22 }
  0x1d   : > { %p3746_p11 = pnand %p3156_p9, %p4477_p1 }
  0x1f   : > { %p3760_p13 = pneg %p3746_p11 }
  0x22   : > { %s3399_s30 = scalar_lea.hbm %s4495_s4, 3072 }
  0x23   : > { %p3400_p12 = scmp.ne.s32.totalorder %s4495_s4, %s3399_s30  ;;  %p3406_p5 = scmp.lt.u32.totalorder %s3399_s30, %s4495_s4 }
  0x25   : > { %p3402_p0 = pnand %p3760_p13, %p3400_p12 }
  0x27   : > { %p3403_p3 = pneg %p3402_p0 }
  0x29   : > { %p3408_p7 = pnand %p3406_p5, %p3403_p3 }
  0x2b   : > { %3411 = shalt.err (!%p3408_p7)
}
  0x2c   : > { %s3412_s24 = scalar_lea.vmem %s3739_s1, 3072  ;;  %p3420_p2 = scmp.lt.s32.totalorder %s3739_s1, %s3739_s1 }
  0x2d   : > { %p3413_p9 = scmp.ne.s32.totalorder %s3739_s1, %s3412_s24  ;;  %p3421_p6 = scmp.lt.s32.totalorder %s3412_s24, %s3412_s24 }
  0x2f   : > { %p3415_p10 = pnand %p3413_p9, %p3760_p13  ;;  %p3422_p12 = por %p3421_p6, %p3420_p2 }
  0x31   : > { %p3416_p1 = pneg %p3415_p10 }
  0x33   : > { %p3423_p0 = pnand %p3422_p12, %p3416_p1 }
  0x35   : > { %3426 = shalt.err (!%p3423_p0)
}
  0x36   : > { %s3591_s23 = smov 192   ;;  %s3592_s16 = smov 12  }
  0x37   : > { %3159 = dma.hbm_to_vmem [thread:$0]  (!%p3746_p11), %s4495_s4, 3072, %s3739_s1, [#allocation6], %s3591_s23, %s3591_s23, %s3592_s16  }
  0x38   : > { %s3427_s14 = scalar_lea.hbm %s4466_s11, 4096 }
  0x39   : > { %p3428_p2 = scmp.ne.s32.totalorder %s4466_s11, %s3427_s14  ;;  %p3434_p10 = scmp.lt.u32.totalorder %s3427_s14, %s4466_s11 }
  0x3b   : > { %p3430_p1 = pnand %p3428_p2, %p3760_p13 }
  0x3d   : > { %p3431_p6 = pneg %p3430_p1 }
  0x3f   : > { %p3436_p3 = pnand %p3434_p10, %p3431_p6 }
  0x41   : > { %3439 = shalt.err (!%p3436_p3)
}
  0x42   : > { %s3440_s1 = scalar_lea.vmem %s3750_s22, 4096  ;;  %p3448_p12 = scmp.lt.s32.totalorder %s3750_s22, %s3750_s22 }
  0x43   : > { %p3441_p5 = scmp.ne.s32.totalorder %s3750_s22, %s3440_s1  ;;  %p3449_p0 = scmp.lt.s32.totalorder %s3440_s1, %s3440_s1 }
  0x45   : > { %p3443_p7 = pnand %p3441_p5, %p3760_p13  ;;  %p3450_p2 = por %p3449_p0, %p3448_p12 }
  0x47   : > { %p3444_p9 = pneg %p3443_p7 }
  0x49   : > { %p3451_p1 = pnand %p3450_p2, %p3444_p9 }
  0x4b   : > { %3454 = shalt.err (!%p3451_p1)
}
  0x4c   : > { %s3593_s10 = smov 256   ;;  %s3594_s9 = smov 16  }
  0x4d   : > { %3162 = dma.hbm_to_vmem [thread:$0]  (!%p3746_p11), %s4466_s11, 4096, %s3750_s22, [#allocation6], %s3593_s10, %s3593_s10, %s3594_s9  }
  0x4e   : > { %s3595_s23 = smov [#allocation8]   ;;  %s3455_s19 = scalar_lea.hbm %s4468_s13, 4096 }
  0x4f   : > { %s498_s16 = sshll.u32 %s3595_s23, 4  ;;  %p3456_p6 = scmp.ne.s32.totalorder %s4468_s13, %s3455_s19  ;;  %s499_s16 = int_to_ptr.vmem [resolvable:$true] %s498_s16 }
  0x50   : > { %p3462_p5 = scmp.lt.u32.totalorder %s3455_s19, %s4468_s13 }
  0x51   : > { %p3458_p10 = pnand %p3456_p6, %p3760_p13 }
  0x53   : > { %p3459_p3 = pneg %p3458_p10 }
  0x55   : > { %p3464_p7 = pnand %p3462_p5, %p3459_p3 }
  0x57   : > { %3467 = shalt.err (!%p3464_p7)
}
  0x58   : > { %s3468_s22 = scalar_lea.vmem %s499_s16, 4096  ;;  %p3476_p2 = scmp.lt.s32.totalorder %s499_s16, %s499_s16 }
  0x59   : > { %p3469_p9 = scmp.ne.s32.totalorder %s499_s16, %s3468_s22  ;;  %p3477_p1 = scmp.lt.s32.totalorder %s3468_s22, %s3468_s22 }
  0x5b   : > { %p3471_p12 = pnand %p3469_p9, %p3760_p13  ;;  %p3478_p4 = por %p3477_p1, %p3476_p2 }
  0x5d   : > { %p3472_p0 = pneg %p3471_p12 }
  0x5f   : > { %p3479_p8 = pnand %p3478_p4, %p3472_p0 }
  0x61   : > { %3482 = shalt.err (!%p3479_p8)
}
  0x62   : > { %s3596_s10 = smov 64   ;;  %s3597_s4 = smov 4  }
  0x63   : > { %3165 = dma.hbm_to_vmem [thread:$0]  (!%p3746_p11), %s4468_s13, 4096, %s499_s16, [#allocation9], %s3596_s10, %s3596_s10, %s3597_s4  }
  0x64   : > { %s3823_s12 = sadd.s32 1, %s3587_s27   ;;  %s68_s23 = sadd.s32 1, %s3583_s26 }
  0x65   : > { %s65_s14 = ssub.s32 %s3587_s27, %s3823_s12  ;;  %p75_p8 = scmp.ne.s32.totalorder %s3583_s26, %s3579_s25 }
  0x66   : > { %p66_p4 = scmp.eq.s32.totalorder %s65_s14, 0  ;;  %p76_p13 = scmp.eq.s32.totalorder %s3587_s27, 0 }
  0x67   : > { %p3177_p6 = scmp.lt.s32.totalorder %s3587_s27, 2  ;;  %p4497_p3 = scmp.eq.s32.totalorder %s3716_s28, 1 }
  0x68   : > { %s3833_s30 = scalar_select %p66_p4, %s3583_s26, %s68_s23  }
  0x69   : > { %p77_p10 = por %p76_p13, %p75_p8  ;;  %p3837_p5 = por %p4497_p3, %p75_p8 }
  0x6a   : > { %s530_s20 = sand.u32 1, %s3583_s26   ;;  %s2788_s19 = sshll.u32 %s3587_s27, 7 }
  0x6b   : > { %s2787_s16 = sshll.u32 %s530_s20, 3  ;;  %s4499_s1 = sld [smem:[#allocation18_spill]] }
  0x6c   : > { %s534_s10 = scalar_lea.vmem [#allocation2], %s2787_s16  ;;  %p3848_p11 = pnand %p3177_p6, %p77_p10 }
  0x6d   : > { %s541_s4 = sshll.u32 %s534_s10, 4  ;;  %s531_s9 = scalar_lea.sflag [#allocation3], %s530_s20  ;;  %s3852_s4 = int_to_ptr.vmem [resolvable:$true] %s541_s4 }
  0x6e   : > { %p3485_p9 = pneg %p3848_p11 }
  0x71   : > { %s3846_s22 = scalar_lea.hbm %s4499_s1, %s2788_s19  ;;  %s3488_s16 = scalar_lea.hbm %s4499_s1, 256 }
  0x72   : > { %s3483_s14 = scalar_lea.hbm %s3846_s22, 128  ;;  %p3489_p2 = scmp.lt.u32.totalorder %s3846_s22, %s4499_s1 }
  0x73   : > { %p3484_p7 = scmp.ne.s32.totalorder %s3846_s22, %s3483_s14  ;;  %p3490_p1 = scmp.lt.u32.totalorder %s3488_s16, %s3483_s14 }
  0x74   : > { %p3492_p8 = scmp.lt.u32.totalorder %s3483_s14, %s3846_s22 }
  0x75   : > { %p3486_p12 = pnand %p3485_p9, %p3484_p7  ;;  %p3491_p4 = por %p3490_p1, %p3489_p2 }
  0x77   : > { %p3487_p0 = pneg %p3486_p12  ;;  %p3493_p13 = por %p3492_p8, %p3491_p4 }
  0x79   : > { %p3494_p6 = pnand %p3493_p13, %p3487_p0 }
  0x7b   : > { %3497 = shalt.err (!%p3494_p6)
}
  0x7c   : > { %s3498_s20 = scalar_lea.vmem %s3852_s4, 128  ;;  %s3598_s10 = smov [#allocation2]  }
  0x7d   : > { %p3499_p10 = scmp.ne.s32.totalorder %s3852_s4, %s3498_s20  ;;  %s3503_s23 = sshll.u32 %s3598_s10, 4  ;;  %s3504_s23 = int_to_ptr.vmem [resolvable:$false] %s3503_s23 }
  0x7e   : > { %s3505_s19 = scalar_lea.vmem %s3504_s23, 256  ;;  %p3506_p12 = scmp.lt.s32.totalorder %s3852_s4, %s3504_s23 }
  0x7f   : > { %p3501_p3 = pnand %p3499_p10, %p3485_p9  ;;  %p3507_p2 = scmp.lt.s32.totalorder %s3505_s19, %s3498_s20 }
  0x81   : > { %p3502_p7 = pneg %p3501_p3  ;;  %p3508_p1 = por %p3507_p2, %p3506_p12 }
  0x83   : > { %p3509_p4 = pnand %p3508_p1, %p3502_p7 }
  0x85   : > { %3512 = shalt.err (!%p3509_p4)
}
  0x86   : > { %3169 = dma.hbm_to_vmem [thread:$0]  (!%p3848_p11), %s3846_s22, 128, %s3852_s4, %s531_s9  }
  0x87   : > { %p4501_p0 = scmp.ne.s32.totalorder %s4493_s18, 0 }
  0x88   : > { %s3882_s14 = sand.u32 (!%p4501_p0), 1, %s3579_s25   ;;  %p4502_p9 = scmp.ne.s32.totalorder (!%p4501_p0), %s4490_s0, 0 }
  0x89   : > { %550 = sbr.rel (%p4501_p0) target bundleno = 1765 (0x6e5), region = 88  ;;  %s2790_s16 = sshll.u32 (!%p4501_p0), %s3882_s14, 3 }
  0x8a   : > { %s553_s21 = scalar_lea.sflag (!%p4501_p0), [#allocation3], %s3882_s14  ;;  %s3888_s24 = scalar_lea.vmem (!%p4501_p0), [#allocation2], %s2790_s16 }
  0x90   : > { %3558 = dma.done.wait (%p4502_p9), %s553_s21, 128  }
  0x91   : > { %3560 = vsyncadd (%p4502_p9), %s553_s21, 4294967168  ;;  %p4503_p11 = scmp.eq.s32.totalorder %s3716_s28, 0 }
  0x93   : > { %3562 = dma.done.wait (%p4503_p11), [#allocation6], 7168   ;;  %p4504_p8 = pmov %p4503_p11 }
  0x95   : > { %3564 = vsyncadd (%p4504_p8), [#allocation6], 4294960128  ;;  %p4505_p13 = pmov %p4504_p8 }
  0x96   : > { %p4506_p6 = pmov %p4504_p8 }
  0x97   : > { %3566 = dma.done.wait (%p4505_p13), [#allocation9], 4096  }
  0x98   : > { %3568 = vsyncadd (%p4506_p6), [#allocation9], 4294963200  ;;  %s2795_s18 = sshll.u32 %s3716_s28, 3  ;;  %v3599_v0 = vmov 0.0   ;;  %s4507_s17 = sld [smem:[#allocation17_spill]]  ;;  %v3910_v1 = vld [vmem:[%s3888_s24] sm:$0xff] }
  0x99   : > { %p625_p10 = scmp.lt.s32.totalorder %s2795_s18, 15  ;;  %3056 = vmatprep.subr.bf16.mxu1 %v3599_v0  ;;  %787 = vadd.xlane.f32.xlu0 %v3910_v1  ;;  %v790_v3 = vmul.f32 %v3910_v1, %v3910_v1  ;;  %v3918_v5 = vld [vmem:[#allocation5 + $0x4] ss:$12 sps:$4 sm:$0xff]   ;;  %v3232_v6 = vld [vmem:[#allocation5] ss:$12 sps:$4 sm:$0xff]   ;;  %v3600_v47 = vmov 0  }
  0x9a   : > { %v3923_v8 = vld [vmem:[#allocation5 + $0x8] ss:$12 sps:$4 sm:$0xff]   ;;  %963 = vmatprep.subr.bf16.mxu0 %v3918_v5  ;;  %v3236_v17 = vld [vmem:[#allocation5 + $0x18] ss:$12 sps:$4 sm:$0xff]   ;;  %v3948_v19 = vld [vmem:[#allocation5 + $0x20] ss:$12 sps:$4 sm:$0xff]   ;;  %995 = vmatprep.mubr.bf16.mxu0 %v3600_v47 }
  0x9b   : > { %s4523_s18 = smov (!%p625_p10, %s2795_s18), 15  ;;  %964 = vmatpush1.bf16.msra.mxu0 %v3232_v6  ;;  %3057 = vmatpush3.bf16.msra.mxu1 %v3923_v8  ;;  %v3942_v16 = vld [vmem:[#allocation5 + $0x1c] ss:$12 sps:$4 sm:$0xff]   ;;  %v3953_v21 = vld [vmem:[#allocation5 + $0x34] ss:$12 sps:$4 sm:$0xff]   ;;  %vm3601_vm0 = vmmov 0  }
  0x9c   : > { %s2796_s0 = sshll.u32 %s4523_s18, 2  ;;  %3058 = vmatprep.subr.bf16.mxu1 %v3599_v0  ;;  %965 = vmatprep.subr.bf16.mxu0 %v3942_v16  ;;  %v3240_v22 = vld [vmem:[#allocation5 + $0x30] ss:$12 sps:$4 sm:$0xff]   ;;  %v3959_v24 = vld [vmem:[#allocation5 + $0x38] ss:$12 sps:$4 sm:$0xff]   ;;  %v1121_v50 = vld [vmem:[%s4460_s5 + $0x18] sm:$0xff] }
  0x9d   : > { %791 = vadd.xlane.f32.xlu0 %v790_v3  ;;  %v3966_v27 = vld [vmem:[#allocation5 + $0x4c] ss:$12 sps:$4 sm:$0xff]   ;;  %v3244_v28 = vld [vmem:[#allocation5 + $0x48] ss:$12 sps:$4 sm:$0xff]   ;;  %v3973_v30 = vld [vmem:[#allocation5 + $0x50] ss:$12 sps:$4 sm:$0xff]   ;;  %3072 = vmatprep.mubr.msk.bf16.mxu1 %vm3601_vm0, %v3599_v0 }
  0x9e   : > { %s3907_s9 = scalar_lea.vmem %s4507_s17, %s2796_s0  ;;  %v3978_v32 = vld [vmem:[#allocation5 + $0x64] ss:$12 sps:$4 sm:$0xff]   ;;  %v3248_v33 = vld [vmem:[#allocation5 + $0x60] ss:$12 sps:$4 sm:$0xff]   ;;  %v3984_v35 = vld [vmem:[#allocation5 + $0x68] ss:$12 sps:$4 sm:$0xff]   ;;  %3229 = vset.pattern.permute.xlu1 %v3600_v47  ;;  %3228 = vset.pattern.permute.xlu0 %v3600_v47 }
  0x9f   : > { %v2955_v2 = vld [vmem:[%s3907_s9] sm:$0xff]   ;;  %v2970_v9 = vld [vmem:[%s3907_s9 + $0x8] sm:$0xff]   ;;  %v2971_v14 = vld [vmem:[%s3907_s9 + $0x10] sm:$0xff]   ;;  %966 = vmatpush1.bf16.msra.mxu0 %v3236_v17  ;;  %3059 = vmatpush3.bf16.msra.mxu1 %v3948_v19  ;;  %s4508_s21 = sld [smem:[#allocation20_spill]]  ;;  %s4509_s22 = sld [smem:[#allocation21_spill]] }
  0xa0   : > { %v3916_v4 = vunpack.c.l.bf16 %v2955_v2  ;;  %v3921_v7 = vunpack.c.h.bf16 %v2955_v2  ;;  %v3934_v12 = vunpack.c.l.bf16 %v2970_v9  ;;  %v3936_v13 = vunpack.c.h.bf16 %v2970_v9  ;;  %3060 = vmatprep.subr.bf16.mxu1 %v3599_v0  ;;  %967 = vmatprep.subr.bf16.mxu0 %v3953_v21  ;;  %v2972_v25 = vld [vmem:[%s3907_s9 + $0x18] sm:$0xff]   ;;  %v3252_v38 = vld [vmem:[#allocation5 + $0x78] ss:$12 sps:$4 sm:$0xff]   ;;  %v3999_v41 = vld [vmem:[#allocation5 + $0x94] ss:$12 sps:$4 sm:$0xff]   ;;  %s4510_s9 = sld [smem:[#allocation22_spill]] }
  0xa1   : > { %v3950_v20 = vunpack.c.l.bf16 %v2971_v14  ;;  %v3956_v23 = vunpack.c.h.bf16 %v2971_v14  ;;  %v3975_v31 = vunpack.c.l.bf16 %v2972_v25  ;;  %v3981_v34 = vunpack.c.h.bf16 %v2972_v25  ;;  %v3990_v37 = vld [vmem:[#allocation5 + $0x7c] ss:$12 sps:$4 sm:$0xff]   ;;  %v3997_v40 = vld [vmem:[#allocation5 + $0x80] ss:$12 sps:$4 sm:$0xff]   ;;  %v4001_v43 = vld [vmem:[#allocation5 + $0x98] ss:$12 sps:$4 sm:$0xff]  }
  0xa2   : > { %650 = vadd.xlane.f32.xlu1 %v3916_v4  ;;  %v675_v10 = vmul.f32 %v3916_v4, %v3916_v4  ;;  %v676_v11 = vmul.f32 %v3921_v7, %v3921_v7  ;;  %v677_v15 = vmul.f32 %v3934_v12, %v3934_v12  ;;  %v678_v18 = vmul.f32 %v3936_v13, %v3936_v13  ;;  %v3256_v42 = vld [vmem:[#allocation5 + $0x90] ss:$12 sps:$4 sm:$0xff]   ;;  %v4003_v44 = vld [vmem:[#allocation5 + $0xac] ss:$12 sps:$4 sm:$0xff]   ;;  %v3260_v45 = vld [vmem:[#allocation5 + $0xa8] ss:$12 sps:$4 sm:$0xff]  }
  0xa3   : > { %968 = vmatpush1.bf16.msra.mxu0 %v3240_v22  ;;  %v679_v26 = vmul.f32 %v3950_v20, %v3950_v20  ;;  %3061 = vmatpush3.bf16.msra.mxu1 %v3959_v24  ;;  %v680_v29 = vmul.f32 %v3956_v23, %v3956_v23  ;;  %v681_v36 = vmul.f32 %v3975_v31, %v3975_v31  ;;  %v4011_v46 = vld [vmem:[#allocation5 + $0xb0] ss:$12 sps:$4 sm:$0xff]   ;;  %v1120_v49 = vld [vmem:[%s4460_s5 + $0x10] sm:$0xff]  ;;  %v1129_v56 = vld [vmem:[%s4460_s5 + $0x58] sm:$0xff]  ;;  %s4511_s23 = sld [smem:[#allocation23_spill]]  ;;  %s2951_s18 = sshll.u32 %s3716_s28, 7 }
  0xa4   : > { %683 = vadd.xlane.f32.xlu0 %v675_v10  ;;  %3062 = vmatprep.subr.bf16.mxu1 %v3599_v0  ;;  %v682_v39 = vmul.f32 %v3981_v34, %v3981_v34  ;;  %v1119_v48 = vld [vmem:[%s4460_s5 + $0x8] sm:$0xff]  ;;  %v1122_v51 = vld [vmem:[%s4460_s5 + $0x20] sm:$0xff]  ;;  %v1124_v55 = vld [vmem:[%s4460_s5 + $0x30] sm:$0xff]  ;;  %s623_s0 = scalar_lea.vmem [#allocation10], %s2790_s16  ;;  %s2657_s10 = scalar_lea.sflag [#allocation4], %s3882_s14 }
  0xa5   : > { %969 = vmatprep.subr.bf16.mxu0 %v3966_v27  ;;  %v1118_v52 = vld [vmem:[%s4460_s5] sm:$0xff]  ;;  %v1123_v53 = vld [vmem:[%s4460_s5 + $0x28] sm:$0xff]  ;;  %v1125_v57 = vld [vmem:[%s4460_s5 + $0x38] sm:$0xff]  ;;  %s3604_s28 = smov [#allocation10]  }
  0xa6   : > { %652 = vadd.xlane.f32.xlu1 %v3921_v7  ;;  %v1127_v54 = vld [vmem:[%s4460_s5 + $0x48] sm:$0xff]  ;;  %v1126_v59 = vld [vmem:[%s4460_s5 + $0x40] sm:$0xff]  ;;  %v1133_v60 = vld [vmem:[%s4460_s5 + $0x78] sm:$0xff]  ;;  %s3517_s16 = sshll.u32 %s3604_s28, 4  ;;  %s3518_s16 = int_to_ptr.vmem [resolvable:$false] %s3517_s16 }
  0xa7   : > { %970 = vmatpush1.bf16.msra.mxu0 %v3244_v28  ;;  %3063 = vmatpush3.bf16.msra.mxu1 %v3973_v30  ;;  %v1131_v58 = vld [vmem:[%s4460_s5 + $0x68] sm:$0xff]  ;;  %v1128_v61 = vld [vmem:[%s4460_s5 + $0x50] sm:$0xff]  ;;  %v1130_v62 = vld [vmem:[%s4460_s5 + $0x60] sm:$0xff] }
  0xa8   : > { %654 = vadd.xlane.f32.xlu0 %v3934_v12  ;;  %3064 = vmatprep.subr.bf16.mxu1 %v3599_v0  ;;  %v1132_v63 = vld [vmem:[%s4460_s5 + $0x70] sm:$0xff] }
  0xa9   : > { %971 = vmatprep.subr.bf16.mxu0 %v3978_v32 }
  0xaa   : > { %685 = vadd.xlane.f32.xlu1 %v676_v11 }
  0xab   : > { %972 = vmatpush1.bf16.msra.mxu0 %v3248_v33  ;;  %3065 = vmatpush3.bf16.msra.mxu1 %v3984_v35 }
  0xac   : > { %687 = vadd.xlane.f32.xlu0 %v677_v15  ;;  %3066 = vmatprep.subr.bf16.mxu1 %v3599_v0 }
  0xad   : > { %973 = vmatprep.subr.bf16.mxu0 %v3990_v37 }
  0xae   : > { %656 = vadd.xlane.f32.xlu1 %v3936_v13 }
  0xaf   : > { %974 = vmatpush1.bf16.msra.mxu0 %v3252_v38  ;;  %3067 = vmatpush3.bf16.msra.mxu1 %v3997_v40 }
  0xb0   : > { %658 = vadd.xlane.f32.xlu0 %v3950_v20  ;;  %975 = vmatprep.subr.bf16.mxu0 %v3999_v41 }
  0xb1   : > { %3068 = vmatprep.subr.bf16.mxu1 %v3599_v0 }
  0xb2   : > { %689 = vadd.xlane.f32.xlu1 %v678_v18 }
  0xb3   : > { %976 = vmatpush1.bf16.msra.mxu0 %v3256_v42  ;;  %3069 = vmatpush3.bf16.msra.mxu1 %v4001_v43 }
  0xb4   : > { %691 = vadd.xlane.f32.xlu0 %v679_v26  ;;  %977 = vmatprep.subr.bf16.mxu0 %v4003_v44 }
  0xb5   : > { %3070 = vmatprep.subr.bf16.mxu1 %v3599_v0 }
  0xb6   : > { %660 = vadd.xlane.f32.xlu1 %v3956_v23 }
  0xb7   : > { %978 = vmatpush1.bf16.msra.mxu0 %v3260_v45  ;;  %3071 = vmatpush3.bf16.msra.mxu1 %v4011_v46 }
  0xb8   : > { %662 = vadd.xlane.f32.xlu0 %v3975_v31  ;;  %1044 = vmatprep.subr.bf16.mxu0 %v3923_v8 }
  0xb9   : > { %3076 = vmatprep.subr.bf16.mxu1 %v3599_v0 }
  0xba   : > { %693 = vadd.xlane.f32.xlu1 %v680_v29 }
  0xbc   : > { %695 = vadd.xlane.f32.xlu0 %v681_v36 }
  0xbe   : > { %664 = vadd.xlane.f32.xlu1 %v3981_v34 }
  0xc2   : > { %697 = vadd.xlane.f32.xlu1 %v682_v39  ;;  %v4077_v39 = vld [vmem:[%s4457_s2] ss:$0 sm:$0xff] }
  0xd2   : > { %1137 = vperm.xlu0 %3228, %v1118_v52  }
  0xd3   : > { %1142 = vperm.xlu1 %3229, %v1119_v48  }
  0xd6   : > { %1182 = vperm.xlu0 %3228, %v1127_v54  }
  0xd7   : > { %1147 = vperm.xlu1 %3229, %v1120_v49  }
  0xda   : > { %1192 = vperm.xlu0 %3228, %v1129_v56  }
  0xdb   : > { %1152 = vperm.xlu1 %3229, %v1121_v50  }
  0xde   : > { %1202 = vperm.xlu0 %3228, %v1131_v58  }
  0xdf   : > { %1157 = vperm.xlu1 %3229, %v1122_v51  }
  0xe2   : > { %1212 = vperm.xlu0 %3228, %v1133_v60  }
  0xe3   : > { %1162 = vperm.xlu1 %3229, %v1123_v53  }
  0xe7   : > { %1167 = vperm.xlu1 %3229, %v1124_v55  }
  0xeb   : > { %1172 = vperm.xlu1 %3229, %v1125_v57  }
  0xef   : > { %1177 = vperm.xlu1 %3229, %v1126_v59  }
  0xf3   : > { %1187 = vperm.xlu1 %3229, %v1128_v61  }
  0xf7   : > { %1197 = vperm.xlu1 %3229, %v1130_v62  }
  0xfb   : > { %1207 = vperm.xlu1 %3229, %v1132_v63  }
 0x126   : > { %v788_v2 = vpop.xlane.xlu0 %787 }
 0x127   : > { %v789_v3 = vmul.f32 0.0078125, %v788_v2 }
 0x129   : > { %v794_v9 = vmul.f32 %v789_v3, %v789_v3  ;;  %v796_v33 = vsub.f32 %v3910_v1, %v789_v3  ;;  %v4086_v1 = vld [vmem:[%s4458_s3] ss:$0 sm:$0xff] }
 0x12a   : > { %v792_v8 = vpop.xlane.xlu0 %791 }
 0x12b   : > { %v793_v10 = vmul.f32 0.0078125, %v792_v8 }
 0x12d   : > { %v795_v14 = vsub.f32 %v793_v10, %v794_v9 }
 0x12f   : > { %v651_v6 = vpop.xlane.xlu1 %650  ;;  %v797_v15 = vadd.f32 1e-05, %v795_v14 }
 0x130   : > { %v4069_v26 = vmul.f32 0.0078125, %v651_v6 }
 0x131   : > { %v684_v17 = vpop.xlane.xlu0 %683  ;;  %3350 = vrsqrt.f32 %v797_v15 }
 0x132   : > { %v707_v42 = vmul.f32 %v4069_v26, %v4069_v26  ;;  %v699_v45 = vmul.f32 0.0078125, %v684_v17 }
 0x133   : > { %v653_v11 = vpop.xlane.xlu1 %652 }
 0x134   : > { %v4071_v28 = vmul.f32 0.0078125, %v653_v11  ;;  %v715_v53 = vsub.f32 %v699_v45, %v707_v42  ;;  %v723_v45 = vsub.f32 %v3916_v4, %v4069_v26 }
 0x135   : > { %v655_v22 = vpop.xlane.xlu0 %654 }
 0x136   : > { %v708_v49 = vmul.f32 %v4071_v28, %v4071_v28  ;;  %v4089_v54 = vmul.f32 0.0078125, %v655_v22  ;;  %v731_v60 = vadd.f32 1e-05, %v715_v53 }
 0x137   : > { %v686_v18 = vpop.xlane.xlu1 %685 }
 0x138   : > { %v700_v50 = vmul.f32 0.0078125, %v686_v18  ;;  %v709_v61 = vmul.f32 %v4089_v54, %v4089_v54  ;;  %3352 = vrsqrt.f32 %v731_v60 }
 0x139   : > { %v688_v29 = vpop.xlane.xlu0 %687 }
 0x13a   : > { %v716_v57 = vsub.f32 %v700_v50, %v708_v49  ;;  %v701_v62 = vmul.f32 0.0078125, %v688_v29 }
 0x13b   : > { %v657_v25 = vpop.xlane.xlu1 %656  ;;  %v3351_v38 = vpop.eup %3350 }
 0x13c   : > { %v799_v48 = vmul.f32 %v3351_v38, %v796_v33  ;;  %v4092_v58 = vmul.f32 0.0078125, %v657_v25  ;;  %v732_v63 = vadd.f32 1e-05, %v716_v57  ;;  %v717_v9 = vsub.f32 %v701_v62, %v709_v61 }
 0x13d   : > { %v659_v52 = vpop.xlane.xlu0 %658 }
 0x13e   : > { %v800_v51 = vmul.f32 %v4077_v39, %v799_v48  ;;  %v710_v2 = vmul.f32 %v4092_v58, %v4092_v58  ;;  %v4103_v10 = vmul.f32 0.0078125, %v659_v52  ;;  %3354 = vrsqrt.f32 %v732_v63 }
 0x13f   : > { %v690_v36 = vpop.xlane.xlu1 %689  ;;  %v733_v15 = vadd.f32 1e-05, %v717_v9 }
 0x140   : > { %v801_v55 = vadd.f32 %v4086_v1, %v800_v51  ;;  %v702_v3 = vmul.f32 0.0078125, %v690_v36 }
 0x141   : > { %v692_v6 = vpop.xlane.xlu0 %691  ;;  %3356 = vrsqrt.f32 %v733_v15 }
 0x142   : > { %v802_v59 = vpack.c.bf16 %v801_v55, %v801_v55  ;;  %v718_v11 = vsub.f32 %v702_v3, %v710_v2  ;;  %v703_v17 = vmul.f32 0.0078125, %v692_v6  ;;  %v3353_v42 = vpop.eup %3352  ;;  %v726_v55 = vsub.f32 %v3936_v13, %v4092_v58 }
 0x143   : > { %v661_v56 = vpop.xlane.xlu1 %660  ;;  %v747_v4 = vmul.f32 %v3353_v42, %v723_v45 }
 0x144   : > { %996 = vmatmul.mubr.bf16.vlgmr.msra.gmra.mrb[0].mxu0 %v802_v59  ;;  %3073 = vmatmul.mubr.bf16.vlgmr.msra.gmra.mrb[0].mxu1 %v802_v59  ;;  %v4105_v14 = vmul.f32 0.0078125, %v661_v56  ;;  %v734_v22 = vadd.f32 1e-05, %v718_v11  ;;  %v725_v56 = vsub.f32 %v3934_v12, %v4089_v54  ;;  %v727_v12 = vsub.f32 %v3950_v20, %v4103_v10 }
 0x145   : > { %1045 = vmatpush1.bf16.msra.mxu0 %v3918_v5  ;;  %1076 = vmatprep.mubr.bf16.mxu0 %v3600_v47  ;;  %v663_v5 = vpop.xlane.xlu0 %662 }
 0x146   : > { %1046 = vmatprep.subr.bf16.mxu0 %v3948_v19  ;;  %3092 = vmatprep.mubr.msk.bf16.mxu1 %vm3601_vm0, %v3599_v0  ;;  %v711_v19 = vmul.f32 %v4103_v10, %v4103_v10  ;;  %v712_v25 = vmul.f32 %v4105_v14, %v4105_v14  ;;  %v4115_v33 = vmul.f32 0.0078125, %v663_v5  ;;  %3358 = vrsqrt.f32 %v734_v22 }
 0x147   : > { %v694_v8 = vpop.xlane.xlu1 %693  ;;  %v728_v54 = vsub.f32 %v3956_v23, %v4105_v14 }
 0x148   : > { %v704_v29 = vmul.f32 0.0078125, %v694_v8  ;;  %v713_v50 = vmul.f32 %v4115_v33, %v4115_v33 }
 0x149   : > { %1047 = vmatpush1.bf16.msra.mxu0 %v3942_v16  ;;  %v719_v16 = vsub.f32 %v703_v17, %v711_v19  ;;  %v696_v38 = vpop.xlane.xlu0 %695 }
 0x14a   : > { %1048 = vmatprep.subr.bf16.mxu0 %v3959_v24  ;;  %v720_v24 = vsub.f32 %v704_v29, %v712_v25  ;;  %v705_v51 = vmul.f32 0.0078125, %v696_v38 }
 0x14b   : > { %v665_v18 = vpop.xlane.xlu1 %664  ;;  %v735_v49 = vadd.f32 1e-05, %v719_v16 }
 0x14c   : > { %v4117_v36 = vmul.f32 0.0078125, %v665_v18  ;;  %v736_v52 = vadd.f32 1e-05, %v720_v24  ;;  %v721_v26 = vsub.f32 %v705_v51, %v713_v50 }
 0x14d   : > { %1049 = vmatpush1.bf16.msra.mxu0 %v3953_v21  ;;  %v724_v21 = vsub.f32 %v3921_v7, %v4071_v28  ;;  %3360 = vrsqrt.f32 %v735_v49 }
 0x14e   : > { %1050 = vmatprep.subr.bf16.mxu0 %v3973_v30  ;;  %v3355_v30 = vpop.eup %3354  ;;  %3362 = vrsqrt.f32 %v736_v52  ;;  %v737_v59 = vadd.f32 1e-05, %v721_v26  ;;  %v730_v23 = vsub.f32 %v3981_v34, %v4117_v36 }
 0x14f   : > { %v698_v48 = vpop.xlane.xlu1 %697  ;;  %v748_v7 = vmul.f32 %v3355_v30, %v724_v21  ;;  %v3357_v28 = vpop.eup %3356 }
 0x150   : > { %v706_v53 = vmul.f32 0.0078125, %v698_v48  ;;  %v3359_v57 = vpop.eup %3358  ;;  %v749_v58 = vmul.f32 %v3357_v28, %v725_v56  ;;  %3364 = vrsqrt.f32 %v737_v59 }
 0x151   : > { %1051 = vmatpush1.bf16.msra.mxu0 %v3966_v27  ;;  %v714_v27 = vmul.f32 %v4117_v36, %v4117_v36  ;;  %v750_v61 = vmul.f32 %v3359_v57, %v726_v55 }
 0x152   : > { %1052 = vmatprep.subr.bf16.mxu0 %v3984_v35 }
 0x153   : > { %v722_v35 = vsub.f32 %v706_v53, %v714_v27  ;;  %v764_v62 = vmul.f32 %v4077_v39, %v750_v61 }
 0x155   : > { %1053 = vmatpush1.bf16.msra.mxu0 %v3978_v32  ;;  %v761_v32 = vmul.f32 %v4077_v39, %v747_v4  ;;  %v738_v60 = vadd.f32 1e-05, %v722_v35  ;;  %v778_v20 = vadd.f32 %v4086_v1, %v764_v62 }
 0x156   : > { %1054 = vmatprep.subr.bf16.mxu0 %v3997_v40  ;;  %v762_v40 = vmul.f32 %v4077_v39, %v748_v7 }
 0x157   : > { %3366 = vrsqrt.f32 %v738_v60  ;;  %v3603_v60 = vmov 1966171168  }
 0x158   : > { %v776_v13 = vadd.f32 %v4086_v1, %v762_v40 }
 0x159   : > { %1055 = vmatpush1.bf16.msra.mxu0 %v3990_v37  ;;  %v775_v37 = vadd.f32 %v4086_v1, %v761_v32 }
 0x15a   : > { %1056 = vmatprep.subr.bf16.mxu0 %v4001_v43  ;;  %v3361_v43 = vpop.eup %3360 }
 0x15b   : > { %v3363_v63 = vpop.eup %3362  ;;  %v751_v3 = vmul.f32 %v3361_v43, %v727_v12 }
 0x15c   : > { %v752_v6 = vmul.f32 %v3363_v63, %v728_v54  ;;  %v3365_v8 = vpop.eup %3364 }
 0x15d   : > { %1057 = vmatpush1.bf16.msra.mxu0 %v3999_v41  ;;  %v783_v41 = vpack.c.bf16 %v776_v13, %v775_v37  ;;  %v765_v10 = vmul.f32 %v4077_v39, %v751_v3  ;;  %v1282_v37 = vunpack.c.l.s4 %v3603_v60  ;;  %v1284_v13 = vlaneseq  ;;  %v3267_v60 = vld [vmem:[%s4462_s7 + $0x28] sm:$0xff]  }
 0x15e   : > { %1058 = vmatprep.subr.bf16.mxu0 %v4011_v46  ;;  %v763_v46 = vmul.f32 %v4077_v39, %v749_v58  ;;  %v766_v11 = vmul.f32 %v4077_v39, %v752_v6 }
 0x15f   : > { %v779_v5 = vadd.f32 %v4086_v1, %v765_v10  ;;  %v1283_v58 = vunpack.c.0.s8 %v1282_v37  ;;  %v4200_v61 = vshrl.u32 %v1284_v13, 7 }
 0x160   : > { %v777_v2 = vadd.f32 %v4086_v1, %v763_v46  ;;  %v780_v15 = vadd.f32 %v4086_v1, %v766_v11 }
 0x161   : > { %1059 = vmatpush1.bf16.msra.mxu0 %v4003_v44  ;;  %v729_v44 = vsub.f32 %v3975_v31, %v4115_v33  ;;  %v3367_v14 = vpop.eup %3366  ;;  %v1143_v31 = vpop.permute.xlu1 %1142  ;;  %v4170_v33 = vld [vmem:[%s4461_s6] ss:$0 sm:$0xff]  ;;  %v4203_v12 = vsub.s32 %v1283_v58, %v4200_v61  ;;  %v3268_v58 = vld [vmem:[%s4462_s7 + $0x30] sm:$0xff]  }
 0x162   : > { %v784_v9 = vpack.c.bf16 %v778_v20, %v777_v2  ;;  %v754_v17 = vmul.f32 %v3367_v14, %v730_v23  ;;  %v785_v18 = vpack.c.bf16 %v780_v15, %v779_v5  ;;  %vm1222_vm1 = vcmp.eq.f32.partialorder %v1143_v31, %v4170_v33 }
 0x163   : > { %v753_v19 = vmul.f32 %v3365_v8, %v729_v44 }
 0x164   : > { %1077 = vmatmul.mubr.bf16.vlgmr.msra.gmra.mrb[4].mxu0 %v783_v41  ;;  %v768_v34 = vmul.f32 %v4077_v39, %v754_v17  ;;  %v4207_v41 = vsub.s32 0, %v4200_v61 }
 0x165   : > { %1086 = vmatprep.mubr.bf16.mxu0 %v3600_v47  ;;  %v767_v22 = vmul.f32 %v4077_v39, %v753_v19  ;;  %v1148_v25 = vpop.permute.xlu1 %1147  ;;  %v1138_v39 = vpop.permute.xlu0 %1137 }
 0x166   : > { %v782_v16 = vadd.f32 %v4086_v1, %v768_v34  ;;  %vm1223_vm2 = vcmp.eq.f32.partialorder %v1148_v25, %v4170_v33  ;;  %vm1221_vm4 = vcmp.eq.f32.partialorder %v1138_v39, %v4170_v33 }
 0x167   : > { %v781_v29 = vadd.f32 %v4086_v1, %v767_v22  ;;  %vm2840_vm5 = vmpackc.low %vm1222_vm1, %vm1221_vm4  ;;  %v3602_v1 = vmov 1.0|1.0  }
 0x168   : > { %3077 = vmatpush3.bf16.msk.msra.mxu1 %vm2840_vm5, %v3602_v1  ;;  %3096 = vmatprep.subr.msk.bf16.mxu0 %vm2840_vm5, %v3602_v1 }
 0x169   : > { %v1153_v24 = vpop.permute.xlu1 %1152  ;;  %v786_v36 = vpack.c.bf16 %v782_v16, %v781_v29  ;;  %3078 = vmatprep.subr.bf16.mxu1 %v3599_v0  ;;  %3097 = vmatpush3.bf16.msk.msra.mxu0 %vm2840_vm5, %v3602_v1  ;;  %v1183_v21 = vpop.permute.xlu0 %1182 }
 0x16a   : > { %vm1224_vm3 = vcmp.eq.f32.partialorder %v1153_v24, %v4170_v33  ;;  %vm1230_vm13 = vcmp.eq.f32.partialorder %v1183_v21, %v4170_v33 }
 0x16b   : > { %vm2842_vm6 = vmpackc.low %vm1224_vm3, %vm1223_vm2 }
 0x16c   : > { %1087 = vmatmul.mubr.bf16.gmra.mrb[8].mxu0 %v784_v9  ;;  %3098 = vmatprep.subr.msk.bf16.mxu0 %vm2842_vm6, %v3602_v1 }
 0x16d   : > { %1096 = vmatprep.mubr.bf16.mxu0 %v3600_v47  ;;  %v1158_v38 = vpop.permute.xlu1 %1157  ;;  %3079 = vmatpush3.bf16.msk.msra.mxu1 %vm2842_vm6, %v3602_v1  ;;  %v1193_v30 = vpop.permute.xlu0 %1192 }
 0x16e   : > { %vm1225_vm7 = vcmp.eq.f32.partialorder %v1158_v38, %v4170_v33  ;;  %3080 = vmatprep.subr.bf16.mxu1 %v3599_v0  ;;  %3099 = vmatpush3.bf16.msk.msra.mxu0 %vm2842_vm6, %v3602_v1  ;;  %vm1232_vm1 = vcmp.eq.f32.partialorder %v1193_v30, %v4170_v33 }
 0x171   : > { %v1163_v42 = vpop.permute.xlu1 %1162  ;;  %v1203_v51 = vpop.permute.xlu0 %1202 }
 0x172   : > { %vm1226_vm8 = vcmp.eq.f32.partialorder %v1163_v42, %v4170_v33  ;;  %vm1234_vm4 = vcmp.eq.f32.partialorder %v1203_v51, %v4170_v33 }
 0x173   : > { %vm2844_vm9 = vmpackc.low %vm1226_vm8, %vm1225_vm7 }
 0x174   : > { %1097 = vmatmul.mubr.bf16.gmra.mrb[12].mxu0 %v785_v18  ;;  %3100 = vmatprep.subr.msk.bf16.mxu0 %vm2844_vm9, %v3602_v1 }
 0x175   : > { %1106 = vmatprep.mubr.bf16.mxu0 %v3600_v47  ;;  %v1168_v45 = vpop.permute.xlu1 %1167  ;;  %3081 = vmatpush3.bf16.msk.msra.mxu1 %vm2844_vm9, %v3602_v1  ;;  %v1213_v53 = vpop.permute.xlu0 %1212 }
 0x176   : > { %vm1227_vm10 = vcmp.eq.f32.partialorder %v1168_v45, %v4170_v33  ;;  %3082 = vmatprep.subr.bf16.mxu1 %v3599_v0  ;;  %3101 = vmatpush3.bf16.msk.msra.mxu0 %vm2844_vm9, %v3602_v1  ;;  %vm1236_vm8 = vcmp.eq.f32.partialorder %v1213_v53, %v4170_v33 }
 0x179   : > { %v1173_v48 = vpop.permute.xlu1 %1172 }
 0x17a   : > { %vm1228_vm11 = vcmp.eq.f32.partialorder %v1173_v48, %v4170_v33 }
 0x17b   : > { %vm2846_vm12 = vmpackc.low %vm1228_vm11, %vm1227_vm10  ;;  %vm1544_vm10 = vcmask 1042434   ;;  %vm1546_vm11 = vcmask 1043459  }
 0x17c   : > { %1107 = vmatmul.mubr.bf16.gmra.mrb[16].mxu0 %v786_v36  ;;  %3083 = vmatpush3.bf16.msk.msra.mxu1 %vm2846_vm12, %v3602_v1 }
 0x17d   : > { %3102 = vmatprep.subr.msk.bf16.mxu0 %vm2846_vm12, %v3602_v1  ;;  %v1178_v49 = vpop.permute.xlu1 %1177  ;;  %3084 = vmatprep.subr.bf16.mxu1 %v3599_v0 }
 0x17e   : > { %3103 = vmatpush3.bf16.msk.msra.mxu0 %vm2846_vm12, %v3602_v1  ;;  %vm1229_vm14 = vcmp.eq.f32.partialorder %v1178_v49, %v4170_v33  ;;  %vm1548_vm12 = vcmask 1044484  }
 0x17f   : > { %vm2848_vm15 = vmpackc.low %vm1230_vm13, %vm1229_vm14  ;;  %vm1550_vm13 = vcmask 1045509   ;;  %vm1552_vm14 = vcmask 1046534  }
 0x180   : > { %3085 = vmatpush3.bf16.msk.msra.mxu1 %vm2848_vm15, %v3602_v1  ;;  %3104 = vmatprep.subr.msk.bf16.mxu0 %vm2848_vm15, %v3602_v1 }
 0x181   : > { %v1188_v50 = vpop.permute.xlu1 %1187  ;;  %3086 = vmatprep.subr.bf16.mxu1 %v3599_v0 }
 0x182   : > { %3105 = vmatpush3.bf16.msk.msra.mxu0 %vm2848_vm15, %v3602_v1  ;;  %vm1231_vm2 = vcmp.eq.f32.partialorder %v1188_v50, %v4170_v33  ;;  %vm1554_vm15 = vcmask 1047559  }
 0x183   : > { %vm2850_vm3 = vmpackc.low %vm1232_vm1, %vm1231_vm2 }
 0x184   : > { %3087 = vmatpush3.bf16.msk.msra.mxu1 %vm2850_vm3, %v3602_v1  ;;  %3106 = vmatprep.subr.msk.bf16.mxu0 %vm2850_vm3, %v3602_v1 }
 0x185   : > { %v1198_v52 = vpop.permute.xlu1 %1197  ;;  %3088 = vmatprep.subr.bf16.mxu1 %v3599_v0 }
 0x186   : > { %3107 = vmatpush3.bf16.msk.msra.mxu0 %vm2850_vm3, %v3602_v1  ;;  %vm1233_vm5 = vcmp.eq.f32.partialorder %v1198_v52, %v4170_v33 }
 0x187   : > { %vm2852_vm6 = vmpackc.low %vm1234_vm4, %vm1233_vm5 }
 0x188   : > { %3089 = vmatpush3.bf16.msk.msra.mxu1 %vm2852_vm6, %v3602_v1  ;;  %3108 = vmatprep.subr.msk.bf16.mxu0 %vm2852_vm6, %v3602_v1 }
 0x189   : > { %3090 = vmatprep.subr.bf16.mxu1 %v3599_v0  ;;  %v1208_v27 = vpop.permute.xlu1 %1207 }
 0x18a   : > { %3109 = vmatpush3.bf16.msk.msra.mxu0 %vm2852_vm6, %v3602_v1  ;;  %vm1235_vm7 = vcmp.eq.f32.partialorder %v1208_v27, %v4170_v33 }
 0x18b   : > { %vm2854_vm9 = vmpackc.low %vm1236_vm8, %vm1235_vm7 }
 0x18c   : > { %3091 = vmatpush3.bf16.msk.msra.mxu1 %vm2854_vm9, %v3602_v1  ;;  %3110 = vmatprep.subr.msk.bf16.mxu0 %vm2854_vm9, %v3602_v1 }
 0x18d   : > { %3120 = vmatprep.subr.bf16.mxu1 %v3599_v0 }
 0x18e   : > { %3111 = vmatpush3.bf16.msk.msra.mxu0 %vm2854_vm9, %v3602_v1 }
 0x217   : > { %v997_v4 = vpop.f32.mrb[0].mxu0  ;;  %v4196_v7 = vpop.f32.mrb[0].mxu1 }
 0x218   : > { %v1117_v26 = vmul.f32 0.17677669, %v997_v4  ;;  %v999_v35 = vpop.f32.mrb[1].mxu0  ;;  %v3074_v28 = vpop.f32.mrb[1].mxu1 }
 0x219   : > { %v1001_v55 = vpop.f32.mrb[2].mxu0  ;;  %v1041_v56 = vpop.f32.mrb[2].mxu1 }
 0x21a   : > { %v1277_v32 = vmul.f32 %v1117_v26, %v999_v35  ;;  %v1002_v40 = vpop.f32.mrb[3].mxu0  ;;  %v3075_v57 = vpop.f32.mrb[3].mxu1  ;;  %v1287_v43 = vrot.slane %v1117_v26, %v4203_v12  ;;  %v1280_v20 = vcombine.high %v1117_v26, %v1117_v26  ;;  %v3262_v56 = vld [vmem:[%s4462_s7] sm:$0xff]  }
 0x21b   : > { %v3264_v40 = vld [vmem:[%s4462_s7 + $0x10] sm:$0xff]   ;;  %v3265_v57 = vld [vmem:[%s4462_s7 + $0x18] sm:$0xff]  }
 0x21c   : > { %v1278_v59 = vpack.c.bf16 %v1277_v32, %v1277_v32  ;;  %v1295_v54 = vcombine.high %v1287_v43, %v1287_v43  ;;  %v1303_v46 = vrot.slane %v1287_v43, %v4203_v12  ;;  %v1294_v5 = vrot.slane %v1280_v20, %v4203_v12  ;;  %v3263_v32 = vld [vmem:[%s4462_s7 + $0x8] sm:$0xff]  }
 0x21e   : > { %3093 = vmatmul.mubr.bf16.vlgmr.msra.gmra.mrb[4].mxu1 %v1278_v59  ;;  %v1317_v62 = vrot.slane %v1295_v54, %v4203_v12  ;;  %v1332_v63 = vrot.slane %v1303_v46, %v4207_v41  ;;  %v1325_v10 = vcombine.high %v1303_v46, %v1303_v46  ;;  %v1296_v22 = vcombine.high %v1294_v5, %v1294_v5  ;;  %v3266_v59 = vld [vmem:[%s4462_s7 + $0x20] sm:$0xff]   ;;  %v3269_v46 = vld [vmem:[%s4462_s7 + $0x38] sm:$0xff]  }
 0x21f   : > { %3136 = vmatprep.mubr.msk.bf16.mxu1 %vm3601_vm0, %v3599_v0  ;;  %v1310_v16 = vrot.slane %v1294_v5, %v4203_v12  ;;  %3121 = vmatpush3.bf16.msra.mxu1 %v3262_v56  ;;  %vm1542_vm0 = vcmask 1041409  }
 0x220   : > { %v1336_v44 = vrot.slane %v1317_v62, %v4207_v41  ;;  %v1327_v14 = vcombine.high %v1317_v62, %v1317_v62  ;;  %v1340_v15 = vrot.slane %v1325_v10, %v4207_v41  ;;  %v1324_v24 = vrot.slane %v1296_v22, %v4203_v12  ;;  %3122 = vmatprep.subr.bf16.mxu1 %v3599_v0 }
 0x221   : > { %v1348_v36 = vrot.slane %v1310_v16, %v4207_v41  ;;  %v1326_v30 = vcombine.high %v1310_v16, %v1310_v16 }
 0x222   : > { %v1344_v18 = vrot.slane %v1327_v14, %v4207_v41  ;;  %v1352_v42 = vrot.slane %v1324_v24, %v4207_v41  ;;  %v1328_v50 = vcombine.high %v1324_v24, %v1324_v24 }
 0x223   : > { %v1356_v51 = vrot.slane %v1326_v30, %v4207_v41  ;;  %3123 = vmatpush3.bf16.msra.mxu1 %v3263_v32 }
 0x224   : > { %v1360_v4 = vrot.slane %v1328_v50, %v4207_v41  ;;  %3124 = vmatprep.subr.bf16.mxu1 %v3599_v0 }
 0x227   : > { %3125 = vmatpush3.bf16.msra.mxu1 %v3264_v40 }
 0x228   : > { %3126 = vmatprep.subr.bf16.mxu1 %v3599_v0 }
 0x22b   : > { %3127 = vmatpush3.bf16.msra.mxu1 %v3265_v57 }
 0x22c   : > { %3128 = vmatprep.subr.bf16.mxu1 %v3599_v0 }
 0x22f   : > { %3129 = vmatpush3.bf16.msra.mxu1 %v3266_v59 }
 0x230   : > { %3130 = vmatprep.subr.bf16.mxu1 %v3599_v0 }
 0x233   : > { %3131 = vmatpush3.bf16.msra.mxu1 %v3267_v60 }
 0x234   : > { %3132 = vmatprep.subr.bf16.mxu1 %v3599_v0 }
 0x237   : > { %v1078_v2 = vpop.f32.mrb[4].mxu0  ;;  %3133 = vmatpush3.bf16.msra.mxu1 %v3268_v58 }
 0x238   : > { %v1369_v3 = vmul.f32 %v1332_v63, %v1078_v2  ;;  %v4212_v6 = vpop.f32.mrb[5].mxu0  ;;  %3134 = vmatprep.subr.bf16.mxu1 %v3599_v0 }
 0x239   : > { %v1082_v8 = vpop.f32.mrb[6].mxu0 }
 0x23a   : > { %v1370_v23 = vmul.f32 %v1336_v44, %v1082_v8  ;;  %v4215_v9 = vpop.f32.mrb[7].mxu0 }
 0x23b   : > { %3135 = vmatpush3.bf16.msra.mxu1 %v3269_v46 }
 0x23c   : > { %v1377_v11 = vpack.c.bf16 %v1370_v23, %v1369_v3 }
 0x23e   : > { %3112 = vmatprep.mubr.bf16.mxu0 %v1377_v11 }
 0x23f   : > { %v1088_v19 = vpop.f32.mrb[8].mxu0 }
 0x240   : > { %v1371_v17 = vmul.f32 %v1340_v15, %v1088_v19  ;;  %v4219_v31 = vpop.f32.mrb[9].mxu0 }
 0x241   : > { %v1092_v34 = vpop.f32.mrb[10].mxu0 }
 0x242   : > { %v1372_v25 = vmul.f32 %v1344_v18, %v1092_v34  ;;  %v4222_v29 = vpop.f32.mrb[11].mxu0 }
 0x244   : > { %v1378_v33 = vpack.c.bf16 %v1372_v25, %v1371_v17 }
 0x246   : > { %3113 = vmatmul.mubr.bf16.vlgmr.msra.gmra.mrb[20].mxu0 %v1378_v33 }
 0x247   : > { %v1098_v38 = vpop.f32.mrb[12].mxu0 }
 0x248   : > { %v1373_v39 = vmul.f32 %v1348_v36, %v1098_v38  ;;  %v4227_v1 = vpop.f32.mrb[13].mxu0 }
 0x249   : > { %v1102_v45 = vpop.f32.mrb[14].mxu0 }
 0x24a   : > { %v1374_v21 = vmul.f32 %v1352_v42, %v1102_v45  ;;  %v4230_v48 = vpop.f32.mrb[15].mxu0 }
 0x24c   : > { %v1379_v49 = vpack.c.bf16 %v1374_v21, %v1373_v39 }
 0x24e   : > { %3116 = vmatprep.mubr.bf16.mxu0 %v1379_v49 }
 0x24f   : > { %v1108_v52 = vpop.f32.mrb[16].mxu0 }
 0x250   : > { %v1375_v27 = vmul.f32 %v1356_v51, %v1108_v52  ;;  %v4233_v53 = vpop.f32.mrb[17].mxu0 }
 0x251   : > { %v1112_v26 = vpop.f32.mrb[18].mxu0 }
 0x252   : > { %v1376_v35 = vmul.f32 %v1360_v4, %v1112_v26  ;;  %v4236_v28 = vpop.f32.mrb[19].mxu0 }
 0x254   : > { %v1380_v55 = vpack.c.bf16 %v1376_v35, %v1375_v27 }
 0x256   : > { %3117 = vmatmul.mubr.bf16.gmra.mrb[24].mxu0 %v1380_v55 }
 0x257   : > { %2213 = vmatprep.mubr.bf16.mxu0 %v3600_v47 }
 0x2f1   : > { %v4262_v37 = vpop.f32.mrb[4].mxu1 }
 0x2f2   : > { %v3094_v13 = vpop.f32.mrb[5].mxu1 }
 0x2f3   : > { %v1418_v43 = vpop.f32.mrb[6].mxu1 }
 0x2f4   : > { %v3095_v54 = vpop.f32.mrb[7].mxu1 }
 0x319   : > { %v4272_v62 = vpop.f32.mrb[20].mxu0 }
 0x31a   : > { %v1498_v63 = vrot.slane %v4272_v62, 4  ;;  %v4275_v2 = vpop.f32.mrb[21].mxu0 }
 0x31b   : > { %v1486_v20 = vrot.slane %v4275_v2, 4  ;;  %v4278_v3 = vpop.f32.mrb[22].mxu0 }
 0x31c   : > { %v1499_v44 = vmax.f32 %v4272_v62, %v1498_v63  ;;  %v1504_v8 = vrot.slane %v4278_v3, 4  ;;  %v4282_v23 = vpop.f32.mrb[23].mxu0 }
 0x31d   : > { %v1487_v10 = vmax.f32 %v4275_v2, %v1486_v20  ;;  %v1492_v0 = vrot.slane %v4282_v23, 4 }
 0x31e   : > { %v1500_v11 = vrot.slane %v1499_v44, 2  ;;  %v1505_v14 = vmax.f32 %v4278_v3, %v1504_v8 }
 0x31f   : > { %v1488_v5 = vrot.slane %v1487_v10, 2  ;;  %v1493_v15 = vmax.f32 %v4282_v23, %v1492_v0 }
 0x320   : > { %v1501_v19 = vmax.f32 %v1499_v44, %v1500_v11  ;;  %v1506_v17 = vrot.slane %v1505_v14, 2 }
 0x321   : > { %v1489_v18 = vmax.f32 %v1487_v10, %v1488_v5  ;;  %v1494_v22 = vrot.slane %v1493_v15, 2 }
 0x322   : > { %v1507_v34 = vmax.f32 %v1505_v14, %v1506_v17  ;;  %v1502_v33 = vrot.slane %v1501_v19, 1 }
 0x323   : > { %v1490_v25 = vrot.slane %v1489_v18, 1  ;;  %v1495_v16 = vmax.f32 %v1493_v15, %v1494_v22 }
 0x324   : > { %v1508_v24 = vrot.slane %v1507_v34, 1  ;;  %v1503_v42 = vmax.f32 %v1501_v19, %v1502_v33 }
 0x325   : > { %v1496_v36 = vrot.slane %v1495_v16, 1  ;;  %v1491_v38 = vmax.f32 %v1489_v18, %v1490_v25 }
 0x326   : > { %v1509_v45 = vmax.f32 %v1507_v34, %v1508_v24 }
 0x327   : > { %v1497_v39 = vmax.f32 %v1495_v16, %v1496_v36 }
 0x329   : > { %v1543_v21 = vsel %vm1542_vm0, %v1497_v39, %v1491_v38  ;;  %v4289_v30 = vpop.f32.mrb[24].mxu0 }
 0x32a   : > { %v1545_v49 = vsel %vm1544_vm10, %v1503_v42, %v1543_v21  ;;  %v1522_v50 = vrot.slane %v4289_v30, 4  ;;  %v1471_v51 = vpop.f32.mrb[25].mxu0 }
 0x32b   : > { %v1510_v52 = vrot.slane %v1471_v51, 4  ;;  %v1547_v27 = vsel %vm1546_vm11, %v1509_v45, %v1545_v49  ;;  %v4294_v4 = vpop.f32.mrb[26].mxu0 }
 0x32c   : > { %v1523_v26 = vmax.f32 %v4289_v30, %v1522_v50  ;;  %v1528_v35 = vrot.slane %v4294_v4, 4  ;;  %v1474_v55 = vpop.f32.mrb[27].mxu0 }
 0x32d   : > { %v1511_v56 = vmax.f32 %v1471_v51, %v1510_v52  ;;  %v1516_v32 = vrot.slane %v1474_v55, 4 }
 0x32e   : > { %v1524_v40 = vrot.slane %v1523_v26, 2  ;;  %v1529_v57 = vmax.f32 %v4294_v4, %v1528_v35 }
 0x32f   : > { %v1512_v59 = vrot.slane %v1511_v56, 2  ;;  %v1517_v60 = vmax.f32 %v1474_v55, %v1516_v32 }
 0x330   : > { %v1525_v13 = vmax.f32 %v1523_v26, %v1524_v40  ;;  %v1530_v58 = vrot.slane %v1529_v57, 2 }
 0x331   : > { %v1513_v43 = vmax.f32 %v1511_v56, %v1512_v59  ;;  %v1518_v54 = vrot.slane %v1517_v60, 2 }
 0x332   : > { %v1531_v46 = vmax.f32 %v1529_v57, %v1530_v58  ;;  %v1526_v44 = vrot.slane %v1525_v13, 1 }
 0x333   : > { %v1514_v63 = vrot.slane %v1513_v43, 1  ;;  %v1519_v20 = vmax.f32 %v1517_v60, %v1518_v54 }
 0x334   : > { %v1532_v10 = vrot.slane %v1531_v46, 1  ;;  %v1527_v5 = vmax.f32 %v1525_v13, %v1526_v44 }
 0x335   : > { %v1515_v8 = vmax.f32 %v1513_v43, %v1514_v63  ;;  %v1520_v0 = vrot.slane %v1519_v20, 1 }
 0x336   : > { %v1533_v15 = vmax.f32 %v1531_v46, %v1532_v10 }
 0x337   : > { %v1549_v11 = vsel %vm1548_vm12, %v1515_v8, %v1547_v27  ;;  %v1521_v14 = vmax.f32 %v1519_v20, %v1520_v0 }
 0x339   : > { %v1551_v19 = vsel %vm1550_vm13, %v1521_v14, %v1549_v11 }
 0x33a   : > { %v1553_v17 = vsel %vm1552_vm14, %v1527_v5, %v1551_v19 }
 0x33b   : > { %v1555_v18 = vsel %vm1554_vm15, %v1533_v15, %v1553_v17 }
 0x33c   : > { %v1557_v22 = vmax.f32 %v4262_v37, %v1555_v18 }
 0x33e   : > { %v1558_v34 = vsub.f32 %v4262_v37, %v1557_v22  ;;  %v1562_v25 = vcombine.high %v1557_v22, %v1557_v22  ;;  %v1569_v16 = vrot.slane %v1557_v22, %v4203_v12 }
 0x340   : > { %v1559_v33 = vmul.f32 1.442695, %v1558_v34  ;;  %v1576_v24 = vrot.slane %v1562_v25, %v4203_v12  ;;  %v1577_v36 = vcombine.high %v1569_v16, %v1569_v16  ;;  %v1585_v38 = vrot.slane %v1569_v16, %v4203_v12 }
 0x342   : > { %v1578_v39 = vcombine.high %v1576_v24, %v1576_v24  ;;  %v1592_v42 = vrot.slane %v1576_v24, %v4203_v12  ;;  %v1599_v45 = vrot.slane %v1577_v36, %v4203_v12  ;;  %v1607_v21 = vcombine.high %v1585_v38, %v1585_v38 }
 0x343   : > { %v1614_v49 = vrot.slane %v1585_v38, %v4207_v41  ;;  %3368 = vpow2.f32 %v1559_v33 }
 0x344   : > { %v1606_v37 = vrot.slane %v1578_v39, %v4203_v12  ;;  %v1608_v50 = vcombine.high %v1592_v42, %v1592_v42  ;;  %v1609_v52 = vcombine.high %v1599_v45, %v1599_v45  ;;  %v1618_v27 = vrot.slane %v1599_v45, %v4207_v41 }
 0x345   : > { %v1622_v26 = vrot.slane %v1607_v21, %v4207_v41  ;;  %v1630_v35 = vrot.slane %v1592_v42, %v4207_v41  ;;  %v1651_v56 = vsub.f32 %v4275_v2, %v1614_v49 }
 0x346   : > { %v1610_v32 = vcombine.high %v1606_v37, %v1606_v37  ;;  %v1626_v40 = vrot.slane %v1609_v52, %v4207_v41  ;;  %v1634_v57 = vrot.slane %v1606_v37, %v4207_v41  ;;  %v1638_v59 = vrot.slane %v1608_v50, %v4207_v41 }
 0x347   : > { %v1652_v60 = vsub.f32 %v4282_v23, %v1618_v27  ;;  %v1653_v12 = vsub.f32 %v4272_v62, %v1622_v26  ;;  %v1655_v13 = vsub.f32 %v1471_v51, %v1630_v35  ;;  %v1659_v58 = vmul.f32 1.442695, %v1651_v56 }
 0x348   : > { %v1642_v43 = vrot.slane %v1610_v32, %v4207_v41  ;;  %v1654_v54 = vsub.f32 %v4278_v3, %v1626_v40  ;;  %v1656_v46 = vsub.f32 %v1474_v55, %v1634_v57  ;;  %v1657_v2 = vsub.f32 %v4289_v30, %v1638_v59 }
 0x349   : > { %3370 = vpow2.f32 %v1659_v58  ;;  %v1661_v63 = vmul.f32 1.442695, %v1652_v60  ;;  %v1663_v20 = vmul.f32 1.442695, %v1653_v12  ;;  %v1667_v10 = vmul.f32 1.442695, %v1655_v13 }
 0x34a   : > { %v1658_v44 = vsub.f32 %v4294_v4, %v1642_v43  ;;  %v1665_v8 = vmul.f32 1.442695, %v1654_v54  ;;  %v1669_v23 = vmul.f32 1.442695, %v1656_v46  ;;  %v1671_v62 = vmul.f32 1.442695, %v1657_v2 }
 0x34b   : > { %3372 = vpow2.f32 %v1661_v63 }
 0x34c   : > { %3374 = vpow2.f32 %v1663_v20  ;;  %v1673_v0 = vmul.f32 1.442695, %v1658_v44 }
 0x34d   : > { %v4325_v51 = vpop.eup %3368  ;;  %3376 = vpow2.f32 %v1665_v8 }
 0x34e   : > { %3378 = vpow2.f32 %v1667_v10  ;;  %v4329_v3 = vmul.f32 %v4325_v51, %v4196_v7 }
 0x34f   : > { %3380 = vpow2.f32 %v1669_v23 }
 0x350   : > { %3382 = vpow2.f32 %v1671_v62 }
 0x351   : > { %3384 = vpow2.f32 %v1673_v0 }
 0x353   : > { %v3371_v30 = vpop.eup %3370 }
 0x354   : > { %v1675_v4 = vrot.slane %v3371_v30, 4  ;;  %v1742_v55 = vmul.f32 %v3371_v30, %v4212_v6 }
 0x355   : > { %v3373_v11 = vpop.eup %3372 }
 0x356   : > { %v3375_v14 = vpop.eup %3374  ;;  %v1676_v5 = vadd.f32 %v3371_v30, %v1675_v4  ;;  %v1681_v15 = vrot.slane %v3373_v11, 4  ;;  %v4333_v19 = vmul.f32 %v3373_v11, %v4215_v9  ;;  %v1750_v17 = vrot.slane %v1742_v55, 4 }
 0x357   : > { %v3377_v18 = vpop.eup %3376  ;;  %v1687_v22 = vrot.slane %v3375_v14, 4  ;;  %v4336_v7 = vmul.f32 %v3375_v14, %v4219_v31 }
 0x358   : > { %v3379_v34 = vpop.eup %3378  ;;  %v1677_v25 = vrot.slane %v1676_v5, 2  ;;  %v1682_v16 = vadd.f32 %v3373_v11, %v1681_v15  ;;  %v1693_v33 = vrot.slane %v3377_v18, 4  ;;  %v4339_v24 = vmul.f32 %v3377_v18, %v4222_v29 }
 0x359   : > { %v3381_v6 = vpop.eup %3380  ;;  %v1688_v36 = vadd.f32 %v3375_v14, %v1687_v22  ;;  %v1699_v38 = vrot.slane %v3379_v34, 4  ;;  %v4342_v39 = vmul.f32 %v3379_v34, %v4227_v1  ;;  %v1751_v9 = vadd.f32 %v1750_v17, %v1742_v55 }
 0x35a   : > { %v3383_v42 = vpop.eup %3382  ;;  %v1678_v45 = vadd.f32 %v1677_v25, %v1676_v5  ;;  %v1683_v21 = vrot.slane %v1682_v16, 2  ;;  %v1694_v49 = vadd.f32 %v3377_v18, %v1693_v33  ;;  %v1705_v31 = vrot.slane %v3381_v6, 4 }
 0x35b   : > { %v3385_v37 = vpop.eup %3384  ;;  %v1689_v50 = vrot.slane %v1688_v36, 2  ;;  %v1700_v52 = vadd.f32 %v3379_v34, %v1699_v38  ;;  %v1711_v27 = vrot.slane %v3383_v42, 4  ;;  %v1747_v26 = vmul.f32 %v3381_v6, %v4230_v48 }
 0x35c   : > { %v1679_v29 = vrot.slane %v1678_v45, 1  ;;  %v1684_v35 = vadd.f32 %v1683_v21, %v1682_v16  ;;  %v1695_v56 = vrot.slane %v1694_v49, 2  ;;  %v1706_v32 = vadd.f32 %v3381_v6, %v1705_v31 }
 0x35d   : > { %v1690_v40 = vadd.f32 %v1689_v50, %v1688_v36  ;;  %v1701_v57 = vrot.slane %v1700_v52, 2  ;;  %v1712_v1 = vadd.f32 %v3383_v42, %v1711_v27  ;;  %v1717_v59 = vrot.slane %v3385_v37, 4 }
 0x35e   : > { %v1680_v60 = vadd.f32 %v1679_v29, %v1678_v45  ;;  %v1685_v12 = vrot.slane %v1684_v35, 1  ;;  %v1696_v13 = vadd.f32 %v1695_v56, %v1694_v49  ;;  %v1707_v58 = vrot.slane %v1706_v32, 2 }
 0x35f   : > { %v1691_v43 = vrot.slane %v1690_v40, 1  ;;  %v1702_v54 = vadd.f32 %v1701_v57, %v1700_v52  ;;  %v1713_v46 = vrot.slane %v1712_v1, 2  ;;  %v1718_v2 = vadd.f32 %v3385_v37, %v1717_v59 }
 0x360   : > { %v1686_v63 = vadd.f32 %v1685_v12, %v1684_v35  ;;  %v1697_v20 = vrot.slane %v1696_v13, 1  ;;  %v1708_v44 = vadd.f32 %v1707_v58, %v1706_v32  ;;  %v1748_v48 = vmul.f32 %v3383_v42, %v4233_v53 }
 0x361   : > { %v1692_v8 = vadd.f32 %v1691_v43, %v1690_v40  ;;  %v1703_v10 = vrot.slane %v1702_v54, 1  ;;  %v1714_v23 = vadd.f32 %v1713_v46, %v1712_v1  ;;  %v1719_v62 = vrot.slane %v1718_v2, 2 }
 0x362   : > { %v1698_v0 = vadd.f32 %v1697_v20, %v1696_v13  ;;  %v1709_v30 = vrot.slane %v1708_v44, 1  ;;  %v1731_v4 = vsel %vm1542_vm0, %v1686_v63, %v1680_v60  ;;  %v1749_v55 = vmul.f32 %v3385_v37, %v4236_v28 }
 0x363   : > { %v1704_v11 = vadd.f32 %v1703_v10, %v1702_v54  ;;  %v1715_v14 = vrot.slane %v1714_v23, 1  ;;  %v1732_v5 = vsel %vm1544_vm10, %v1692_v8, %v1731_v4  ;;  %v1720_v15 = vadd.f32 %v1719_v62, %v1718_v2 }
 0x364   : > { %v1710_v17 = vadd.f32 %v1709_v30, %v1708_v44  ;;  %v1733_v18 = vsel %vm1546_vm11, %v1698_v0, %v1732_v5  ;;  %v1752_v22 = vrot.slane %v1751_v9, 2  ;;  %v1756_v53 = vrot.slane %v4333_v19, 4 }
 0x365   : > { %v1716_v34 = vadd.f32 %v1715_v14, %v1714_v23  ;;  %v1734_v25 = vsel %vm1548_vm12, %v1704_v11, %v1733_v18  ;;  %v1721_v16 = vrot.slane %v1720_v15, 1  ;;  %v1762_v33 = vrot.slane %v4336_v7, 4 }
 0x366   : > { %v1735_v6 = vsel %vm1550_vm13, %v1710_v17, %v1734_v25  ;;  %v1753_v28 = vadd.f32 %v1752_v22, %v1751_v9  ;;  %v1757_v36 = vadd.f32 %v1756_v53, %v4333_v19  ;;  %v1768_v38 = vrot.slane %v4339_v24, 4 }
 0x367   : > { %v1736_v42 = vsel %vm1552_vm14, %v1716_v34, %v1735_v6  ;;  %v1722_v45 = vadd.f32 %v1721_v16, %v1720_v15  ;;  %v1763_v21 = vadd.f32 %v1762_v33, %v4336_v7  ;;  %v1774_v49 = vrot.slane %v4342_v39, 4  ;;  %v3270_v33 = vld [vmem:[#allocation7] ss:$16 sps:$4 sm:$0xff]   ;;  %v3272_v6 = vld [vmem:[#allocation7 + $0x4] ss:$16 sps:$4 sm:$0xff]  }
 0x368   : > { %v1754_v31 = vrot.slane %v1753_v28, 1  ;;  %v1758_v37 = vrot.slane %v1757_v36, 2  ;;  %v1769_v50 = vadd.f32 %v1768_v38, %v4339_v24  ;;  %v1780_v52 = vrot.slane %v1747_v26, 4  ;;  %v3278_v38 = vld [vmem:[#allocation7 + $0x24] ss:$16 sps:$4 sm:$0xff]   ;;  %2181 = vmatprep.subr.bf16.mxu0 %v3272_v6  ;;  %v3323_v6 = vld [vmem:[#allocation8 + $0xc8] sm:$0xff]  }
 0x369   : > { %v1737_v27 = vsel %vm1554_vm15, %v1722_v45, %v1736_v42  ;;  %v1764_v29 = vrot.slane %v1763_v21, 2  ;;  %v1775_v9 = vadd.f32 %v1774_v49, %v4342_v39  ;;  %v1786_v19 = vrot.slane %v1748_v48, 4  ;;  %v3281_v42 = vld [vmem:[#allocation7 + $0x2c] ss:$16 sps:$4 sm:$0xff]   ;;  %2182 = vmatpush1.bf16.msra.mxu0 %v3270_v33  ;;  %v3276_v45 = vld [vmem:[#allocation7 + $0x20] ss:$16 sps:$4 sm:$0xff]  }
 0x36a   : > { %v1739_v35 = vadd.f32 %v4325_v51, %v1737_v27  ;;  %v1759_v56 = vadd.f32 %v1758_v37, %v1757_v36  ;;  %v1770_v32 = vrot.slane %v1769_v50, 2  ;;  %v1781_v7 = vadd.f32 %v1780_v52, %v1747_v26  ;;  %v3275_v36 = vld [vmem:[#allocation7 + $0xc] ss:$16 sps:$4 sm:$0xff]   ;;  %2183 = vmatprep.subr.bf16.mxu0 %v3278_v38  ;;  %v2881_v49 = vld [vmem:[%s4470_s15] ss:$0 sm:$0xff] }
 0x36b   : > { %v1765_v40 = vadd.f32 %v1764_v29, %v1763_v21  ;;  %v1776_v57 = vrot.slane %v1775_v9, 2  ;;  %v1787_v1 = vadd.f32 %v1786_v19, %v1748_v48  ;;  %v1755_v59 = vadd.f32 %v1754_v31, %v1753_v28  ;;  %v3273_v28 = vld [vmem:[#allocation7 + $0x8] ss:$16 sps:$4 sm:$0xff]   ;;  %2222 = vmatprep.subr.bf16.mxu1 %v3275_v36  ;;  %v3326_v38 = vld [vmem:[#allocation8 + $0x50] sm:$0xff]  }
 0x36c   : > { %v1760_v60 = vrot.slane %v1759_v56, 1  ;;  %v1771_v12 = vadd.f32 %v1770_v32, %v1769_v50  ;;  %v1792_v13 = vrot.slane %v1749_v55, 4  ;;  %v1782_v43 = vrot.slane %v1781_v7, 2  ;;  %v3279_v21 = vld [vmem:[#allocation7 + $0x28] ss:$16 sps:$4 sm:$0xff]  }
 0x36d   : > { %v1766_v24 = vrot.slane %v1765_v40, 1  ;;  %v1777_v58 = vadd.f32 %v1776_v57, %v1775_v9  ;;  %v1788_v54 = vrot.slane %v1787_v1, 2  ;;  %3386 = vrcp.f32 %v1739_v35  ;;  %2184 = vmatpush1.bf16.msra.mxu0 %v3276_v45  ;;  %v3398_v29 = vld [vmem:[%s3888_s24] sm:$0xff]  ;;  %v3322_v33 = vld [vmem:[#allocation8 + $0x48] sm:$0xff]   ;;  %s3519_s24 = scalar_lea.vmem %s3518_s16, 256 }
 0x36e   : > { %v1761_v46 = vadd.f32 %v1760_v60, %v1759_v56  ;;  %v1772_v39 = vrot.slane %v1771_v12, 1  ;;  %v1793_v2 = vadd.f32 %v1792_v13, %v1749_v55  ;;  %v1783_v20 = vadd.f32 %v1782_v43, %v1781_v7  ;;  %v3284_v35 = vld [vmem:[#allocation7 + $0x44] ss:$16 sps:$4 sm:$0xff]   ;;  %v3287_v56 = vld [vmem:[#allocation7 + $0x4c] ss:$16 sps:$4 sm:$0xff]  }
 0x36f   : > { %v1767_v63 = vadd.f32 %v1766_v24, %v1765_v40  ;;  %v1778_v51 = vrot.slane %v1777_v58, 1  ;;  %v1789_v44 = vadd.f32 %v1788_v54, %v1787_v1  ;;  %v3282_v32 = vld [vmem:[#allocation7 + $0x40] ss:$16 sps:$4 sm:$0xff]   ;;  %v3285_v40 = vld [vmem:[#allocation7 + $0x48] ss:$16 sps:$4 sm:$0xff]   ;;  %2185 = vmatprep.subr.bf16.mxu0 %v3284_v35 }
 0x370   : > { %v1773_v8 = vadd.f32 %v1772_v39, %v1771_v12  ;;  %v1794_v10 = vrot.slane %v1793_v2, 2  ;;  %v1806_v26 = vsel %vm1542_vm0, %v1761_v46, %v1755_v59  ;;  %v1784_v23 = vrot.slane %v1783_v20, 1  ;;  %v3290_v57 = vld [vmem:[#allocation7 + $0x64] ss:$16 sps:$4 sm:$0xff]   ;;  %v3293_v7 = vld [vmem:[#allocation7 + $0x6c] ss:$16 sps:$4 sm:$0xff]  }
 0x371   : > { %v1779_v48 = vadd.f32 %v1778_v51, %v1777_v58  ;;  %v1790_v62 = vrot.slane %v1789_v44, 1  ;;  %v1807_v0 = vsel %vm1544_vm10, %v1767_v63, %v1806_v26  ;;  %2186 = vmatpush1.bf16.msra.mxu0 %v3282_v32  ;;  %v3288_v1 = vld [vmem:[#allocation7 + $0x60] ss:$16 sps:$4 sm:$0xff]   ;;  %v3291_v59 = vld [vmem:[#allocation7 + $0x68] ss:$16 sps:$4 sm:$0xff]  }
 0x372   : > { %v1795_v30 = vadd.f32 %v1794_v10, %v1793_v2  ;;  %v1808_v4 = vsel %vm1546_vm11, %v1773_v8, %v1807_v0  ;;  %v1785_v11 = vadd.f32 %v1784_v23, %v1783_v20  ;;  %2187 = vmatprep.subr.bf16.mxu0 %v3290_v57  ;;  %v3294_v60 = vld [vmem:[#allocation7 + $0x80] ss:$16 sps:$4 sm:$0xff]   ;;  %v3296_v12 = vld [vmem:[#allocation7 + $0x84] ss:$16 sps:$4 sm:$0xff]   ;;  %v3297_v13 = vld [vmem:[#allocation7 + $0x88] ss:$16 sps:$4 sm:$0xff]  }
 0x373   : > { %v1809_v14 = vsel %vm1548_vm12, %v1779_v48, %v1808_v4  ;;  %v1791_v55 = vadd.f32 %v1790_v62, %v1789_v44  ;;  %v3299_v24 = vld [vmem:[#allocation7 + $0x8c] ss:$16 sps:$4 sm:$0xff]   ;;  %v3302_v58 = vld [vmem:[#allocation7 + $0xa4] ss:$16 sps:$4 sm:$0xff]   ;;  %v3300_v54 = vld [vmem:[#allocation7 + $0xa0] ss:$16 sps:$4 sm:$0xff]  }
 0x374   : > { %v1796_v5 = vrot.slane %v1795_v30, 1  ;;  %v1810_v15 = vsel %vm1550_vm13, %v1785_v11, %v1809_v14  ;;  %v3305_v43 = vld [vmem:[#allocation7 + $0xac] ss:$16 sps:$4 sm:$0xff]   ;;  %v3303_v46 = vld [vmem:[#allocation7 + $0xa8] ss:$16 sps:$4 sm:$0xff]   ;;  %v3328_v45 = vld [vmem:[#allocation8 + $0x10] sm:$0xff]  }
 0x375   : > { %v1811_v18 = vsel %vm1552_vm14, %v1791_v55, %v1810_v15  ;;  %2188 = vmatpush1.bf16.msra.mxu0 %v3288_v1  ;;  %v3308_v39 = vld [vmem:[#allocation7 + $0xc4] ss:$16 sps:$4 sm:$0xff]   ;;  %v3311_v2 = vld [vmem:[#allocation7 + $0xcc] ss:$16 sps:$4 sm:$0xff]   ;;  %v3306_v63 = vld [vmem:[#allocation7 + $0xc0] ss:$16 sps:$4 sm:$0xff]  }
 0x376   : > { %v1797_v17 = vadd.f32 %v1796_v5, %v1795_v30  ;;  %2189 = vmatprep.subr.bf16.mxu0 %v3296_v12  ;;  %v3309_v51 = vld [vmem:[#allocation7 + $0xc8] ss:$16 sps:$4 sm:$0xff]   ;;  %v3314_v20 = vld [vmem:[#allocation7 + $0xe4] ss:$16 sps:$4 sm:$0xff]   ;;  %v3317_v44 = vld [vmem:[#allocation7 + $0xec] ss:$16 sps:$4 sm:$0xff]  }
 0x377   : > { %v3387_v22 = vpop.eup %3386  ;;  %v3312_v8 = vld [vmem:[#allocation7 + $0xe0] ss:$16 sps:$4 sm:$0xff]   ;;  %v3315_v10 = vld [vmem:[#allocation7 + $0xe8] ss:$16 sps:$4 sm:$0xff]  }
 0x378   : > { %v1812_v53 = vsel %vm1554_vm15, %v1797_v17, %v1811_v18  ;;  %v2882_v55 = vld [vmem:[%s4508_s21] ss:$0 sm:$0xff]  ;;  %v3325_v36 = vld [vmem:[#allocation8 + $0x88] sm:$0xff]   ;;  %v3346_v1 = vld [vmem:[#allocation8 + $0x78] sm:$0xff]   ;;  %s4512_s21 = sld [smem:[#allocation24_spill]] }
 0x379   : > { %v1814_v34 = vadd.f32 %v1812_v53, %v4329_v3  ;;  %2190 = vmatpush1.bf16.msra.mxu0 %v3294_v60  ;;  %v2883_v15 = vld [vmem:[%s4509_s22] ss:$0 sm:$0xff]  ;;  %v3318_v53 = vld [vmem:[#allocation8 + $0x40] sm:$0xff]   ;;  %v3340_v35 = vld [vmem:[#allocation8 + $0x28] sm:$0xff]   ;;  %s2670_s22 = sshll.u32 %s623_s0, 4  ;;  %s4413_s22 = int_to_ptr.vmem [resolvable:$true] %s2670_s22 }
 0x37a   : > { %2191 = vmatprep.subr.bf16.mxu0 %v3302_v58  ;;  %v3342_v32 = vld [vmem:[#allocation8 + $0x70] sm:$0xff]   ;;  %v3348_v60 = vld [vmem:[#allocation8 + $0x38] sm:$0xff]   ;;  %v2007_v58 = vsub.s32 1, %v4200_v61  ;;  %p3520_p2 = scmp.lt.s32.totalorder %s4413_s22, %s3518_s16 }
 0x37b   : > { %v1815_v25 = vmul.f32 %v3387_v22, %v1814_v34  ;;  %v3319_v34 = vld [vmem:[#allocation8 + $0xc0] sm:$0xff]   ;;  %v3344_v57 = vld [vmem:[#allocation8 + $0x30] sm:$0xff]   ;;  %v3349_v12 = vld [vmem:[#allocation8 + $0xb8] sm:$0xff]  }
 0x37d   : > { %v1816_v16 = vpack.c.bf16 %v1815_v25, %v1815_v25  ;;  %2192 = vmatpush1.bf16.msra.mxu0 %v3300_v54  ;;  %v3320_v25 = vld [vmem:[#allocation8] sm:$0xff]  }
 0x37e   : > { %2193 = vmatprep.subr.bf16.mxu0 %v3308_v39 }
 0x37f   : > { %3137 = vmatmul.mubr.bf16.vlgmr.msra.gmra.mrb[8].mxu1 %v1816_v16  ;;  %v3321_v16 = vld [vmem:[#allocation8 + $0x80] sm:$0xff]  }
 0x380   : > { %2254 = vmatprep.mubr.bf16.mxu1 %v3600_v47  ;;  %2223 = vmatpush1.bf16.msra.mxu1 %v3273_v28  ;;  %v2872_v47 = vld [vmem:[%s4463_s8] ss:$0 sm:$0xff]  ;;  %v3324_v28 = vld [vmem:[#allocation8 + $0x8] sm:$0xff]  }
 0x381   : > { %2224 = vmatprep.subr.bf16.mxu1 %v3281_v42  ;;  %2194 = vmatpush1.bf16.msra.mxu0 %v3306_v63  ;;  %v3327_v42 = vld [vmem:[#allocation8 + $0xd0] sm:$0xff]  }
 0x382   : > { %2195 = vmatprep.subr.bf16.mxu0 %v3314_v20 }
 0x384   : > { %2225 = vmatpush1.bf16.msra.mxu1 %v3279_v21  ;;  %v3329_v21 = vld [vmem:[#allocation8 + $0x90] sm:$0xff]  }
 0x385   : > { %2226 = vmatprep.subr.bf16.mxu1 %v3287_v56  ;;  %2196 = vmatpush1.bf16.msra.mxu0 %v3312_v8  ;;  %v3341_v56 = vld [vmem:[#allocation8 + $0xa8] sm:$0xff]  }
 0x386   : > { %3012 = vmatprep.subr.bf16.mxu0 %v3318_v53 }
 0x388   : > { %2227 = vmatpush1.bf16.msra.mxu1 %v3285_v40  ;;  %v3343_v40 = vld [vmem:[#allocation8 + $0xf0] sm:$0xff]  }
 0x389   : > { %2228 = vmatprep.subr.bf16.mxu1 %v3293_v7  ;;  %v3345_v7 = vld [vmem:[#allocation8 + $0xb0] sm:$0xff]  }
 0x38c   : > { %2229 = vmatpush1.bf16.msra.mxu1 %v3291_v59  ;;  %v3347_v59 = vld [vmem:[#allocation8 + $0xf8] sm:$0xff]  }
 0x38d   : > { %2230 = vmatprep.subr.bf16.mxu1 %v3299_v24  ;;  %v1999_v24 = vld [vmem:[%s4510_s9] sm:$0xf]  ;;  %s4513_s9 = sld [smem:[#allocation25_spill]] }
 0x38e   : > { %v2004_v54 = vrot.slane %v1999_v24, %v4207_v41  ;;  %v2008_v39 = vrot.slane %v1999_v24, %v2007_v58 }
 0x390   : > { %2231 = vmatpush1.bf16.msra.mxu1 %v3297_v13  ;;  %v2011_v13 = vsub.s32 2, %v4200_v61 }
 0x391   : > { %2232 = vmatprep.subr.bf16.mxu1 %v3305_v43  ;;  %v2015_v43 = vsub.s32 3, %v4200_v61 }
 0x393   : > { %s4411_s20 = scalar_lea.hbm %s4513_s9, %s2951_s18 }
 0x394   : > { %2233 = vmatpush1.bf16.msra.mxu1 %v3303_v46  ;;  %v2012_v46 = vrot.slane %v1999_v24, %v2011_v13 }
 0x395   : > { %2234 = vmatprep.subr.bf16.mxu1 %v3311_v2  ;;  %v2016_v2 = vrot.slane %v1999_v24, %v2015_v43 }
 0x398   : > { %2235 = vmatpush1.bf16.msra.mxu1 %v3309_v51 }
 0x399   : > { %2236 = vmatprep.subr.bf16.mxu1 %v3317_v44 }
 0x39c   : > { %2237 = vmatpush1.bf16.msra.mxu1 %v3315_v10 }
 0x39d   : > { %3034 = vmatprep.subr.bf16.mxu1 %v3319_v34 }
 0x452   : > { %v1922_v3 = vpop.f32.mrb[8].mxu1 }
 0x453   : > { %v1923_v31 = vadd.f32 %v2872_v47, %v1922_v3  ;;  %v3138_v37 = vpop.f32.mrb[9].mxu1  ;;  %v3330_v47 = vld [vmem:[#allocation8 + $0x58] sm:$0xff]  }
 0x454   : > { %v1925_v50 = vpop.f32.mrb[10].mxu1  ;;  %v3331_v3 = vld [vmem:[#allocation8 + $0xd8] sm:$0xff]   ;;  %v3334_v37 = vld [vmem:[#allocation8 + $0x60] sm:$0xff]  }
 0x455   : > { %v1935_v52 = vmul.f32 %v2881_v49, %v1923_v31  ;;  %v3139_v27 = vpop.f32.mrb[11].mxu1  ;;  %v3332_v49 = vld [vmem:[#allocation8 + $0x18] sm:$0xff]   ;;  %v3335_v50 = vld [vmem:[#allocation8 + $0xe0] sm:$0xff]  }
 0x456   : > { %v3333_v31 = vld [vmem:[#allocation8 + $0x98] sm:$0xff]   ;;  %v3337_v27 = vld [vmem:[#allocation8 + $0xa0] sm:$0xff]  }
 0x457   : > { %v4379_v9 = vadd.f32 %v3398_v29, %v1935_v52  ;;  %v3336_v52 = vld [vmem:[#allocation8 + $0x20] sm:$0xff]   ;;  %v3338_v29 = vld [vmem:[#allocation8 + $0x68] sm:$0xff]  }
 0x459   : > { %1939 = vadd.xlane.f32.xlu1 %v4379_v9  ;;  %v1942_v19 = vmul.f32 %v4379_v9, %v4379_v9 }
 0x45b   : > { %1943 = vadd.xlane.f32.xlu0 %v1942_v19  ;;  %v3339_v19 = vld [vmem:[#allocation8 + $0xe8] sm:$0xff]  }
 0x4e6   : > { %v1940_v26 = vpop.xlane.xlu1 %1939 }
 0x4e7   : > { %v1941_v48 = vmul.f32 0.0078125, %v1940_v26 }
 0x4e8   : > { %v1944_v23 = vpop.xlane.xlu0 %1943 }
 0x4e9   : > { %v1946_v62 = vmul.f32 %v1941_v48, %v1941_v48  ;;  %v1945_v0 = vmul.f32 0.0078125, %v1944_v23  ;;  %v1948_v11 = vsub.f32 %v4379_v9, %v1941_v48 }
 0x4eb   : > { %v1947_v30 = vsub.f32 %v1945_v0, %v1946_v62 }
 0x4ed   : > { %v1949_v4 = vadd.f32 1e-05, %v1947_v30 }
 0x4ef   : > { %3388 = vrsqrt.f32 %v1949_v4 }
 0x4f9   : > { %v3389_v14 = vpop.eup %3388 }
 0x4fa   : > { %v1951_v5 = vmul.f32 %v3389_v14, %v1948_v11 }
 0x4fc   : > { %v1958_v17 = vmul.f32 %v2882_v55, %v1951_v5 }
 0x4fe   : > { %v1965_v18 = vadd.f32 %v2883_v15, %v1958_v17 }
 0x500   : > { %v1966_v22 = vpack.c.bf16 %v1965_v18, %v1965_v18 }
 0x502   : > { %2214 = vmatmul.mubr.bf16.vlgmr.msra.gmra.mrb[28].mxu0 %v1966_v22  ;;  %2255 = vmatmul.mubr.bf16.vlgmr.msra.gmra.mrb[12].mxu1 %v1966_v22 }
 0x503   : > { %3013 = vmatpush3.bf16.msra.mxu0 %v3320_v25  ;;  %3035 = vmatpush3.bf16.msra.mxu1 %v3321_v16 }
 0x504   : > { %3014 = vmatprep.subr.bf16.mxu0 %v3322_v33  ;;  %3036 = vmatprep.subr.bf16.mxu1 %v3323_v6 }
 0x507   : > { %3015 = vmatpush3.bf16.msra.mxu0 %v3324_v28  ;;  %3037 = vmatpush3.bf16.msra.mxu1 %v3325_v36 }
 0x508   : > { %3016 = vmatprep.subr.bf16.mxu0 %v3326_v38  ;;  %3038 = vmatprep.subr.bf16.mxu1 %v3327_v42 }
 0x50b   : > { %3017 = vmatpush3.bf16.msra.mxu0 %v3328_v45  ;;  %3039 = vmatpush3.bf16.msra.mxu1 %v3329_v21 }
 0x50c   : > { %3018 = vmatprep.subr.bf16.mxu0 %v3330_v47  ;;  %3040 = vmatprep.subr.bf16.mxu1 %v3331_v3 }
 0x50f   : > { %3019 = vmatpush3.bf16.msra.mxu0 %v3332_v49  ;;  %3041 = vmatpush3.bf16.msra.mxu1 %v3333_v31 }
 0x510   : > { %3020 = vmatprep.subr.bf16.mxu0 %v3334_v37  ;;  %3042 = vmatprep.subr.bf16.mxu1 %v3335_v50 }
 0x513   : > { %3021 = vmatpush3.bf16.msra.mxu0 %v3336_v52  ;;  %3043 = vmatpush3.bf16.msra.mxu1 %v3337_v27 }
 0x514   : > { %3022 = vmatprep.subr.bf16.mxu0 %v3338_v29  ;;  %3044 = vmatprep.subr.bf16.mxu1 %v3339_v19 }
 0x517   : > { %3023 = vmatpush3.bf16.msra.mxu0 %v3340_v35  ;;  %3045 = vmatpush3.bf16.msra.mxu1 %v3341_v56 }
 0x518   : > { %3024 = vmatprep.subr.bf16.mxu0 %v3342_v32  ;;  %3046 = vmatprep.subr.bf16.mxu1 %v3343_v40 }
 0x51b   : > { %3025 = vmatpush3.bf16.msra.mxu0 %v3344_v57  ;;  %3047 = vmatpush3.bf16.msra.mxu1 %v3345_v7 }
 0x51c   : > { %3026 = vmatprep.subr.bf16.mxu0 %v3346_v1  ;;  %3048 = vmatprep.subr.bf16.mxu1 %v3347_v59 }
 0x51f   : > { %3027 = vmatpush3.bf16.msra.mxu0 %v3348_v60  ;;  %3049 = vmatpush3.bf16.msra.mxu1 %v3349_v12  ;;  %v2916_v12 = vld [vmem:[%s4511_s23] ss:$0 sm:$0xff]  ;;  %s3513_s23 = scalar_lea.vmem %s4413_s22, 128 }
 0x520   : > { %p3514_p3 = scmp.ne.s32.totalorder %s4413_s22, %s3513_s23  ;;  %p3521_p1 = scmp.lt.s32.totalorder %s3519_s24, %s3513_s23 }
 0x522   : > { %p3515_p7 = pnand %p3514_p3, %p3837_p5  ;;  %p3522_p4 = por %p3521_p1, %p3520_p2 }
 0x524   : > { %p3516_p12 = pneg %p3515_p7 }
 0x526   : > { %p3523_p0 = pnand %p3522_p4, %p3516_p12 }
 0x5d5   : > { %v2215_v63 = vpop.f32.mrb[28].mxu0  ;;  %v2256_v51 = vpop.f32.mrb[12].mxu1 }
 0x5d6   : > { %v2216_v20 = vadd.f32 %v2215_v63, %v2004_v54  ;;  %v2257_v44 = vadd.f32 %v2256_v51, %v2012_v46  ;;  %v2217_v8 = vpop.f32.mrb[29].mxu0  ;;  %v2258_v10 = vpop.f32.mrb[13].mxu1  ;;  %v2949_v51 = vld [vmem:[%s4512_s21] ss:$0 sm:$0xff] }
 0x5d7   : > { %v2218_v26 = vadd.f32 %v2217_v8, %v2008_v39  ;;  %v2259_v48 = vadd.f32 %v2258_v10, %v2016_v2  ;;  %v2219_v23 = vpop.f32.mrb[30].mxu0  ;;  %v2260_v62 = vpop.f32.mrb[14].mxu1 }
 0x5d8   : > { %v2263_v0 = vmul.f32 %v2216_v20, %v2216_v20  ;;  %v2265_v30 = vmul.f32 %v2257_v44, %v2257_v44  ;;  %v2220_v4 = vpop.f32.mrb[31].mxu0  ;;  %v2261_v11 = vpop.f32.mrb[15].mxu1 }
 0x5d9   : > { %v2264_v61 = vmul.f32 %v2218_v26, %v2218_v26  ;;  %v2266_v14 = vmul.f32 %v2259_v48, %v2259_v48 }
 0x5da   : > { %v2267_v41 = vmul.f32 %v2263_v0, %v2216_v20  ;;  %v2269_v55 = vmul.f32 %v2265_v30, %v2257_v44 }
 0x5db   : > { %v2268_v5 = vmul.f32 %v2264_v61, %v2218_v26  ;;  %v2270_v15 = vmul.f32 %v2266_v14, %v2259_v48 }
 0x5dc   : > { %v2271_v17 = vmul.f32 0.044715, %v2267_v41  ;;  %v2273_v18 = vmul.f32 0.044715, %v2269_v55 }
 0x5dd   : > { %v2272_v22 = vmul.f32 0.044715, %v2268_v5  ;;  %v2274_v53 = vmul.f32 0.044715, %v2270_v15 }
 0x5de   : > { %v2275_v34 = vadd.f32 %v2271_v17, %v2216_v20  ;;  %v2277_v25 = vadd.f32 %v2273_v18, %v2257_v44 }
 0x5df   : > { %v2276_v16 = vadd.f32 %v2272_v22, %v2218_v26  ;;  %v2278_v33 = vadd.f32 %v2274_v53, %v2259_v48 }
 0x5e0   : > { %v2279_v6 = vmul.f32 0.7978846, %v2275_v34  ;;  %v2281_v28 = vmul.f32 0.7978846, %v2277_v25 }
 0x5e1   : > { %v2280_v36 = vmul.f32 0.7978846, %v2276_v16  ;;  %v2282_v38 = vmul.f32 0.7978846, %v2278_v33 }
 0x5e2   : > { %3390 = vtanh.f32 %v2279_v6 }
 0x5e3   : > { %3392 = vtanh.f32 %v2281_v28 }
 0x5e4   : > { %3394 = vtanh.f32 %v2280_v36 }
 0x5e5   : > { %3396 = vtanh.f32 %v2282_v38 }
 0x5ec   : > { %v3391_v42 = vpop.eup %3390 }
 0x5ed   : > { %v3393_v45 = vpop.eup %3392  ;;  %v2287_v21 = vadd.f32 1.0, %v3391_v42 }
 0x5ee   : > { %v3395_v47 = vpop.eup %3394  ;;  %v2289_v3 = vadd.f32 1.0, %v3393_v45 }
 0x5ef   : > { %v3397_v49 = vpop.eup %3396  ;;  %v2288_v31 = vadd.f32 1.0, %v3395_v47  ;;  %v2291_v37 = vmul.f32 0.5, %v2287_v21 }
 0x5f0   : > { %v2290_v50 = vadd.f32 1.0, %v3397_v49  ;;  %v2293_v52 = vmul.f32 0.5, %v2289_v3 }
 0x5f1   : > { %v2292_v27 = vmul.f32 0.5, %v2288_v31  ;;  %v2295_v19 = vmul.f32 %v2291_v37, %v2216_v20 }
 0x5f2   : > { %v2294_v29 = vmul.f32 0.5, %v2290_v50  ;;  %v2297_v56 = vmul.f32 %v2293_v52, %v2257_v44 }
 0x5f3   : > { %v2296_v35 = vmul.f32 %v2292_v27, %v2218_v26  ;;  %v2299_v7 = vpack.c.bf16 %v2295_v19, %v2295_v19 }
 0x5f4   : > { %v2298_v32 = vmul.f32 %v2294_v29, %v2259_v48  ;;  %v2301_v1 = vpack.c.bf16 %v2297_v56, %v2297_v56 }
 0x5f5   : > { %v2300_v40 = vpack.c.bf16 %v2296_v35, %v2296_v35 }
 0x5f6   : > { %v2302_v57 = vpack.c.bf16 %v2298_v32, %v2298_v32 }
 0x5f7   : > { %2598 = vmatprep.mubr.bf16.mxu0 %v2300_v40 }
 0x5f8   : > { %2638 = vmatprep.mubr.bf16.mxu1 %v2302_v57  ;;  %2599 = vmatmul.mubr.bf16.vlgmr.msra.gmra.mrb[32].mxu0 %v2299_v7 }
 0x5f9   : > { %2639 = vmatmul.mubr.bf16.vlgmr.msra.gmra.mrb[16].mxu1 %v2301_v1 }
 0x6cb   : > { %v3028_v59 = vpop.f32.mrb[32].mxu0 }
 0x6cc   : > { %v3050_v60 = vpop.f32.mrb[16].mxu1  ;;  %v3029_v13 = vpop.f32.mrb[33].mxu0 }
 0x6cd   : > { %v3030_v24 = vadd.f32 %v3029_v13, %v3028_v59  ;;  %v3051_v58 = vpop.f32.mrb[17].mxu1  ;;  %v3031_v43 = vpop.f32.mrb[34].mxu0 }
 0x6ce   : > { %v3052_v54 = vadd.f32 %v3051_v58, %v3050_v60  ;;  %v3053_v46 = vpop.f32.mrb[18].mxu1  ;;  %v3032_v39 = vpop.f32.mrb[35].mxu0 }
 0x6cf   : > { %v2601_v2 = vadd.f32 %v3030_v24, %v2916_v12  ;;  %v3054_v63 = vpop.f32.mrb[19].mxu1 }
 0x6d1   : > { %v2641_v20 = vadd.f32 %v3052_v54, %v2601_v2 }
 0x6d3   : > { %v2653_v44 = vmul.f32 %v2949_v51, %v2641_v20 }
 0x6d5   : > { %v2654_v8 = vadd.f32 %v2653_v44, %v4379_v9 }
 0x6d7   : > { %2655 = vst [vmem:[%s623_s0] sm:$0xff] %v2654_v8 }
 0x6d8   : > { %3526 = shalt.err (!%p3523_p0)
}
 0x6d9   : > { %s3527_s14 = scalar_lea.hbm %s4411_s20, 128  ;;  %s3531_s18 = scalar_lea.hbm %s4513_s9, 256 }
 0x6da   : > { %p3528_p9 = scmp.ne.s32.totalorder %s4411_s20, %s3527_s14  ;;  %p3532_p13 = scmp.lt.u32.totalorder %s4411_s20, %s4513_s9 }
 0x6db   : > { %p3533_p6 = scmp.lt.u32.totalorder %s3531_s18, %s3527_s14  ;;  %p3535_p3 = scmp.lt.u32.totalorder %s3527_s14, %s4411_s20 }
 0x6dc   : > { %p3529_p11 = pnand %p3528_p9, %p3837_p5 }
 0x6dd   : > { %p3534_p10 = por %p3533_p6, %p3532_p13 }
 0x6de   : > { %p3530_p8 = pneg %p3529_p11 }
 0x6df   : > { %p3536_p7 = por %p3535_p3, %p3534_p10 }
 0x6e1   : > { %p3537_p12 = pnand %p3536_p7, %p3530_p8 }
 0x6e3   : > { %3540 = shalt.err (!%p3537_p12)
}
 0x6e4   : > { %3154 = dma.vmem_to_hbm [thread:$0]  (%p3837_p5), %s4413_s22, 128, %s4411_s20, %s2657_s10  }
 0x6e5 PF: > { %s4514_s17 = sld [smem:[#allocation15_spill]]  ;;  %s4515_s23 = sld [smem:[#allocation16_spill]] }
 0x6e6   : > { %p4517_p1 = scmp.ge.s32.totalorder %s3587_s27, 2 }
 0x6eb   : > { %s2682_s28 = sand.u32 1, %s4514_s17   ;;  %p4516_p2 = scmp.ne.s32.totalorder %s4515_s23, 0 }
 0x6ec   : > { %s2683_s16 = scalar_lea.sflag [#allocation4], %s2682_s28 }
 0x6ed   : > { %p3171_p4 = pnand %p4517_p1, %p4516_p2 }
 0x6ef   : > { %3570 = dma.done.wait (!%p3171_p4), %s2683_s16, 128  }
 0x6f0   : > { %3572 = vsyncadd (!%p3171_p4), %s2683_s16, 4294967168  ;;  %p32_p0 = scmp.ge.s32.totalorder %s3823_s12, 4   ;;  %s4518_s24 = smov %s3579_s25 }
 0x6f1   : > { %s4519_s25 = smov %s3583_s26  ;;  %s4520_s26 = smov %s3833_s30 }
 0x6f2   : > { %s4521_s27 = smov %s3823_s12  ;;  %34 = sbr.rel (!%p32_p0) target bundleno = 17 (0x11), region = 148 }
 0x6f9   :  { %2688 = vsyncpa [#allocation3], 1 }
 0x6fa   :  { %2690 = vsyncpa [#allocation3 + $0x1], 1 }
 0x6fb   :  { %2691 = vsyncpa [#allocation6], 1 }
 0x6fc   :  { %2692 = vsyncpa [#allocation9], 1 }
 0x6fd   :  { %2693 = vsyncpa [#allocation4], 1 }
 0x6fe   :  { %2695 = vsyncpa [#allocation4 + $0x1], 1 }

// kernel: tpu_custom_call.1
= control target key start
LH: loop header
LB: loop body
LE: loop exit
PB: predicated region body
PF: predicated region fallthrough
CT: control target
= control target key end

     0   :  { %s4455_s0 = inlined_call_operand.vmem [shape: bf16[128,128], index: 0, kind: input, shape index: {}]   ;;  %s4456_s1 = inlined_call_operand.hbm [shape: f32[16,128], index: 1, kind: input, shape index: {}]   ;;  %s4457_s2 = inlined_call_operand.vmem [shape: f32[1,128], index: 2, kind: input, shape index: {}]   ;;  %s4458_s3 = inlined_call_operand.vmem [shape: f32[1,128], index: 3, kind: input, shape index: {}]   ;;  %s4459_s4 = inlined_call_operand.hbm [shape: bf16[128,384], index: 4, kind: input, shape index: {}]   ;;  %s4460_s5 = inlined_call_operand.vmem [shape: f32[128,1], index: 5, kind: input, shape index: {}]   ;;  %s4461_s6 = inlined_call_operand.vmem [shape: f32[1,128], index: 6, kind: input, shape index: {}]   ;;  %s4462_s7 = inlined_call_operand.vmem [shape: bf16[128,128], index: 7, kind: input, shape index: {}]   ;;  %s4463_s8 = inlined_call_operand.vmem [shape: f32[1,128], index: 8, kind: input, shape index: {}]   ;;  %s4464_s9 = inlined_call_operand.vmem [shape: f32[1,128], index: 9, kind: input, shape index: {}]   ;;  %s4465_s10 = inlined_call_operand.vmem [shape: f32[1,128], index: 10, kind: input, shape index: {}]   ;;  %s4466_s11 = inlined_call_operand.hbm [shape: bf16[128,512], index: 11, kind: input, shape index: {}]   ;;  %s4467_s12 = inlined_call_operand.vmem [shape: f32[1,512], index: 12, kind: input, shape index: {}]   ;;  %s4468_s13 = inlined_call_operand.hbm [shape: bf16[512,128], index: 13, kind: input, shape index: {}]   ;;  %s4469_s14 = inlined_call_operand.vmem [shape: f32[1,128], index: 14, kind: input, shape index: {}]   ;;  %s4470_s15 = inlined_call_operand.vmem [shape: f32[1,128], index: 15, kind: input, shape index: {}]   ;;  %s4471_s16 = inlined_call_operand.vmem [shape: f32[1,128], index: 16, kind: input, shape index: {}]   ;;  %s4472_s17 = inlined_call_operand.hbm [shape: f32[16,128], index: 17, kind: output, shape index: {}]  }
   0x1   :  { %4480 = sst [smem:[#allocation17_spill]] %s4455_s0 }
   0x2   :  { %4481 = sst [smem:[#allocation18_spill]] %s4456_s1 }
   0x3   :  { %4482 = sst [smem:[#allocation19_spill]] %s4459_s4 }
   0x4   :  { %4483 = sst [smem:[#allocation20_spill]] %s4464_s9 }
   0x5   :  { %4484 = sst [smem:[#allocation21_spill]] %s4465_s10 }
   0x6   :  { %4485 = sst [smem:[#allocation22_spill]] %s4467_s12 }
   0x7   :  { %4486 = sst [smem:[#allocation23_spill]] %s4469_s14 }
   0x8   :  { %4487 = sst [smem:[#allocation24_spill]] %s4471_s16 }
   0x9   :  { %4488 = sst [smem:[#allocation25_spill]] %s4472_s17 }
   0xa   :  { %22 = vsyncpa [#allocation3], 0 }
   0xb   :  { %24 = vsyncpa [#allocation3 + $0x1], 0 }
   0xc   :  { %25 = vsyncpa [#allocation6], 0 }
   0xd   :  { %26 = vsyncpa [#allocation9], 0 }
   0xe   :  { %27 = vsyncpa [#allocation4], 0 }
   0xf   :  { %29 = vsyncpa [#allocation4 + $0x1], 0  ;;  %s3695_s24 = smov 0   ;;  %s3697_s25 = smov 0  }
  0x10   :  { %s3699_s26 = smov 0   ;;  %s3701_s27 = smov 0  }
  0x11 LB: > { %4489 = sst [smem:[#allocation15_spill]] %s3575_s24  ;;  %s3716_s28 = sadd.s32 4294967295, %s3587_s27   ;;  %s3587_s27 = sphi %s3701_s27, %s4521_s27   ;;  %s3583_s26 = sphi %s3699_s26, %s4520_s26   ;;  %s3579_s25 = sphi %s3697_s25, %s4519_s25   ;;  %s3575_s24 = sphi %s3695_s24, %s4518_s24  }
  0x12   : > { %s2781_s29 = sadd.s32 4294967294, %s3587_s27   ;;  %p81_p0 = scmp.ne.s32.totalorder %s3579_s25, %s3575_s24 }
  0x13   : > { %p4477_p1 = scmp.eq.s32.totalorder %s3716_s28, 0  ;;  %p426_p3 = scmp.eq.s32.totalorder %s2781_s29, 1 }
  0x14   : > { %p2782_p5 = scmp.ge.s32.totalorder %s3587_s27, 1  ;;  %p433_p7 = scmp.lt.s32.totalorder %s3587_s27, 3 }
  0x15   : > { %p3725_p4 = por %p4477_p1, %p81_p0  ;;  %p3730_p6 = por %p426_p3, %p81_p0 }
  0x16   : > { %p3735_p8 = pnand %p2782_p5, %p433_p7  ;;  %s3589_s19 = smov [#allocation5]  }
  0x17   : > { %s4490_s0 = scalar_select %p3725_p4, 1, 0 }
  0x18   : > { %s4491_s30 = scalar_select %p3730_p6, 1, 0 }
  0x19   : > { %s4493_s18 = scalar_select %p3735_p8, 1, 0 }
  0x1a   : > { %4492 = sst [smem:[#allocation16_spill]] %s4491_s30  ;;  %s451_s1 = sshll.u32 %s3589_s19, 4  ;;  %s3739_s1 = int_to_ptr.vmem [resolvable:$true] %s451_s1 }
  0x1b   : > { %p3156_p9 = pneg %p3735_p8  ;;  %s3590_s21 = smov [#allocation7]  }
  0x1c   : > { %s482_s22 = sshll.u32 %s3590_s21, 4  ;;  %s4495_s4 = sld [smem:[#allocation19_spill]]  ;;  %s3750_s22 = int_to_ptr.vmem [resolvable:$true] %s482_s22 }
  0x1d   : > { %p3746_p11 = pnand %p3156_p9, %p4477_p1 }
  0x1f   : > { %p3760_p13 = pneg %p3746_p11 }
  0x22   : > { %s3399_s30 = scalar_lea.hbm %s4495_s4, 3072 }
  0x23   : > { %p3400_p12 = scmp.ne.s32.totalorder %s4495_s4, %s3399_s30  ;;  %p3406_p5 = scmp.lt.u32.totalorder %s3399_s30, %s4495_s4 }
  0x25   : > { %p3402_p0 = pnand %p3760_p13, %p3400_p12 }
  0x27   : > { %p3403_p3 = pneg %p3402_p0 }
  0x29   : > { %p3408_p7 = pnand %p3406_p5, %p3403_p3 }
  0x2b   : > { %3411 = shalt.err (!%p3408_p7)
}
  0x2c   : > { %s3412_s24 = scalar_lea.vmem %s3739_s1, 3072  ;;  %p3420_p2 = scmp.lt.s32.totalorder %s3739_s1, %s3739_s1 }
  0x2d   : > { %p3413_p9 = scmp.ne.s32.totalorder %s3739_s1, %s3412_s24  ;;  %p3421_p6 = scmp.lt.s32.totalorder %s3412_s24, %s3412_s24 }
  0x2f   : > { %p3415_p10 = pnand %p3413_p9, %p3760_p13  ;;  %p3422_p12 = por %p3421_p6, %p3420_p2 }
  0x31   : > { %p3416_p1 = pneg %p3415_p10 }
  0x33   : > { %p3423_p0 = pnand %p3422_p12, %p3416_p1 }
  0x35   : > { %3426 = shalt.err (!%p3423_p0)
}
  0x36   : > { %s3591_s23 = smov 192   ;;  %s3592_s16 = smov 12  }
  0x37   : > { %3159 = dma.hbm_to_vmem [thread:$0]  (!%p3746_p11), %s4495_s4, 3072, %s3739_s1, [#allocation6], %s3591_s23, %s3591_s23, %s3592_s16  }
  0x38   : > { %s3427_s14 = scalar_lea.hbm %s4466_s11, 4096 }
  0x39   : > { %p3428_p2 = scmp.ne.s32.totalorder %s4466_s11, %s3427_s14  ;;  %p3434_p10 = scmp.lt.u32.totalorder %s3427_s14, %s4466_s11 }
  0x3b   : > { %p3430_p1 = pnand %p3428_p2, %p3760_p13 }
  0x3d   : > { %p3431_p6 = pneg %p3430_p1 }
  0x3f   : > { %p3436_p3 = pnand %p3434_p10, %p3431_p6 }
  0x41   : > { %3439 = shalt.err (!%p3436_p3)
}
  0x42   : > { %s3440_s1 = scalar_lea.vmem %s3750_s22, 4096  ;;  %p3448_p12 = scmp.lt.s32.totalorder %s3750_s22, %s3750_s22 }
  0x43   : > { %p3441_p5 = scmp.ne.s32.totalorder %s3750_s22, %s3440_s1  ;;  %p3449_p0 = scmp.lt.s32.totalorder %s3440_s1, %s3440_s1 }
  0x45   : > { %p3443_p7 = pnand %p3441_p5, %p3760_p13  ;;  %p3450_p2 = por %p3449_p0, %p3448_p12 }
  0x47   : > { %p3444_p9 = pneg %p3443_p7 }
  0x49   : > { %p3451_p1 = pnand %p3450_p2, %p3444_p9 }
  0x4b   : > { %3454 = shalt.err (!%p3451_p1)
}
  0x4c   : > { %s3593_s10 = smov 256   ;;  %s3594_s9 = smov 16  }
  0x4d   : > { %3162 = dma.hbm_to_vmem [thread:$0]  (!%p3746_p11), %s4466_s11, 4096, %s3750_s22, [#allocation6], %s3593_s10, %s3593_s10, %s3594_s9  }
  0x4e   : > { %s3595_s23 = smov [#allocation8]   ;;  %s3455_s19 = scalar_lea.hbm %s4468_s13, 4096 }
  0x4f   : > { %s498_s16 = sshll.u32 %s3595_s23, 4  ;;  %p3456_p6 = scmp.ne.s32.totalorder %s4468_s13, %s3455_s19  ;;  %s499_s16 = int_to_ptr.vmem [resolvable:$true] %s498_s16 }
  0x50   : > { %p3462_p5 = scmp.lt.u32.totalorder %s3455_s19, %s4468_s13 }
  0x51   : > { %p3458_p10 = pnand %p3456_p6, %p3760_p13 }
  0x53   : > { %p3459_p3 = pneg %p3458_p10 }
  0x55   : > { %p3464_p7 = pnand %p3462_p5, %p3459_p3 }
  0x57   : > { %3467 = shalt.err (!%p3464_p7)
}
  0x58   : > { %s3468_s22 = scalar_lea.vmem %s499_s16, 4096  ;;  %p3476_p2 = scmp.lt.s32.totalorder %s499_s16, %s499_s16 }
  0x59   : > { %p3469_p9 = scmp.ne.s32.totalorder %s499_s16, %s3468_s22  ;;  %p3477_p1 = scmp.lt.s32.totalorder %s3468_s22, %s3468_s22 }
  0x5b   : > { %p3471_p12 = pnand %p3469_p9, %p3760_p13  ;;  %p3478_p4 = por %p3477_p1, %p3476_p2 }
  0x5d   : > { %p3472_p0 = pneg %p3471_p12 }
  0x5f   : > { %p3479_p8 = pnand %p3478_p4, %p3472_p0 }
  0x61   : > { %3482 = shalt.err (!%p3479_p8)
}
  0x62   : > { %s3596_s10 = smov 64   ;;  %s3597_s4 = smov 4  }
  0x63   : > { %3165 = dma.hbm_to_vmem [thread:$0]  (!%p3746_p11), %s4468_s13, 4096, %s499_s16, [#allocation9], %s3596_s10, %s3596_s10, %s3597_s4  }
  0x64   : > { %s3823_s12 = sadd.s32 1, %s3587_s27   ;;  %s68_s23 = sadd.s32 1, %s3583_s26 }
  0x65   : > { %s65_s14 = ssub.s32 %s3587_s27, %s3823_s12  ;;  %p75_p8 = scmp.ne.s32.totalorder %s3583_s26, %s3579_s25 }
  0x66   : > { %p66_p4 = scmp.eq.s32.totalorder %s65_s14, 0  ;;  %p76_p13 = scmp.eq.s32.totalorder %s3587_s27, 0 }
  0x67   : > { %p3177_p6 = scmp.lt.s32.totalorder %s3587_s27, 2  ;;  %p4497_p3 = scmp.eq.s32.totalorder %s3716_s28, 1 }
  0x68   : > { %s3833_s30 = scalar_select %p66_p4, %s3583_s26, %s68_s23  }
  0x69   : > { %p77_p10 = por %p76_p13, %p75_p8  ;;  %p3837_p5 = por %p4497_p3, %p75_p8 }
  0x6a   : > { %s530_s20 = sand.u32 1, %s3583_s26   ;;  %s2788_s19 = sshll.u32 %s3587_s27, 7 }
  0x6b   : > { %s2787_s16 = sshll.u32 %s530_s20, 3  ;;  %s4499_s1 = sld [smem:[#allocation18_spill]] }
  0x6c   : > { %s534_s10 = scalar_lea.vmem [#allocation2], %s2787_s16  ;;  %p3848_p11 = pnand %p3177_p6, %p77_p10 }
  0x6d   : > { %s541_s4 = sshll.u32 %s534_s10, 4  ;;  %s531_s9 = scalar_lea.sflag [#allocation3], %s530_s20  ;;  %s3852_s4 = int_to_ptr.vmem [resolvable:$true] %s541_s4 }
  0x6e   : > { %p3485_p9 = pneg %p3848_p11 }
  0x71   : > { %s3846_s22 = scalar_lea.hbm %s4499_s1, %s2788_s19  ;;  %s3488_s16 = scalar_lea.hbm %s4499_s1, 256 }
  0x72   : > { %s3483_s14 = scalar_lea.hbm %s3846_s22, 128  ;;  %p3489_p2 = scmp.lt.u32.totalorder %s3846_s22, %s4499_s1 }
  0x73   : > { %p3484_p7 = scmp.ne.s32.totalorder %s3846_s22, %s3483_s14  ;;  %p3490_p1 = scmp.lt.u32.totalorder %s3488_s16, %s3483_s14 }
  0x74   : > { %p3492_p8 = scmp.lt.u32.totalorder %s3483_s14, %s3846_s22 }
  0x75   : > { %p3486_p12 = pnand %p3485_p9, %p3484_p7  ;;  %p3491_p4 = por %p3490_p1, %p3489_p2 }
  0x77   : > { %p3487_p0 = pneg %p3486_p12  ;;  %p3493_p13 = por %p3492_p8, %p3491_p4 }
  0x79   : > { %p3494_p6 = pnand %p3493_p13, %p3487_p0 }
  0x7b   : > { %3497 = shalt.err (!%p3494_p6)
}
  0x7c   : > { %s3498_s20 = scalar_lea.vmem %s3852_s4, 128  ;;  %s3598_s10 = smov [#allocation2]  }
  0x7d   : > { %p3499_p10 = scmp.ne.s32.totalorder %s3852_s4, %s3498_s20  ;;  %s3503_s23 = sshll.u32 %s3598_s10, 4  ;;  %s3504_s23 = int_to_ptr.vmem [resolvable:$false] %s3503_s23 }
  0x7e   : > { %s3505_s19 = scalar_lea.vmem %s3504_s23, 256  ;;  %p3506_p12 = scmp.lt.s32.totalorder %s3852_s4, %s3504_s23 }
  0x7f   : > { %p3501_p3 = pnand %p3499_p10, %p3485_p9  ;;  %p3507_p2 = scmp.lt.s32.totalorder %s3505_s19, %s3498_s20 }
  0x81   : > { %p3502_p7 = pneg %p3501_p3  ;;  %p3508_p1 = por %p3507_p2, %p3506_p12 }
  0x83   : > { %p3509_p4 = pnand %p3508_p1, %p3502_p7 }
  0x85   : > { %3512 = shalt.err (!%p3509_p4)
}
  0x86   : > { %3169 = dma.hbm_to_vmem [thread:$0]  (!%p3848_p11), %s3846_s22, 128, %s3852_s4, %s531_s9  }
  0x87   : > { %p4501_p0 = scmp.ne.s32.totalorder %s4493_s18, 0 }
  0x88   : > { %s3882_s14 = sand.u32 (!%p4501_p0), 1, %s3579_s25   ;;  %p4502_p9 = scmp.ne.s32.totalorder (!%p4501_p0), %s4490_s0, 0 }
  0x89   : > { %550 = sbr.rel (%p4501_p0) target bundleno = 1765 (0x6e5), region = 88  ;;  %s2790_s16 = sshll.u32 (!%p4501_p0), %s3882_s14, 3 }
  0x8a   : > { %s553_s21 = scalar_lea.sflag (!%p4501_p0), [#allocation3], %s3882_s14  ;;  %s3888_s24 = scalar_lea.vmem (!%p4501_p0), [#allocation2], %s2790_s16 }
  0x90   : > { %3558 = dma.done.wait (%p4502_p9), %s553_s21, 128  }
  0x91   : > { %3560 = vsyncadd (%p4502_p9), %s553_s21, 4294967168  ;;  %p4503_p11 = scmp.eq.s32.totalorder %s3716_s28, 0 }
  0x93   : > { %3562 = dma.done.wait (%p4503_p11), [#allocation6], 7168   ;;  %p4504_p8 = pmov %p4503_p11 }
  0x95   : > { %3564 = vsyncadd (%p4504_p8), [#allocation6], 4294960128  ;;  %p4505_p13 = pmov %p4504_p8 }
  0x96   : > { %p4506_p6 = pmov %p4504_p8 }
  0x97   : > { %3566 = dma.done.wait (%p4505_p13), [#allocation9], 4096  }
  0x98   : > { %3568 = vsyncadd (%p4506_p6), [#allocation9], 4294963200  ;;  %s2795_s18 = sshll.u32 %s3716_s28, 3  ;;  %v3599_v0 = vmov 0.0   ;;  %s4507_s17 = sld [smem:[#allocation17_spill]]  ;;  %v3910_v1 = vld [vmem:[%s3888_s24] sm:$0xff] }
  0x99   : > { %p625_p10 = scmp.lt.s32.totalorder %s2795_s18, 15  ;;  %3056 = vmatprep.subr.bf16.mxu1 %v3599_v0  ;;  %787 = vadd.xlane.f32.xlu0 %v3910_v1  ;;  %v790_v3 = vmul.f32 %v3910_v1, %v3910_v1  ;;  %v3918_v5 = vld [vmem:[#allocation5 + $0x4] ss:$12 sps:$4 sm:$0xff]   ;;  %v3232_v6 = vld [vmem:[#allocation5] ss:$12 sps:$4 sm:$0xff]   ;;  %v3600_v47 = vmov 0  }
  0x9a   : > { %v3923_v8 = vld [vmem:[#allocation5 + $0x8] ss:$12 sps:$4 sm:$0xff]   ;;  %963 = vmatprep.subr.bf16.mxu0 %v3918_v5  ;;  %v3236_v17 = vld [vmem:[#allocation5 + $0x18] ss:$12 sps:$4 sm:$0xff]   ;;  %v3948_v19 = vld [vmem:[#allocation5 + $0x20] ss:$12 sps:$4 sm:$0xff]   ;;  %995 = vmatprep.mubr.bf16.mxu0 %v3600_v47 }
  0x9b   : > { %s4523_s18 = smov (!%p625_p10, %s2795_s18), 15  ;;  %964 = vmatpush1.bf16.msra.mxu0 %v3232_v6  ;;  %3057 = vmatpush3.bf16.msra.mxu1 %v3923_v8  ;;  %v3942_v16 = vld [vmem:[#allocation5 + $0x1c] ss:$12 sps:$4 sm:$0xff]   ;;  %v3953_v21 = vld [vmem:[#allocation5 + $0x34] ss:$12 sps:$4 sm:$0xff]   ;;  %vm3601_vm0 = vmmov 0  }
  0x9c   : > { %s2796_s0 = sshll.u32 %s4523_s18, 2  ;;  %3058 = vmatprep.subr.bf16.mxu1 %v3599_v0  ;;  %965 = vmatprep.subr.bf16.mxu0 %v3942_v16  ;;  %v3240_v22 = vld [vmem:[#allocation5 + $0x30] ss:$12 sps:$4 sm:$0xff]   ;;  %v3959_v24 = vld [vmem:[#allocation5 + $0x38] ss:$12 sps:$4 sm:$0xff]   ;;  %v1121_v50 = vld [vmem:[%s4460_s5 + $0x18] sm:$0xff] }
  0x9d   : > { %791 = vadd.xlane.f32.xlu0 %v790_v3  ;;  %v3966_v27 = vld [vmem:[#allocation5 + $0x4c] ss:$12 sps:$4 sm:$0xff]   ;;  %v3244_v28 = vld [vmem:[#allocation5 + $0x48] ss:$12 sps:$4 sm:$0xff]   ;;  %v3973_v30 = vld [vmem:[#allocation5 + $0x50] ss:$12 sps:$4 sm:$0xff]   ;;  %3072 = vmatprep.mubr.msk.bf16.mxu1 %vm3601_vm0, %v3599_v0 }
  0x9e   : > { %s3907_s9 = scalar_lea.vmem %s4507_s17, %s2796_s0  ;;  %v3978_v32 = vld [vmem:[#allocation5 + $0x64] ss:$12 sps:$4 sm:$0xff]   ;;  %v3248_v33 = vld [vmem:[#allocation5 + $0x60] ss:$12 sps:$4 sm:$0xff]   ;;  %v3984_v35 = vld [vmem:[#allocation5 + $0x68] ss:$12 sps:$4 sm:$0xff]   ;;  %3229 = vset.pattern.permute.xlu1 %v3600_v47  ;;  %3228 = vset.pattern.permute.xlu0 %v3600_v47 }
  0x9f   : > { %v2955_v2 = vld [vmem:[%s3907_s9] sm:$0xff]   ;;  %v2970_v9 = vld [vmem:[%s3907_s9 + $0x8] sm:$0xff]   ;;  %v2971_v14 = vld [vmem:[%s3907_s9 + $0x10] sm:$0xff]   ;;  %966 = vmatpush1.bf16.msra.mxu0 %v3236_v17  ;;  %3059 = vmatpush3.bf16.msra.mxu1 %v3948_v19  ;;  %s4508_s21 = sld [smem:[#allocation20_spill]]  ;;  %s4509_s22 = sld [smem:[#allocation21_spill]] }
  0xa0   : > { %v3916_v4 = vunpack.c.l.bf16 %v2955_v2  ;;  %v3921_v7 = vunpack.c.h.bf16 %v2955_v2  ;;  %v3934_v12 = vunpack.c.l.bf16 %v2970_v9  ;;  %v3936_v13 = vunpack.c.h.bf16 %v2970_v9  ;;  %3060 = vmatprep.subr.bf16.mxu1 %v3599_v0  ;;  %967 = vmatprep.subr.bf16.mxu0 %v3953_v21  ;;  %v2972_v25 = vld [vmem:[%s3907_s9 + $0x18] sm:$0xff]   ;;  %v3252_v38 = vld [vmem:[#allocation5 + $0x78] ss:$12 sps:$4 sm:$0xff]   ;;  %v3999_v41 = vld [vmem:[#allocation5 + $0x94] ss:$12 sps:$4 sm:$0xff]   ;;  %s4510_s9 = sld [smem:[#allocation22_spill]] }
  0xa1   : > { %v3950_v20 = vunpack.c.l.bf16 %v2971_v14  ;;  %v3956_v23 = vunpack.c.h.bf16 %v2971_v14  ;;  %v3975_v31 = vunpack.c.l.bf16 %v2972_v25  ;;  %v3981_v34 = vunpack.c.h.bf16 %v2972_v25  ;;  %v3990_v37 = vld [vmem:[#allocation5 + $0x7c] ss:$12 sps:$4 sm:$0xff]   ;;  %v3997_v40 = vld [vmem:[#allocation5 + $0x80] ss:$12 sps:$4 sm:$0xff]   ;;  %v4001_v43 = vld [vmem:[#allocation5 + $0x98] ss:$12 sps:$4 sm:$0xff]  }
  0xa2   : > { %650 = vadd.xlane.f32.xlu1 %v3916_v4  ;;  %v675_v10 = vmul.f32 %v3916_v4, %v3916_v4  ;;  %v676_v11 = vmul.f32 %v3921_v7, %v3921_v7  ;;  %v677_v15 = vmul.f32 %v3934_v12, %v3934_v12  ;;  %v678_v18 = vmul.f32 %v3936_v13, %v3936_v13  ;;  %v3256_v42 = vld [vmem:[#allocation5 + $0x90] ss:$12 sps:$4 sm:$0xff]   ;;  %v4003_v44 = vld [vmem:[#allocation5 + $0xac] ss:$12 sps:$4 sm:$0xff]   ;;  %v3260_v45 = vld [vmem:[#allocation5 + $0xa8] ss:$12 sps:$4 sm:$0xff]  }
  0xa3   : > { %968 = vmatpush1.bf16.msra.mxu0 %v3240_v22  ;;  %v679_v26 = vmul.f32 %v3950_v20, %v3950_v20  ;;  %3061 = vmatpush3.bf16.msra.mxu1 %v3959_v24  ;;  %v680_v29 = vmul.f32 %v3956_v23, %v3956_v23  ;;  %v681_v36 = vmul.f32 %v3975_v31, %v3975_v31  ;;  %v4011_v46 = vld [vmem:[#allocation5 + $0xb0] ss:$12 sps:$4 sm:$0xff]   ;;  %v1120_v49 = vld [vmem:[%s4460_s5 + $0x10] sm:$0xff]  ;;  %v1129_v56 = vld [vmem:[%s4460_s5 + $0x58] sm:$0xff]  ;;  %s4511_s23 = sld [smem:[#allocation23_spill]]  ;;  %s2951_s18 = sshll.u32 %s3716_s28, 7 }
  0xa4   : > { %683 = vadd.xlane.f32.xlu0 %v675_v10  ;;  %3062 = vmatprep.subr.bf16.mxu1 %v3599_v0  ;;  %v682_v39 = vmul.f32 %v3981_v34, %v3981_v34  ;;  %v1119_v48 = vld [vmem:[%s4460_s5 + $0x8] sm:$0xff]  ;;  %v1122_v51 = vld [vmem:[%s4460_s5 + $0x20] sm:$0xff]  ;;  %v1124_v55 = vld [vmem:[%s4460_s5 + $0x30] sm:$0xff]  ;;  %s623_s0 = scalar_lea.vmem [#allocation10], %s2790_s16  ;;  %s2657_s10 = scalar_lea.sflag [#allocation4], %s3882_s14 }
  0xa5   : > { %969 = vmatprep.subr.bf16.mxu0 %v3966_v27  ;;  %v1118_v52 = vld [vmem:[%s4460_s5] sm:$0xff]  ;;  %v1123_v53 = vld [vmem:[%s4460_s5 + $0x28] sm:$0xff]  ;;  %v1125_v57 = vld [vmem:[%s4460_s5 + $0x38] sm:$0xff]  ;;  %s3604_s28 = smov [#allocation10]  }
  0xa6   : > { %652 = vadd.xlane.f32.xlu1 %v3921_v7  ;;  %v1127_v54 = vld [vmem:[%s4460_s5 + $0x48] sm:$0xff]  ;;  %v1126_v59 = vld [vmem:[%s4460_s5 + $0x40] sm:$0xff]  ;;  %v1133_v60 = vld [vmem:[%s4460_s5 + $0x78] sm:$0xff]  ;;  %s3517_s16 = sshll.u32 %s3604_s28, 4  ;;  %s3518_s16 = int_to_ptr.vmem [resolvable:$false] %s3517_s16 }
  0xa7   : > { %970 = vmatpush1.bf16.msra.mxu0 %v3244_v28  ;;  %3063 = vmatpush3.bf16.msra.mxu1 %v3973_v30  ;;  %v1131_v58 = vld [vmem:[%s4460_s5 + $0x68] sm:$0xff]  ;;  %v1128_v61 = vld [vmem:[%s4460_s5 + $0x50] sm:$0xff]  ;;  %v1130_v62 = vld [vmem:[%s4460_s5 + $0x60] sm:$0xff] }
  0xa8   : > { %654 = vadd.xlane.f32.xlu0 %v3934_v12  ;;  %3064 = vmatprep.subr.bf16.mxu1 %v3599_v0  ;;  %v1132_v63 = vld [vmem:[%s4460_s5 + $0x70] sm:$0xff] }
  0xa9   : > { %971 = vmatprep.subr.bf16.mxu0 %v3978_v32 }
  0xaa   : > { %685 = vadd.xlane.f32.xlu1 %v676_v11 }
  0xab   : > { %972 = vmatpush1.bf16.msra.mxu0 %v3248_v33  ;;  %3065 = vmatpush3.bf16.msra.mxu1 %v3984_v35 }
  0xac   : > { %687 = vadd.xlane.f32.xlu0 %v677_v15  ;;  %3066 = vmatprep.subr.bf16.mxu1 %v3599_v0 }
  0xad   : > { %973 = vmatprep.subr.bf16.mxu0 %v3990_v37 }
  0xae   : > { %656 = vadd.xlane.f32.xlu1 %v3936_v13 }
  0xaf   : > { %974 = vmatpush1.bf16.msra.mxu0 %v3252_v38  ;;  %3067 = vmatpush3.bf16.msra.mxu1 %v3997_v40 }
  0xb0   : > { %658 = vadd.xlane.f32.xlu0 %v3950_v20  ;;  %975 = vmatprep.subr.bf16.mxu0 %v3999_v41 }
  0xb1   : > { %3068 = vmatprep.subr.bf16.mxu1 %v3599_v0 }
  0xb2   : > { %689 = vadd.xlane.f32.xlu1 %v678_v18 }
  0xb3   : > { %976 = vmatpush1.bf16.msra.mxu0 %v3256_v42  ;;  %3069 = vmatpush3.bf16.msra.mxu1 %v4001_v43 }
  0xb4   : > { %691 = vadd.xlane.f32.xlu0 %v679_v26  ;;  %977 = vmatprep.subr.bf16.mxu0 %v4003_v44 }
  0xb5   : > { %3070 = vmatprep.subr.bf16.mxu1 %v3599_v0 }
  0xb6   : > { %660 = vadd.xlane.f32.xlu1 %v3956_v23 }
  0xb7   : > { %978 = vmatpush1.bf16.msra.mxu0 %v3260_v45  ;;  %3071 = vmatpush3.bf16.msra.mxu1 %v4011_v46 }
  0xb8   : > { %662 = vadd.xlane.f32.xlu0 %v3975_v31  ;;  %1044 = vmatprep.subr.bf16.mxu0 %v3923_v8 }
  0xb9   : > { %3076 = vmatprep.subr.bf16.mxu1 %v3599_v0 }
  0xba   : > { %693 = vadd.xlane.f32.xlu1 %v680_v29 }
  0xbc   : > { %695 = vadd.xlane.f32.xlu0 %v681_v36 }
  0xbe   : > { %664 = vadd.xlane.f32.xlu1 %v3981_v34 }
  0xc2   : > { %697 = vadd.xlane.f32.xlu1 %v682_v39  ;;  %v4077_v39 = vld [vmem:[%s4457_s2] ss:$0 sm:$0xff] }
  0xd2   : > { %1137 = vperm.xlu0 %3228, %v1118_v52  }
  0xd3   : > { %1142 = vperm.xlu1 %3229, %v1119_v48  }
  0xd6   : > { %1182 = vperm.xlu0 %3228, %v1127_v54  }
  0xd7   : > { %1147 = vperm.xlu1 %3229, %v1120_v49  }
  0xda   : > { %1192 = vperm.xlu0 %3228, %v1129_v56  }
  0xdb   : > { %1152 = vperm.xlu1 %3229, %v1121_v50  }
  0xde   : > { %1202 = vperm.xlu0 %3228, %v1131_v58  }
  0xdf   : > { %1157 = vperm.xlu1 %3229, %v1122_v51  }
  0xe2   : > { %1212 = vperm.xlu0 %3228, %v1133_v60  }
  0xe3   : > { %1162 = vperm.xlu1 %3229, %v1123_v53  }
  0xe7   : > { %1167 = vperm.xlu1 %3229, %v1124_v55  }
  0xeb   : > { %1172 = vperm.xlu1 %3229, %v1125_v57  }
  0xef   : > { %1177 = vperm.xlu1 %3229, %v1126_v59  }
  0xf3   : > { %1187 = vperm.xlu1 %3229, %v1128_v61  }
  0xf7   : > { %1197 = vperm.xlu1 %3229, %v1130_v62  }
  0xfb   : > { %1207 = vperm.xlu1 %3229, %v1132_v63  }
 0x126   : > { %v788_v2 = vpop.xlane.xlu0 %787 }
 0x127   : > { %v789_v3 = vmul.f32 0.0078125, %v788_v2 }
 0x129   : > { %v794_v9 = vmul.f32 %v789_v3, %v789_v3  ;;  %v796_v33 = vsub.f32 %v3910_v1, %v789_v3  ;;  %v4086_v1 = vld [vmem:[%s4458_s3] ss:$0 sm:$0xff] }
 0x12a   : > { %v792_v8 = vpop.xlane.xlu0 %791 }
 0x12b   : > { %v793_v10 = vmul.f32 0.0078125, %v792_v8 }
 0x12d   : > { %v795_v14 = vsub.f32 %v793_v10, %v794_v9 }
 0x12f   : > { %v651_v6 = vpop.xlane.xlu1 %650  ;;  %v797_v15 = vadd.f32 1e-05, %v795_v14 }
 0x130   : > { %v4069_v26 = vmul.f32 0.0078125, %v651_v6 }
 0x131   : > { %v684_v17 = vpop.xlane.xlu0 %683  ;;  %3350 = vrsqrt.f32 %v797_v15 }
 0x132   : > { %v707_v42 = vmul.f32 %v4069_v26, %v4069_v26  ;;  %v699_v45 = vmul.f32 0.0078125, %v684_v17 }
 0x133   : > { %v653_v11 = vpop.xlane.xlu1 %652 }
 0x134   : > { %v4071_v28 = vmul.f32 0.0078125, %v653_v11  ;;  %v715_v53 = vsub.f32 %v699_v45, %v707_v42  ;;  %v723_v45 = vsub.f32 %v3916_v4, %v4069_v26 }
 0x135   : > { %v655_v22 = vpop.xlane.xlu0 %654 }
 0x136   : > { %v708_v49 = vmul.f32 %v4071_v28, %v4071_v28  ;;  %v4089_v54 = vmul.f32 0.0078125, %v655_v22  ;;  %v731_v60 = vadd.f32 1e-05, %v715_v53 }
 0x137   : > { %v686_v18 = vpop.xlane.xlu1 %685 }
 0x138   : > { %v700_v50 = vmul.f32 0.0078125, %v686_v18  ;;  %v709_v61 = vmul.f32 %v4089_v54, %v4089_v54  ;;  %3352 = vrsqrt.f32 %v731_v60 }
 0x139   : > { %v688_v29 = vpop.xlane.xlu0 %687 }
 0x13a   : > { %v716_v57 = vsub.f32 %v700_v50, %v708_v49  ;;  %v701_v62 = vmul.f32 0.0078125, %v688_v29 }
 0x13b   : > { %v657_v25 = vpop.xlane.xlu1 %656  ;;  %v3351_v38 = vpop.eup %3350 }
 0x13c   : > { %v799_v48 = vmul.f32 %v3351_v38, %v796_v33  ;;  %v4092_v58 = vmul.f32 0.0078125, %v657_v25  ;;  %v732_v63 = vadd.f32 1e-05, %v716_v57  ;;  %v717_v9 = vsub.f32 %v701_v62, %v709_v61 }
 0x13d   : > { %v659_v52 = vpop.xlane.xlu0 %658 }
 0x13e   : > { %v800_v51 = vmul.f32 %v4077_v39, %v799_v48  ;;  %v710_v2 = vmul.f32 %v4092_v58, %v4092_v58  ;;  %v4103_v10 = vmul.f32 0.0078125, %v659_v52  ;;  %3354 = vrsqrt.f32 %v732_v63 }
 0x13f   : > { %v690_v36 = vpop.xlane.xlu1 %689  ;;  %v733_v15 = vadd.f32 1e-05, %v717_v9 }
 0x140   : > { %v801_v55 = vadd.f32 %v4086_v1, %v800_v51  ;;  %v702_v3 = vmul.f32 0.0078125, %v690_v36 }
 0x141   : > { %v692_v6 = vpop.xlane.xlu0 %691  ;;  %3356 = vrsqrt.f32 %v733_v15 }
 0x142   : > { %v802_v59 = vpack.c.bf16 %v801_v55, %v801_v55  ;;  %v718_v11 = vsub.f32 %v702_v3, %v710_v2  ;;  %v703_v17 = vmul.f32 0.0078125, %v692_v6  ;;  %v3353_v42 = vpop.eup %3352  ;;  %v726_v55 = vsub.f32 %v3936_v13, %v4092_v58 }
 0x143   : > { %v661_v56 = vpop.xlane.xlu1 %660  ;;  %v747_v4 = vmul.f32 %v3353_v42, %v723_v45 }
 0x144   : > { %996 = vmatmul.mubr.bf16.vlgmr.msra.gmra.mrb[0].mxu0 %v802_v59  ;;  %3073 = vmatmul.mubr.bf16.vlgmr.msra.gmra.mrb[0].mxu1 %v802_v59  ;;  %v4105_v14 = vmul.f32 0.0078125, %v661_v56  ;;  %v734_v22 = vadd.f32 1e-05, %v718_v11  ;;  %v725_v56 = vsub.f32 %v3934_v12, %v4089_v54  ;;  %v727_v12 = vsub.f32 %v3950_v20, %v4103_v10 }
 0x145   : > { %1045 = vmatpush1.bf16.msra.mxu0 %v3918_v5  ;;  %1076 = vmatprep.mubr.bf16.mxu0 %v3600_v47  ;;  %v663_v5 = vpop.xlane.xlu0 %662 }
 0x146   : > { %1046 = vmatprep.subr.bf16.mxu0 %v3948_v19  ;;  %3092 = vmatprep.mubr.msk.bf16.mxu1 %vm3601_vm0, %v3599_v0  ;;  %v711_v19 = vmul.f32 %v4103_v10, %v4103_v10  ;;  %v712_v25 = vmul.f32 %v4105_v14, %v4105_v14  ;;  %v4115_v33 = vmul.f32 0.0078125, %v663_v5  ;;  %3358 = vrsqrt.f32 %v734_v22 }
 0x147   : > { %v694_v8 = vpop.xlane.xlu1 %693  ;;  %v728_v54 = vsub.f32 %v3956_v23, %v4105_v14 }
 0x148   : > { %v704_v29 = vmul.f32 0.0078125, %v694_v8  ;;  %v713_v50 = vmul.f32 %v4115_v33, %v4115_v33 }
 0x149   : > { %1047 = vmatpush1.bf16.msra.mxu0 %v3942_v16  ;;  %v719_v16 = vsub.f32 %v703_v17, %v711_v19  ;;  %v696_v38 = vpop.xlane.xlu0 %695 }
 0x14a   : > { %1048 = vmatprep.subr.bf16.mxu0 %v3959_v24  ;;  %v720_v24 = vsub.f32 %v704_v29, %v712_v25  ;;  %v705_v51 = vmul.f32 0.0078125, %v696_v38 }
 0x14b   : > { %v665_v18 = vpop.xlane.xlu1 %664  ;;  %v735_v49 = vadd.f32 1e-05, %v719_v16 }
 0x14c   : > { %v4117_v36 = vmul.f32 0.0078125, %v665_v18  ;;  %v736_v52 = vadd.f32 1e-05, %v720_v24  ;;  %v721_v26 = vsub.f32 %v705_v51, %v713_v50 }
 0x14d   : > { %1049 = vmatpush1.bf16.msra.mxu0 %v3953_v21  ;;  %v724_v21 = vsub.f32 %v3921_v7, %v4071_v28  ;;  %3360 = vrsqrt.f32 %v735_v49 }
 0x14e   : > { %1050 = vmatprep.subr.bf16.mxu0 %v3973_v30  ;;  %v3355_v30 = vpop.eup %3354  ;;  %3362 = vrsqrt.f32 %v736_v52  ;;  %v737_v59 = vadd.f32 1e-05, %v721_v26  ;;  %v730_v23 = vsub.f32 %v3981_v34, %v4117_v36 }
 0x14f   : > { %v698_v48 = vpop.xlane.xlu1 %697  ;;  %v748_v7 = vmul.f32 %v3355_v30, %v724_v21  ;;  %v3357_v28 = vpop.eup %3356 }
 0x150   : > { %v706_v53 = vmul.f32 0.0078125, %v698_v48  ;;  %v3359_v57 = vpop.eup %3358  ;;  %v749_v58 = vmul.f32 %v3357_v28, %v725_v56  ;;  %3364 = vrsqrt.f32 %v737_v59 }
 0x151   : > { %1051 = vmatpush1.bf16.msra.mxu0 %v3966_v27  ;;  %v714_v27 = vmul.f32 %v4117_v36, %v4117_v36  ;;  %v750_v61 = vmul.f32 %v3359_v57, %v726_v55 }
 0x152   : > { %1052 = vmatprep.subr.bf16.mxu0 %v3984_v35 }
 0x153   : > { %v722_v35 = vsub.f32 %v706_v53, %v714_v27  ;;  %v764_v62 = vmul.f32 %v4077_v39, %v750_v61 }
 0x155   : > { %1053 = vmatpush1.bf16.msra.mxu0 %v3978_v32  ;;  %v761_v32 = vmul.f32 %v4077_v39, %v747_v4  ;;  %v738_v60 = vadd.f32 1e-05, %v722_v35  ;;  %v778_v20 = vadd.f32 %v4086_v1, %v764_v62 }
 0x156   : > { %1054 = vmatprep.subr.bf16.mxu0 %v3997_v40  ;;  %v762_v40 = vmul.f32 %v4077_v39, %v748_v7 }
 0x157   : > { %3366 = vrsqrt.f32 %v738_v60  ;;  %v3603_v60 = vmov 1966171168  }
 0x158   : > { %v776_v13 = vadd.f32 %v4086_v1, %v762_v40 }
 0x159   : > { %1055 = vmatpush1.bf16.msra.mxu0 %v3990_v37  ;;  %v775_v37 = vadd.f32 %v4086_v1, %v761_v32 }
 0x15a   : > { %1056 = vmatprep.subr.bf16.mxu0 %v4001_v43  ;;  %v3361_v43 = vpop.eup %3360 }
 0x15b   : > { %v3363_v63 = vpop.eup %3362  ;;  %v751_v3 = vmul.f32 %v3361_v43, %v727_v12 }
 0x15c   : > { %v752_v6 = vmul.f32 %v3363_v63, %v728_v54  ;;  %v3365_v8 = vpop.eup %3364 }
 0x15d   : > { %1057 = vmatpush1.bf16.msra.mxu0 %v3999_v41  ;;  %v783_v41 = vpack.c.bf16 %v776_v13, %v775_v37  ;;  %v765_v10 = vmul.f32 %v4077_v39, %v751_v3  ;;  %v1282_v37 = vunpack.c.l.s4 %v3603_v60  ;;  %v1284_v13 = vlaneseq  ;;  %v3267_v60 = vld [vmem:[%s4462_s7 + $0x28] sm:$0xff]  }
 0x15e   : > { %1058 = vmatprep.subr.bf16.mxu0 %v4011_v46  ;;  %v763_v46 = vmul.f32 %v4077_v39, %v749_v58  ;;  %v766_v11 = vmul.f32 %v4077_v39, %v752_v6 }
 0x15f   : > { %v779_v5 = vadd.f32 %v4086_v1, %v765_v10  ;;  %v1283_v58 = vunpack.c.0.s8 %v1282_v37  ;;  %v4200_v61 = vshrl.u32 %v1284_v13, 7 }
 0x160   : > { %v777_v2 = vadd.f32 %v4086_v1, %v763_v46  ;;  %v780_v15 = vadd.f32 %v4086_v1, %v766_v11 }
 0x161   : > { %1059 = vmatpush1.bf16.msra.mxu0 %v4003_v44  ;;  %v729_v44 = vsub.f32 %v3975_v31, %v4115_v33  ;;  %v3367_v14 = vpop.eup %3366  ;;  %v1143_v31 = vpop.permute.xlu1 %1142  ;;  %v4170_v33 = vld [vmem:[%s4461_s6] ss:$0 sm:$0xff]  ;;  %v4203_v12 = vsub.s32 %v1283_v58, %v4200_v61  ;;  %v3268_v58 = vld [vmem:[%s4462_s7 + $0x30] sm:$0xff]  }
 0x162   : > { %v784_v9 = vpack.c.bf16 %v778_v20, %v777_v2  ;;  %v754_v17 = vmul.f32 %v3367_v14, %v730_v23  ;;  %v785_v18 = vpack.c.bf16 %v780_v15, %v779_v5  ;;  %vm1222_vm1 = vcmp.eq.f32.partialorder %v1143_v31, %v4170_v33 }
 0x163   : > { %v753_v19 = vmul.f32 %v3365_v8, %v729_v44 }
 0x164   : > { %1077 = vmatmul.mubr.bf16.vlgmr.msra.gmra.mrb[4].mxu0 %v783_v41  ;;  %v768_v34 = vmul.f32 %v4077_v39, %v754_v17  ;;  %v4207_v41 = vsub.s32 0, %v4200_v61 }
 0x165   : > { %1086 = vmatprep.mubr.bf16.mxu0 %v3600_v47  ;;  %v767_v22 = vmul.f32 %v4077_v39, %v753_v19  ;;  %v1148_v25 = vpop.permute.xlu1 %1147  ;;  %v1138_v39 = vpop.permute.xlu0 %1137 }
 0x166   : > { %v782_v16 = vadd.f32 %v4086_v1, %v768_v34  ;;  %vm1223_vm2 = vcmp.eq.f32.partialorder %v1148_v25, %v4170_v33  ;;  %vm1221_vm4 = vcmp.eq.f32.partialorder %v1138_v39, %v4170_v33 }
 0x167   : > { %v781_v29 = vadd.f32 %v4086_v1, %v767_v22  ;;  %vm2840_vm5 = vmpackc.low %vm1222_vm1, %vm1221_vm4  ;;  %v3602_v1 = vmov 1.0|1.0  }
 0x168   : > { %3077 = vmatpush3.bf16.msk.msra.mxu1 %vm2840_vm5, %v3602_v1  ;;  %3096 = vmatprep.subr.msk.bf16.mxu0 %vm2840_vm5, %v3602_v1 }
 0x169   : > { %v1153_v24 = vpop.permute.xlu1 %1152  ;;  %v786_v36 = vpack.c.bf16 %v782_v16, %v781_v29  ;;  %3078 = vmatprep.subr.bf16.mxu1 %v3599_v0  ;;  %3097 = vmatpush3.bf16.msk.msra.mxu0 %vm2840_vm5, %v3602_v1  ;;  %v1183_v21 = vpop.permute.xlu0 %1182 }
 0x16a   : > { %vm1224_vm3 = vcmp.eq.f32.partialorder %v1153_v24, %v4170_v33  ;;  %vm1230_vm13 = vcmp.eq.f32.partialorder %v1183_v21, %v4170_v33 }
 0x16b   : > { %vm2842_vm6 = vmpackc.low %vm1224_vm3, %vm1223_vm2 }
 0x16c   : > { %1087 = vmatmul.mubr.bf16.gmra.mrb[8].mxu0 %v784_v9  ;;  %3098 = vmatprep.subr.msk.bf16.mxu0 %vm2842_vm6, %v3602_v1 }
 0x16d   : > { %1096 = vmatprep.mubr.bf16.mxu0 %v3600_v47  ;;  %v1158_v38 = vpop.permute.xlu1 %1157  ;;  %3079 = vmatpush3.bf16.msk.msra.mxu1 %vm2842_vm6, %v3602_v1  ;;  %v1193_v30 = vpop.permute.xlu0 %1192 }
 0x16e   : > { %vm1225_vm7 = vcmp.eq.f32.partialorder %v1158_v38, %v4170_v33  ;;  %3080 = vmatprep.subr.bf16.mxu1 %v3599_v0  ;;  %3099 = vmatpush3.bf16.msk.msra.mxu0 %vm2842_vm6, %v3602_v1  ;;  %vm1232_vm1 = vcmp.eq.f32.partialorder %v1193_v30, %v4170_v33 }
 0x171   : > { %v1163_v42 = vpop.permute.xlu1 %1162  ;;  %v1203_v51 = vpop.permute.xlu0 %1202 }
 0x172   : > { %vm1226_vm8 = vcmp.eq.f32.partialorder %v1163_v42, %v4170_v33  ;;  %vm1234_vm4 = vcmp.eq.f32.partialorder %v1203_v51, %v4170_v33 }
 0x173   : > { %vm2844_vm9 = vmpackc.low %vm1226_vm8, %vm1225_vm7 }
 0x174   : > { %1097 = vmatmul.mubr.bf16.gmra.mrb[12].mxu0 %v785_v18  ;;  %3100 = vmatprep.subr.msk.bf16.mxu0 %vm2844_vm9, %v3602_v1 }
 0x175   : > { %1106 = vmatprep.mubr.bf16.mxu0 %v3600_v47  ;;  %v1168_v45 = vpop.permute.xlu1 %1167  ;;  %3081 = vmatpush3.bf16.msk.msra.mxu1 %vm2844_vm9, %v3602_v1  ;;  %v1213_v53 = vpop.permute.xlu0 %1212 }
 0x176   : > { %vm1227_vm10 = vcmp.eq.f32.partialorder %v1168_v45, %v4170_v33  ;;  %3082 = vmatprep.subr.bf16.mxu1 %v3599_v0  ;;  %3101 = vmatpush3.bf16.msk.msra.mxu0 %vm2844_vm9, %v3602_v1  ;;  %vm1236_vm8 = vcmp.eq.f32.partialorder %v1213_v53, %v4170_v33 }
 0x179   : > { %v1173_v48 = vpop.permute.xlu1 %1172 }
 0x17a   : > { %vm1228_vm11 = vcmp.eq.f32.partialorder %v1173_v48, %v4170_v33 }
 0x17b   : > { %vm2846_vm12 = vmpackc.low %vm1228_vm11, %vm1227_vm10  ;;  %vm1544_vm10 = vcmask 1042434   ;;  %vm1546_vm11 = vcmask 1043459  }
 0x17c   : > { %1107 = vmatmul.mubr.bf16.gmra.mrb[16].mxu0 %v786_v36  ;;  %3083 = vmatpush3.bf16.msk.msra.mxu1 %vm2846_vm12, %v3602_v1 }
 0x17d   : > { %3102 = vmatprep.subr.msk.bf16.mxu0 %vm2846_vm12, %v3602_v1  ;;  %v1178_v49 = vpop.permute.xlu1 %1177  ;;  %3084 = vmatprep.subr.bf16.mxu1 %v3599_v0 }
 0x17e   : > { %3103 = vmatpush3.bf16.msk.msra.mxu0 %vm2846_vm12, %v3602_v1  ;;  %vm1229_vm14 = vcmp.eq.f32.partialorder %v1178_v49, %v4170_v33  ;;  %vm1548_vm12 = vcmask 1044484  }
 0x17f   : > { %vm2848_vm15 = vmpackc.low %vm1230_vm13, %vm1229_vm14  ;;  %vm1550_vm13 = vcmask 1045509   ;;  %vm1552_vm14 = vcmask 1046534  }
 0x180   : > { %3085 = vmatpush3.bf16.msk.msra.mxu1 %vm2848_vm15, %v3602_v1  ;;  %3104 = vmatprep.subr.msk.bf16.mxu0 %vm2848_vm15, %v3602_v1 }
 0x181   : > { %v1188_v50 = vpop.permute.xlu1 %1187  ;;  %3086 = vmatprep.subr.bf16.mxu1 %v3599_v0 }
 0x182   : > { %3105 = vmatpush3.bf16.msk.msra.mxu0 %vm2848_vm15, %v3602_v1  ;;  %vm1231_vm2 = vcmp.eq.f32.partialorder %v1188_v50, %v4170_v33  ;;  %vm1554_vm15 = vcmask 1047559  }
 0x183   : > { %vm2850_vm3 = vmpackc.low %vm1232_vm1, %vm1231_vm2 }
 0x184   : > { %3087 = vmatpush3.bf16.msk.msra.mxu1 %vm2850_vm3, %v3602_v1  ;;  %3106 = vmatprep.subr.msk.bf16.mxu0 %vm2850_vm3, %v3602_v1 }
 0x185   : > { %v1198_v52 = vpop.permute.xlu1 %1197  ;;  %3088 = vmatprep.subr.bf16.mxu1 %v3599_v0 }
 0x186   : > { %3107 = vmatpush3.bf16.msk.msra.mxu0 %vm2850_vm3, %v3602_v1  ;;  %vm1233_vm5 = vcmp.eq.f32.partialorder %v1198_v52, %v4170_v33 }
 0x187   : > { %vm2852_vm6 = vmpackc.low %vm1234_vm4, %vm1233_vm5 }
 0x188   : > { %3089 = vmatpush3.bf16.msk.msra.mxu1 %vm2852_vm6, %v3602_v1  ;;  %3108 = vmatprep.subr.msk.bf16.mxu0 %vm2852_vm6, %v3602_v1 }
 0x189   : > { %3090 = vmatprep.subr.bf16.mxu1 %v3599_v0  ;;  %v1208_v27 = vpop.permute.xlu1 %1207 }
 0x18a   : > { %3109 = vmatpush3.bf16.msk.msra.mxu0 %vm2852_vm6, %v3602_v1  ;;  %vm1235_vm7 = vcmp.eq.f32.partialorder %v1208_v27, %v4170_v33 }
 0x18b   : > { %vm2854_vm9 = vmpackc.low %vm1236_vm8, %vm1235_vm7 }
 0x18c   : > { %3091 = vmatpush3.bf16.msk.msra.mxu1 %vm2854_vm9, %v3602_v1  ;;  %3110 = vmatprep.subr.msk.bf16.mxu0 %vm2854_vm9, %v3602_v1 }
 0x18d   : > { %3120 = vmatprep.subr.bf16.mxu1 %v3599_v0 }
 0x18e   : > { %3111 = vmatpush3.bf16.msk.msra.mxu0 %vm2854_vm9, %v3602_v1 }
 0x217   : > { %v997_v4 = vpop.f32.mrb[0].mxu0  ;;  %v4196_v7 = vpop.f32.mrb[0].mxu1 }
 0x218   : > { %v1117_v26 = vmul.f32 0.17677669, %v997_v4  ;;  %v999_v35 = vpop.f32.mrb[1].mxu0  ;;  %v3074_v28 = vpop.f32.mrb[1].mxu1 }
 0x219   : > { %v1001_v55 = vpop.f32.mrb[2].mxu0  ;;  %v1041_v56 = vpop.f32.mrb[2].mxu1 }
 0x21a   : > { %v1277_v32 = vmul.f32 %v1117_v26, %v999_v35  ;;  %v1002_v40 = vpop.f32.mrb[3].mxu0  ;;  %v3075_v57 = vpop.f32.mrb[3].mxu1  ;;  %v1287_v43 = vrot.slane %v1117_v26, %v4203_v12  ;;  %v1280_v20 = vcombine.high %v1117_v26, %v1117_v26  ;;  %v3262_v56 = vld [vmem:[%s4462_s7] sm:$0xff]  }
 0x21b   : > { %v3264_v40 = vld [vmem:[%s4462_s7 + $0x10] sm:$0xff]   ;;  %v3265_v57 = vld [vmem:[%s4462_s7 + $0x18] sm:$0xff]  }
 0x21c   : > { %v1278_v59 = vpack.c.bf16 %v1277_v32, %v1277_v32  ;;  %v1295_v54 = vcombine.high %v1287_v43, %v1287_v43  ;;  %v1303_v46 = vrot.slane %v1287_v43, %v4203_v12  ;;  %v1294_v5 = vrot.slane %v1280_v20, %v4203_v12  ;;  %v3263_v32 = vld [vmem:[%s4462_s7 + $0x8] sm:$0xff]  }
 0x21e   : > { %3093 = vmatmul.mubr.bf16.vlgmr.msra.gmra.mrb[4].mxu1 %v1278_v59  ;;  %v1317_v62 = vrot.slane %v1295_v54, %v4203_v12  ;;  %v1332_v63 = vrot.slane %v1303_v46, %v4207_v41  ;;  %v1325_v10 = vcombine.high %v1303_v46, %v1303_v46  ;;  %v1296_v22 = vcombine.high %v1294_v5, %v1294_v5  ;;  %v3266_v59 = vld [vmem:[%s4462_s7 + $0x20] sm:$0xff]   ;;  %v3269_v46 = vld [vmem:[%s4462_s7 + $0x38] sm:$0xff]  }
 0x21f   : > { %3136 = vmatprep.mubr.msk.bf16.mxu1 %vm3601_vm0, %v3599_v0  ;;  %v1310_v16 = vrot.slane %v1294_v5, %v4203_v12  ;;  %3121 = vmatpush3.bf16.msra.mxu1 %v3262_v56  ;;  %vm1542_vm0 = vcmask 1041409  }
 0x220   : > { %v1336_v44 = vrot.slane %v1317_v62, %v4207_v41  ;;  %v1327_v14 = vcombine.high %v1317_v62, %v1317_v62  ;;  %v1340_v15 = vrot.slane %v1325_v10, %v4207_v41  ;;  %v1324_v24 = vrot.slane %v1296_v22, %v4203_v12  ;;  %3122 = vmatprep.subr.bf16.mxu1 %v3599_v0 }
 0x221   : > { %v1348_v36 = vrot.slane %v1310_v16, %v4207_v41  ;;  %v1326_v30 = vcombine.high %v1310_v16, %v1310_v16 }
 0x222   : > { %v1344_v18 = vrot.slane %v1327_v14, %v4207_v41  ;;  %v1352_v42 = vrot.slane %v1324_v24, %v4207_v41  ;;  %v1328_v50 = vcombine.high %v1324_v24, %v1324_v24 }
 0x223   : > { %v1356_v51 = vrot.slane %v1326_v30, %v4207_v41  ;;  %3123 = vmatpush3.bf16.msra.mxu1 %v3263_v32 }
 0x224   : > { %v1360_v4 = vrot.slane %v1328_v50, %v4207_v41  ;;  %3124 = vmatprep.subr.bf16.mxu1 %v3599_v0 }
 0x227   : > { %3125 = vmatpush3.bf16.msra.mxu1 %v3264_v40 }
 0x228   : > { %3126 = vmatprep.subr.bf16.mxu1 %v3599_v0 }
 0x22b   : > { %3127 = vmatpush3.bf16.msra.mxu1 %v3265_v57 }
 0x22c   : > { %3128 = vmatprep.subr.bf16.mxu1 %v3599_v0 }
 0x22f   : > { %3129 = vmatpush3.bf16.msra.mxu1 %v3266_v59 }
 0x230   : > { %3130 = vmatprep.subr.bf16.mxu1 %v3599_v0 }
 0x233   : > { %3131 = vmatpush3.bf16.msra.mxu1 %v3267_v60 }
 0x234   : > { %3132 = vmatprep.subr.bf16.mxu1 %v3599_v0 }
 0x237   : > { %v1078_v2 = vpop.f32.mrb[4].mxu0  ;;  %3133 = vmatpush3.bf16.msra.mxu1 %v3268_v58 }
 0x238   : > { %v1369_v3 = vmul.f32 %v1332_v63, %v1078_v2  ;;  %v4212_v6 = vpop.f32.mrb[5].mxu0  ;;  %3134 = vmatprep.subr.bf16.mxu1 %v3599_v0 }
 0x239   : > { %v1082_v8 = vpop.f32.mrb[6].mxu0 }
 0x23a   : > { %v1370_v23 = vmul.f32 %v1336_v44, %v1082_v8  ;;  %v4215_v9 = vpop.f32.mrb[7].mxu0 }
 0x23b   : > { %3135 = vmatpush3.bf16.msra.mxu1 %v3269_v46 }
 0x23c   : > { %v1377_v11 = vpack.c.bf16 %v1370_v23, %v1369_v3 }
 0x23e   : > { %3112 = vmatprep.mubr.bf16.mxu0 %v1377_v11 }
 0x23f   : > { %v1088_v19 = vpop.f32.mrb[8].mxu0 }
 0x240   : > { %v1371_v17 = vmul.f32 %v1340_v15, %v1088_v19  ;;  %v4219_v31 = vpop.f32.mrb[9].mxu0 }
 0x241   : > { %v1092_v34 = vpop.f32.mrb[10].mxu0 }
 0x242   : > { %v1372_v25 = vmul.f32 %v1344_v18, %v1092_v34  ;;  %v4222_v29 = vpop.f32.mrb[11].mxu0 }
 0x244   : > { %v1378_v33 = vpack.c.bf16 %v1372_v25, %v1371_v17 }
 0x246   : > { %3113 = vmatmul.mubr.bf16.vlgmr.msra.gmra.mrb[20].mxu0 %v1378_v33 }
 0x247   : > { %v1098_v38 = vpop.f32.mrb[12].mxu0 }
 0x248   : > { %v1373_v39 = vmul.f32 %v1348_v36, %v1098_v38  ;;  %v4227_v1 = vpop.f32.mrb[13].mxu0 }
 0x249   : > { %v1102_v45 = vpop.f32.mrb[14].mxu0 }
 0x24a   : > { %v1374_v21 = vmul.f32 %v1352_v42, %v1102_v45  ;;  %v4230_v48 = vpop.f32.mrb[15].mxu0 }
 0x24c   : > { %v1379_v49 = vpack.c.bf16 %v1374_v21, %v1373_v39 }
 0x24e   : > { %3116 = vmatprep.mubr.bf16.mxu0 %v1379_v49 }
 0x24f   : > { %v1108_v52 = vpop.f32.mrb[16].mxu0 }
 0x250   : > { %v1375_v27 = vmul.f32 %v1356_v51, %v1108_v52  ;;  %v4233_v53 = vpop.f32.mrb[17].mxu0 }
 0x251   : > { %v1112_v26 = vpop.f32.mrb[18].mxu0 }
 0x252   : > { %v1376_v35 = vmul.f32 %v1360_v4, %v1112_v26  ;;  %v4236_v28 = vpop.f32.mrb[19].mxu0 }
 0x254   : > { %v1380_v55 = vpack.c.bf16 %v1376_v35, %v1375_v27 }
 0x256   : > { %3117 = vmatmul.mubr.bf16.gmra.mrb[24].mxu0 %v1380_v55 }
 0x257   : > { %2213 = vmatprep.mubr.bf16.mxu0 %v3600_v47 }
 0x2f1   : > { %v4262_v37 = vpop.f32.mrb[4].mxu1 }
 0x2f2   : > { %v3094_v13 = vpop.f32.mrb[5].mxu1 }
 0x2f3   : > { %v1418_v43 = vpop.f32.mrb[6].mxu1 }
 0x2f4   : > { %v3095_v54 = vpop.f32.mrb[7].mxu1 }
 0x319   : > { %v4272_v62 = vpop.f32.mrb[20].mxu0 }
 0x31a   : > { %v1498_v63 = vrot.slane %v4272_v62, 4  ;;  %v4275_v2 = vpop.f32.mrb[21].mxu0 }
 0x31b   : > { %v1486_v20 = vrot.slane %v4275_v2, 4  ;;  %v4278_v3 = vpop.f32.mrb[22].mxu0 }
 0x31c   : > { %v1499_v44 = vmax.f32 %v4272_v62, %v1498_v63  ;;  %v1504_v8 = vrot.slane %v4278_v3, 4  ;;  %v4282_v23 = vpop.f32.mrb[23].mxu0 }
 0x31d   : > { %v1487_v10 = vmax.f32 %v4275_v2, %v1486_v20  ;;  %v1492_v0 = vrot.slane %v4282_v23, 4 }
 0x31e   : > { %v1500_v11 = vrot.slane %v1499_v44, 2  ;;  %v1505_v14 = vmax.f32 %v4278_v3, %v1504_v8 }
 0x31f   : > { %v1488_v5 = vrot.slane %v1487_v10, 2  ;;  %v1493_v15 = vmax.f32 %v4282_v23, %v1492_v0 }
 0x320   : > { %v1501_v19 = vmax.f32 %v1499_v44, %v1500_v11  ;;  %v1506_v17 = vrot.slane %v1505_v14, 2 }
 0x321   : > { %v1489_v18 = vmax.f32 %v1487_v10, %v1488_v5  ;;  %v1494_v22 = vrot.slane %v1493_v15, 2 }
 0x322   : > { %v1507_v34 = vmax.f32 %v1505_v14, %v1506_v17  ;;  %v1502_v33 = vrot.slane %v1501_v19, 1 }
 0x323   : > { %v1490_v25 = vrot.slane %v1489_v18, 1  ;;  %v1495_v16 = vmax.f32 %v1493_v15, %v1494_v22 }
 0x324   : > { %v1508_v24 = vrot.slane %v1507_v34, 1  ;;  %v1503_v42 = vmax.f32 %v1501_v19, %v1502_v33 }
 0x325   : > { %v1496_v36 = vrot.slane %v1495_v16, 1  ;;  %v1491_v38 = vmax.f32 %v1489_v18, %v1490_v25 }
 0x326   : > { %v1509_v45 = vmax.f32 %v1507_v34, %v1508_v24 }
 0x327   : > { %v1497_v39 = vmax.f32 %v1495_v16, %v1496_v36 }
 0x329   : > { %v1543_v21 = vsel %vm1542_vm0, %v1497_v39, %v1491_v38  ;;  %v4289_v30 = vpop.f32.mrb[24].mxu0 }
 0x32a   : > { %v1545_v49 = vsel %vm1544_vm10, %v1503_v42, %v1543_v21  ;;  %v1522_v50 = vrot.slane %v4289_v30, 4  ;;  %v1471_v51 = vpop.f32.mrb[25].mxu0 }
 0x32b   : > { %v1510_v52 = vrot.slane %v1471_v51, 4  ;;  %v1547_v27 = vsel %vm1546_vm11, %v1509_v45, %v1545_v49  ;;  %v4294_v4 = vpop.f32.mrb[26].mxu0 }
 0x32c   : > { %v1523_v26 = vmax.f32 %v4289_v30, %v1522_v50  ;;  %v1528_v35 = vrot.slane %v4294_v4, 4  ;;  %v1474_v55 = vpop.f32.mrb[27].mxu0 }
 0x32d   : > { %v1511_v56 = vmax.f32 %v1471_v51, %v1510_v52  ;;  %v1516_v32 = vrot.slane %v1474_v55, 4 }
 0x32e   : > { %v1524_v40 = vrot.slane %v1523_v26, 2  ;;  %v1529_v57 = vmax.f32 %v4294_v4, %v1528_v35 }
 0x32f   : > { %v1512_v59 = vrot.slane %v1511_v56, 2  ;;  %v1517_v60 = vmax.f32 %v1474_v55, %v1516_v32 }
 0x330   : > { %v1525_v13 = vmax.f32 %v1523_v26, %v1524_v40  ;;  %v1530_v58 = vrot.slane %v1529_v57, 2 }
 0x331   : > { %v1513_v43 = vmax.f32 %v1511_v56, %v1512_v59  ;;  %v1518_v54 = vrot.slane %v1517_v60, 2 }
 0x332   : > { %v1531_v46 = vmax.f32 %v1529_v57, %v1530_v58  ;;  %v1526_v44 = vrot.slane %v1525_v13, 1 }
 0x333   : > { %v1514_v63 = vrot.slane %v1513_v43, 1  ;;  %v1519_v20 = vmax.f32 %v1517_v60, %v1518_v54 }
 0x334   : > { %v1532_v10 = vrot.slane %v1531_v46, 1  ;;  %v1527_v5 = vmax.f32 %v1525_v13, %v1526_v44 }
 0x335   : > { %v1515_v8 = vmax.f32 %v1513_v43, %v1514_v63  ;;  %v1520_v0 = vrot.slane %v1519_v20, 1 }
 0x336   : > { %v1533_v15 = vmax.f32 %v1531_v46, %v1532_v10 }
 0x337   : > { %v1549_v11 = vsel %vm1548_vm12, %v1515_v8, %v1547_v27  ;;  %v1521_v14 = vmax.f32 %v1519_v20, %v1520_v0 }
 0x339   : > { %v1551_v19 = vsel %vm1550_vm13, %v1521_v14, %v1549_v11 }
 0x33a   : > { %v1553_v17 = vsel %vm1552_vm14, %v1527_v5, %v1551_v19 }
 0x33b   : > { %v1555_v18 = vsel %vm1554_vm15, %v1533_v15, %v1553_v17 }
 0x33c   : > { %v1557_v22 = vmax.f32 %v4262_v37, %v1555_v18 }
 0x33e   : > { %v1558_v34 = vsub.f32 %v4262_v37, %v1557_v22  ;;  %v1562_v25 = vcombine.high %v1557_v22, %v1557_v22  ;;  %v1569_v16 = vrot.slane %v1557_v22, %v4203_v12 }
 0x340   : > { %v1559_v33 = vmul.f32 1.442695, %v1558_v34  ;;  %v1576_v24 = vrot.slane %v1562_v25, %v4203_v12  ;;  %v1577_v36 = vcombine.high %v1569_v16, %v1569_v16  ;;  %v1585_v38 = vrot.slane %v1569_v16, %v4203_v12 }
 0x342   : > { %v1578_v39 = vcombine.high %v1576_v24, %v1576_v24  ;;  %v1592_v42 = vrot.slane %v1576_v24, %v4203_v12  ;;  %v1599_v45 = vrot.slane %v1577_v36, %v4203_v12  ;;  %v1607_v21 = vcombine.high %v1585_v38, %v1585_v38 }
 0x343   : > { %v1614_v49 = vrot.slane %v1585_v38, %v4207_v41  ;;  %3368 = vpow2.f32 %v1559_v33 }
 0x344   : > { %v1606_v37 = vrot.slane %v1578_v39, %v4203_v12  ;;  %v1608_v50 = vcombine.high %v1592_v42, %v1592_v42  ;;  %v1609_v52 = vcombine.high %v1599_v45, %v1599_v45  ;;  %v1618_v27 = vrot.slane %v1599_v45, %v4207_v41 }
 0x345   : > { %v1622_v26 = vrot.slane %v1607_v21, %v4207_v41  ;;  %v1630_v35 = vrot.slane %v1592_v42, %v4207_v41  ;;  %v1651_v56 = vsub.f32 %v4275_v2, %v1614_v49 }
 0x346   : > { %v1610_v32 = vcombine.high %v1606_v37, %v1606_v37  ;;  %v1626_v40 = vrot.slane %v1609_v52, %v4207_v41  ;;  %v1634_v57 = vrot.slane %v1606_v37, %v4207_v41  ;;  %v1638_v59 = vrot.slane %v1608_v50, %v4207_v41 }
 0x347   : > { %v1652_v60 = vsub.f32 %v4282_v23, %v1618_v27  ;;  %v1653_v12 = vsub.f32 %v4272_v62, %v1622_v26  ;;  %v1655_v13 = vsub.f32 %v1471_v51, %v1630_v35  ;;  %v1659_v58 = vmul.f32 1.442695, %v1651_v56 }
 0x348   : > { %v1642_v43 = vrot.slane %v1610_v32, %v4207_v41  ;;  %v1654_v54 = vsub.f32 %v4278_v3, %v1626_v40  ;;  %v1656_v46 = vsub.f32 %v1474_v55, %v1634_v57  ;;  %v1657_v2 = vsub.f32 %v4289_v30, %v1638_v59 }
 0x349   : > { %3370 = vpow2.f32 %v1659_v58  ;;  %v1661_v63 = vmul.f32 1.442695, %v1652_v60  ;;  %v1663_v20 = vmul.f32 1.442695, %v1653_v12  ;;  %v1667_v10 = vmul.f32 1.442695, %v1655_v13 }
 0x34a   : > { %v1658_v44 = vsub.f32 %v4294_v4, %v1642_v43  ;;  %v1665_v8 = vmul.f32 1.442695, %v1654_v54  ;;  %v1669_v23 = vmul.f32 1.442695, %v1656_v46  ;;  %v1671_v62 = vmul.f32 1.442695, %v1657_v2 }
 0x34b   : > { %3372 = vpow2.f32 %v1661_v63 }
 0x34c   : > { %3374 = vpow2.f32 %v1663_v20  ;;  %v1673_v0 = vmul.f32 1.442695, %v1658_v44 }
 0x34d   : > { %v4325_v51 = vpop.eup %3368  ;;  %3376 = vpow2.f32 %v1665_v8 }
 0x34e   : > { %3378 = vpow2.f32 %v1667_v10  ;;  %v4329_v3 = vmul.f32 %v4325_v51, %v4196_v7 }
 0x34f   : > { %3380 = vpow2.f32 %v1669_v23 }
 0x350   : > { %3382 = vpow2.f32 %v1671_v62 }
 0x351   : > { %3384 = vpow2.f32 %v1673_v0 }
 0x353   : > { %v3371_v30 = vpop.eup %3370 }
 0x354   : > { %v1675_v4 = vrot.slane %v3371_v30, 4  ;;  %v1742_v55 = vmul.f32 %v3371_v30, %v4212_v6 }
 0x355   : > { %v3373_v11 = vpop.eup %3372 }
 0x356   : > { %v3375_v14 = vpop.eup %3374  ;;  %v1676_v5 = vadd.f32 %v3371_v30, %v1675_v4  ;;  %v1681_v15 = vrot.slane %v3373_v11, 4  ;;  %v4333_v19 = vmul.f32 %v3373_v11, %v4215_v9  ;;  %v1750_v17 = vrot.slane %v1742_v55, 4 }
 0x357   : > { %v3377_v18 = vpop.eup %3376  ;;  %v1687_v22 = vrot.slane %v3375_v14, 4  ;;  %v4336_v7 = vmul.f32 %v3375_v14, %v4219_v31 }
 0x358   : > { %v3379_v34 = vpop.eup %3378  ;;  %v1677_v25 = vrot.slane %v1676_v5, 2  ;;  %v1682_v16 = vadd.f32 %v3373_v11, %v1681_v15  ;;  %v1693_v33 = vrot.slane %v3377_v18, 4  ;;  %v4339_v24 = vmul.f32 %v3377_v18, %v4222_v29 }
 0x359   : > { %v3381_v6 = vpop.eup %3380  ;;  %v1688_v36 = vadd.f32 %v3375_v14, %v1687_v22  ;;  %v1699_v38 = vrot.slane %v3379_v34, 4  ;;  %v4342_v39 = vmul.f32 %v3379_v34, %v4227_v1  ;;  %v1751_v9 = vadd.f32 %v1750_v17, %v1742_v55 }
 0x35a   : > { %v3383_v42 = vpop.eup %3382  ;;  %v1678_v45 = vadd.f32 %v1677_v25, %v1676_v5  ;;  %v1683_v21 = vrot.slane %v1682_v16, 2  ;;  %v1694_v49 = vadd.f32 %v3377_v18, %v1693_v33  ;;  %v1705_v31 = vrot.slane %v3381_v6, 4 }
 0x35b   : > { %v3385_v37 = vpop.eup %3384  ;;  %v1689_v50 = vrot.slane %v1688_v36, 2  ;;  %v1700_v52 = vadd.f32 %v3379_v34, %v1699_v38  ;;  %v1711_v27 = vrot.slane %v3383_v42, 4  ;;  %v1747_v26 = vmul.f32 %v3381_v6, %v4230_v48 }
 0x35c   : > { %v1679_v29 = vrot.slane %v1678_v45, 1  ;;  %v1684_v35 = vadd.f32 %v1683_v21, %v1682_v16  ;;  %v1695_v56 = vrot.slane %v1694_v49, 2  ;;  %v1706_v32 = vadd.f32 %v3381_v6, %v1705_v31 }
 0x35d   : > { %v1690_v40 = vadd.f32 %v1689_v50, %v1688_v36  ;;  %v1701_v57 = vrot.slane %v1700_v52, 2  ;;  %v1712_v1 = vadd.f32 %v3383_v42, %v1711_v27  ;;  %v1717_v59 = vrot.slane %v3385_v37, 4 }
 0x35e   : > { %v1680_v60 = vadd.f32 %v1679_v29, %v1678_v45  ;;  %v1685_v12 = vrot.slane %v1684_v35, 1  ;;  %v1696_v13 = vadd.f32 %v1695_v56, %v1694_v49  ;;  %v1707_v58 = vrot.slane %v1706_v32, 2 }
 0x35f   : > { %v1691_v43 = vrot.slane %v1690_v40, 1  ;;  %v1702_v54 = vadd.f32 %v1701_v57, %v1700_v52  ;;  %v1713_v46 = vrot.slane %v1712_v1, 2  ;;  %v1718_v2 = vadd.f32 %v3385_v37, %v1717_v59 }
 0x360   : > { %v1686_v63 = vadd.f32 %v1685_v12, %v1684_v35  ;;  %v1697_v20 = vrot.slane %v1696_v13, 1  ;;  %v1708_v44 = vadd.f32 %v1707_v58, %v1706_v32  ;;  %v1748_v48 = vmul.f32 %v3383_v42, %v4233_v53 }
 0x361   : > { %v1692_v8 = vadd.f32 %v1691_v43, %v1690_v40  ;;  %v1703_v10 = vrot.slane %v1702_v54, 1  ;;  %v1714_v23 = vadd.f32 %v1713_v46, %v1712_v1  ;;  %v1719_v62 = vrot.slane %v1718_v2, 2 }
 0x362   : > { %v1698_v0 = vadd.f32 %v1697_v20, %v1696_v13  ;;  %v1709_v30 = vrot.slane %v1708_v44, 1  ;;  %v1731_v4 = vsel %vm1542_vm0, %v1686_v63, %v1680_v60  ;;  %v1749_v55 = vmul.f32 %v3385_v37, %v4236_v28 }
 0x363   : > { %v1704_v11 = vadd.f32 %v1703_v10, %v1702_v54  ;;  %v1715_v14 = vrot.slane %v1714_v23, 1  ;;  %v1732_v5 = vsel %vm1544_vm10, %v1692_v8, %v1731_v4  ;;  %v1720_v15 = vadd.f32 %v1719_v62, %v1718_v2 }
 0x364   : > { %v1710_v17 = vadd.f32 %v1709_v30, %v1708_v44  ;;  %v1733_v18 = vsel %vm1546_vm11, %v1698_v0, %v1732_v5  ;;  %v1752_v22 = vrot.slane %v1751_v9, 2  ;;  %v1756_v53 = vrot.slane %v4333_v19, 4 }
 0x365   : > { %v1716_v34 = vadd.f32 %v1715_v14, %v1714_v23  ;;  %v1734_v25 = vsel %vm1548_vm12, %v1704_v11, %v1733_v18  ;;  %v1721_v16 = vrot.slane %v1720_v15, 1  ;;  %v1762_v33 = vrot.slane %v4336_v7, 4 }
 0x366   : > { %v1735_v6 = vsel %vm1550_vm13, %v1710_v17, %v1734_v25  ;;  %v1753_v28 = vadd.f32 %v1752_v22, %v1751_v9  ;;  %v1757_v36 = vadd.f32 %v1756_v53, %v4333_v19  ;;  %v1768_v38 = vrot.slane %v4339_v24, 4 }
 0x367   : > { %v1736_v42 = vsel %vm1552_vm14, %v1716_v34, %v1735_v6  ;;  %v1722_v45 = vadd.f32 %v1721_v16, %v1720_v15  ;;  %v1763_v21 = vadd.f32 %v1762_v33, %v4336_v7  ;;  %v1774_v49 = vrot.slane %v4342_v39, 4  ;;  %v3270_v33 = vld [vmem:[#allocation7] ss:$16 sps:$4 sm:$0xff]   ;;  %v3272_v6 = vld [vmem:[#allocation7 + $0x4] ss:$16 sps:$4 sm:$0xff]  }
 0x368   : > { %v1754_v31 = vrot.slane %v1753_v28, 1  ;;  %v1758_v37 = vrot.slane %v1757_v36, 2  ;;  %v1769_v50 = vadd.f32 %v1768_v38, %v4339_v24  ;;  %v1780_v52 = vrot.slane %v1747_v26, 4  ;;  %v3278_v38 = vld [vmem:[#allocation7 + $0x24] ss:$16 sps:$4 sm:$0xff]   ;;  %2181 = vmatprep.subr.bf16.mxu0 %v3272_v6  ;;  %v3323_v6 = vld [vmem:[#allocation8 + $0xc8] sm:$0xff]  }
 0x369   : > { %v1737_v27 = vsel %vm1554_vm15, %v1722_v45, %v1736_v42  ;;  %v1764_v29 = vrot.slane %v1763_v21, 2  ;;  %v1775_v9 = vadd.f32 %v1774_v49, %v4342_v39  ;;  %v1786_v19 = vrot.slane %v1748_v48, 4  ;;  %v3281_v42 = vld [vmem:[#allocation7 + $0x2c] ss:$16 sps:$4 sm:$0xff]   ;;  %2182 = vmatpush1.bf16.msra.mxu0 %v3270_v33  ;;  %v3276_v45 = vld [vmem:[#allocation7 + $0x20] ss:$16 sps:$4 sm:$0xff]  }
 0x36a   : > { %v1739_v35 = vadd.f32 %v4325_v51, %v1737_v27  ;;  %v1759_v56 = vadd.f32 %v1758_v37, %v1757_v36  ;;  %v1770_v32 = vrot.slane %v1769_v50, 2  ;;  %v1781_v7 = vadd.f32 %v1780_v52, %v1747_v26  ;;  %v3275_v36 = vld [vmem:[#allocation7 + $0xc] ss:$16 sps:$4 sm:$0xff]   ;;  %2183 = vmatprep.subr.bf16.mxu0 %v3278_v38  ;;  %v2881_v49 = vld [vmem:[%s4470_s15] ss:$0 sm:$0xff] }
 0x36b   : > { %v1765_v40 = vadd.f32 %v1764_v29, %v1763_v21  ;;  %v1776_v57 = vrot.slane %v1775_v9, 2  ;;  %v1787_v1 = vadd.f32 %v1786_v19, %v1748_v48  ;;  %v1755_v59 = vadd.f32 %v1754_v31, %v1753_v28  ;;  %v3273_v28 = vld [vmem:[#allocation7 + $0x8] ss:$16 sps:$4 sm:$0xff]   ;;  %2222 = vmatprep.subr.bf16.mxu1 %v3275_v36  ;;  %v3326_v38 = vld [vmem:[#allocation8 + $0x50] sm:$0xff]  }
 0x36c   : > { %v1760_v60 = vrot.slane %v1759_v56, 1  ;;  %v1771_v12 = vadd.f32 %v1770_v32, %v1769_v50  ;;  %v1792_v13 = vrot.slane %v1749_v55, 4  ;;  %v1782_v43 = vrot.slane %v1781_v7, 2  ;;  %v3279_v21 = vld [vmem:[#allocation7 + $0x28] ss:$16 sps:$4 sm:$0xff]  }
 0x36d   : > { %v1766_v24 = vrot.slane %v1765_v40, 1  ;;  %v1777_v58 = vadd.f32 %v1776_v57, %v1775_v9  ;;  %v1788_v54 = vrot.slane %v1787_v1, 2  ;;  %3386 = vrcp.f32 %v1739_v35  ;;  %2184 = vmatpush1.bf16.msra.mxu0 %v3276_v45  ;;  %v3398_v29 = vld [vmem:[%s3888_s24] sm:$0xff]  ;;  %v3322_v33 = vld [vmem:[#allocation8 + $0x48] sm:$0xff]   ;;  %s3519_s24 = scalar_lea.vmem %s3518_s16, 256 }
 0x36e   : > { %v1761_v46 = vadd.f32 %v1760_v60, %v1759_v56  ;;  %v1772_v39 = vrot.slane %v1771_v12, 1  ;;  %v1793_v2 = vadd.f32 %v1792_v13, %v1749_v55  ;;  %v1783_v20 = vadd.f32 %v1782_v43, %v1781_v7  ;;  %v3284_v35 = vld [vmem:[#allocation7 + $0x44] ss:$16 sps:$4 sm:$0xff]   ;;  %v3287_v56 = vld [vmem:[#allocation7 + $0x4c] ss:$16 sps:$4 sm:$0xff]  }
 0x36f   : > { %v1767_v63 = vadd.f32 %v1766_v24, %v1765_v40  ;;  %v1778_v51 = vrot.slane %v1777_v58, 1  ;;  %v1789_v44 = vadd.f32 %v1788_v54, %v1787_v1  ;;  %v3282_v32 = vld [vmem:[#allocation7 + $0x40] ss:$16 sps:$4 sm:$0xff]   ;;  %v3285_v40 = vld [vmem:[#allocation7 + $0x48] ss:$16 sps:$4 sm:$0xff]   ;;  %2185 = vmatprep.subr.bf16.mxu0 %v3284_v35 }
 0x370   : > { %v1773_v8 = vadd.f32 %v1772_v39, %v1771_v12  ;;  %v1794_v10 = vrot.slane %v1793_v2, 2  ;;  %v1806_v26 = vsel %vm1542_vm0, %v1761_v46, %v1755_v59  ;;  %v1784_v23 = vrot.slane %v1783_v20, 1  ;;  %v3290_v57 = vld [vmem:[#allocation7 + $0x64] ss:$16 sps:$4 sm:$0xff]   ;;  %v3293_v7 = vld [vmem:[#allocation7 + $0x6c] ss:$16 sps:$4 sm:$0xff]  }
 0x371   : > { %v1779_v48 = vadd.f32 %v1778_v51, %v1777_v58  ;;  %v1790_v62 = vrot.slane %v1789_v44, 1  ;;  %v1807_v0 = vsel %vm1544_vm10, %v1767_v63, %v1806_v26  ;;  %2186 = vmatpush1.bf16.msra.mxu0 %v3282_v32  ;;  %v3288_v1 = vld [vmem:[#allocation7 + $0x60] ss:$16 sps:$4 sm:$0xff]   ;;  %v3291_v59 = vld [vmem:[#allocation7 + $0x68] ss:$16 sps:$4 sm:$0xff]  }
 0x372   : > { %v1795_v30 = vadd.f32 %v1794_v10, %v1793_v2  ;;  %v1808_v4 = vsel %vm1546_vm11, %v1773_v8, %v1807_v0  ;;  %v1785_v11 = vadd.f32 %v1784_v23, %v1783_v20  ;;  %2187 = vmatprep.subr.bf16.mxu0 %v3290_v57  ;;  %v3294_v60 = vld [vmem:[#allocation7 + $0x80] ss:$16 sps:$4 sm:$0xff]   ;;  %v3296_v12 = vld [vmem:[#allocation7 + $0x84] ss:$16 sps:$4 sm:$0xff]   ;;  %v3297_v13 = vld [vmem:[#allocation7 + $0x88] ss:$16 sps:$4 sm:$0xff]  }
 0x373   : > { %v1809_v14 = vsel %vm1548_vm12, %v1779_v48, %v1808_v4  ;;  %v1791_v55 = vadd.f32 %v1790_v62, %v1789_v44  ;;  %v3299_v24 = vld [vmem:[#allocation7 + $0x8c] ss:$16 sps:$4 sm:$0xff]   ;;  %v3302_v58 = vld [vmem:[#allocation7 + $0xa4] ss:$16 sps:$4 sm:$0xff]   ;;  %v3300_v54 = vld [vmem:[#allocation7 + $0xa0] ss:$16 sps:$4 sm:$0xff]  }
 0x374   : > { %v1796_v5 = vrot.slane %v1795_v30, 1  ;;  %v1810_v15 = vsel %vm1550_vm13, %v1785_v11, %v1809_v14  ;;  %v3305_v43 = vld [vmem:[#allocation7 + $0xac] ss:$16 sps:$4 sm:$0xff]   ;;  %v3303_v46 = vld [vmem:[#allocation7 + $0xa8] ss:$16 sps:$4 sm:$0xff]   ;;  %v3328_v45 = vld [vmem:[#allocation8 + $0x10] sm:$0xff]  }
 0x375   : > { %v1811_v18 = vsel %vm1552_vm14, %v1791_v55, %v1810_v15  ;;  %2188 = vmatpush1.bf16.msra.mxu0 %v3288_v1  ;;  %v3308_v39 = vld [vmem:[#allocation7 + $0xc4] ss:$16 sps:$4 sm:$0xff]   ;;  %v3311_v2 = vld [vmem:[#allocation7 + $0xcc] ss:$16 sps:$4 sm:$0xff]   ;;  %v3306_v63 = vld [vmem:[#allocation7 + $0xc0] ss:$16 sps:$4 sm:$0xff]  }
 0x376   : > { %v1797_v17 = vadd.f32 %v1796_v5, %v1795_v30  ;;  %2189 = vmatprep.subr.bf16.mxu0 %v3296_v12  ;;  %v3309_v51 = vld [vmem:[#allocation7 + $0xc8] ss:$16 sps:$4 sm:$0xff]   ;;  %v3314_v20 = vld [vmem:[#allocation7 + $0xe4] ss:$16 sps:$4 sm:$0xff]   ;;  %v3317_v44 = vld [vmem:[#allocation7 + $0xec] ss:$16 sps:$4 sm:$0xff]  }
 0x377   : > { %v3387_v22 = vpop.eup %3386  ;;  %v3312_v8 = vld [vmem:[#allocation7 + $0xe0] ss:$16 sps:$4 sm:$0xff]   ;;  %v3315_v10 = vld [vmem:[#allocation7 + $0xe8] ss:$16 sps:$4 sm:$0xff]  }
 0x378   : > { %v1812_v53 = vsel %vm1554_vm15, %v1797_v17, %v1811_v18  ;;  %v2882_v55 = vld [vmem:[%s4508_s21] ss:$0 sm:$0xff]  ;;  %v3325_v36 = vld [vmem:[#allocation8 + $0x88] sm:$0xff]   ;;  %v3346_v1 = vld [vmem:[#allocation8 + $0x78] sm:$0xff]   ;;  %s4512_s21 = sld [smem:[#allocation24_spill]] }
 0x379   : > { %v1814_v34 = vadd.f32 %v1812_v53, %v4329_v3  ;;  %2190 = vmatpush1.bf16.msra.mxu0 %v3294_v60  ;;  %v2883_v15 = vld [vmem:[%s4509_s22] ss:$0 sm:$0xff]  ;;  %v3318_v53 = vld [vmem:[#allocation8 + $0x40] sm:$0xff]   ;;  %v3340_v35 = vld [vmem:[#allocation8 + $0x28] sm:$0xff]   ;;  %s2670_s22 = sshll.u32 %s623_s0, 4  ;;  %s4413_s22 = int_to_ptr.vmem [resolvable:$true] %s2670_s22 }
 0x37a   : > { %2191 = vmatprep.subr.bf16.mxu0 %v3302_v58  ;;  %v3342_v32 = vld [vmem:[#allocation8 + $0x70] sm:$0xff]   ;;  %v3348_v60 = vld [vmem:[#allocation8 + $0x38] sm:$0xff]   ;;  %v2007_v58 = vsub.s32 1, %v4200_v61  ;;  %p3520_p2 = scmp.lt.s32.totalorder %s4413_s22, %s3518_s16 }
 0x37b   : > { %v1815_v25 = vmul.f32 %v3387_v22, %v1814_v34  ;;  %v3319_v34 = vld [vmem:[#allocation8 + $0xc0] sm:$0xff]   ;;  %v3344_v57 = vld [vmem:[#allocation8 + $0x30] sm:$0xff]   ;;  %v3349_v12 = vld [vmem:[#allocation8 + $0xb8] sm:$0xff]  }
 0x37d   : > { %v1816_v16 = vpack.c.bf16 %v1815_v25, %v1815_v25  ;;  %2192 = vmatpush1.bf16.msra.mxu0 %v3300_v54  ;;  %v3320_v25 = vld [vmem:[#allocation8] sm:$0xff]  }
 0x37e   : > { %2193 = vmatprep.subr.bf16.mxu0 %v3308_v39 }
 0x37f   : > { %3137 = vmatmul.mubr.bf16.vlgmr.msra.gmra.mrb[8].mxu1 %v1816_v16  ;;  %v3321_v16 = vld [vmem:[#allocation8 + $0x80] sm:$0xff]  }
 0x380   : > { %2254 = vmatprep.mubr.bf16.mxu1 %v3600_v47  ;;  %2223 = vmatpush1.bf16.msra.mxu1 %v3273_v28  ;;  %v2872_v47 = vld [vmem:[%s4463_s8] ss:$0 sm:$0xff]  ;;  %v3324_v28 = vld [vmem:[#allocation8 + $0x8] sm:$0xff]  }
 0x381   : > { %2224 = vmatprep.subr.bf16.mxu1 %v3281_v42  ;;  %2194 = vmatpush1.bf16.msra.mxu0 %v3306_v63  ;;  %v3327_v42 = vld [vmem:[#allocation8 + $0xd0] sm:$0xff]  }
 0x382   : > { %2195 = vmatprep.subr.bf16.mxu0 %v3314_v20 }
 0x384   : > { %2225 = vmatpush1.bf16.msra.mxu1 %v3279_v21  ;;  %v3329_v21 = vld [vmem:[#allocation8 + $0x90] sm:$0xff]  }
 0x385   : > { %2226 = vmatprep.subr.bf16.mxu1 %v3287_v56  ;;  %2196 = vmatpush1.bf16.msra.mxu0 %v3312_v8  ;;  %v3341_v56 = vld [vmem:[#allocation8 + $0xa8] sm:$0xff]  }
 0x386   : > { %3012 = vmatprep.subr.bf16.mxu0 %v3318_v53 }
 0x388   : > { %2227 = vmatpush1.bf16.msra.mxu1 %v3285_v40  ;;  %v3343_v40 = vld [vmem:[#allocation8 + $0xf0] sm:$0xff]  }
 0x389   : > { %2228 = vmatprep.subr.bf16.mxu1 %v3293_v7  ;;  %v3345_v7 = vld [vmem:[#allocation8 + $0xb0] sm:$0xff]  }
 0x38c   : > { %2229 = vmatpush1.bf16.msra.mxu1 %v3291_v59  ;;  %v3347_v59 = vld [vmem:[#allocation8 + $0xf8] sm:$0xff]  }
 0x38d   : > { %2230 = vmatprep.subr.bf16.mxu1 %v3299_v24  ;;  %v1999_v24 = vld [vmem:[%s4510_s9] sm:$0xf]  ;;  %s4513_s9 = sld [smem:[#allocation25_spill]] }
 0x38e   : > { %v2004_v54 = vrot.slane %v1999_v24, %v4207_v41  ;;  %v2008_v39 = vrot.slane %v1999_v24, %v2007_v58 }
 0x390   : > { %2231 = vmatpush1.bf16.msra.mxu1 %v3297_v13  ;;  %v2011_v13 = vsub.s32 2, %v4200_v61 }
 0x391   : > { %2232 = vmatprep.subr.bf16.mxu1 %v3305_v43  ;;  %v2015_v43 = vsub.s32 3, %v4200_v61 }
 0x393   : > { %s4411_s20 = scalar_lea.hbm %s4513_s9, %s2951_s18 }
 0x394   : > { %2233 = vmatpush1.bf16.msra.mxu1 %v3303_v46  ;;  %v2012_v46 = vrot.slane %v1999_v24, %v2011_v13 }
 0x395   : > { %2234 = vmatprep.subr.bf16.mxu1 %v3311_v2  ;;  %v2016_v2 = vrot.slane %v1999_v24, %v2015_v43 }
 0x398   : > { %2235 = vmatpush1.bf16.msra.mxu1 %v3309_v51 }
 0x399   : > { %2236 = vmatprep.subr.bf16.mxu1 %v3317_v44 }
 0x39c   : > { %2237 = vmatpush1.bf16.msra.mxu1 %v3315_v10 }
 0x39d   : > { %3034 = vmatprep.subr.bf16.mxu1 %v3319_v34 }
 0x452   : > { %v1922_v3 = vpop.f32.mrb[8].mxu1 }
 0x453   : > { %v1923_v31 = vadd.f32 %v2872_v47, %v1922_v3  ;;  %v3138_v37 = vpop.f32.mrb[9].mxu1  ;;  %v3330_v47 = vld [vmem:[#allocation8 + $0x58] sm:$0xff]  }
 0x454   : > { %v1925_v50 = vpop.f32.mrb[10].mxu1  ;;  %v3331_v3 = vld [vmem:[#allocation8 + $0xd8] sm:$0xff]   ;;  %v3334_v37 = vld [vmem:[#allocation8 + $0x60] sm:$0xff]  }
 0x455   : > { %v1935_v52 = vmul.f32 %v2881_v49, %v1923_v31  ;;  %v3139_v27 = vpop.f32.mrb[11].mxu1  ;;  %v3332_v49 = vld [vmem:[#allocation8 + $0x18] sm:$0xff]   ;;  %v3335_v50 = vld [vmem:[#allocation8 + $0xe0] sm:$0xff]  }
 0x456   : > { %v3333_v31 = vld [vmem:[#allocation8 + $0x98] sm:$0xff]   ;;  %v3337_v27 = vld [vmem:[#allocation8 + $0xa0] sm:$0xff]  }
 0x457   : > { %v4379_v9 = vadd.f32 %v3398_v29, %v1935_v52  ;;  %v3336_v52 = vld [vmem:[#allocation8 + $0x20] sm:$0xff]   ;;  %v3338_v29 = vld [vmem:[#allocation8 + $0x68] sm:$0xff]  }
 0x459   : > { %1939 = vadd.xlane.f32.xlu1 %v4379_v9  ;;  %v1942_v19 = vmul.f32 %v4379_v9, %v4379_v9 }
 0x45b   : > { %1943 = vadd.xlane.f32.xlu0 %v1942_v19  ;;  %v3339_v19 = vld [vmem:[#allocation8 + $0xe8] sm:$0xff]  }
 0x4e6   : > { %v1940_v26 = vpop.xlane.xlu1 %1939 }
 0x4e7   : > { %v1941_v48 = vmul.f32 0.0078125, %v1940_v26 }
 0x4e8   : > { %v1944_v23 = vpop.xlane.xlu0 %1943 }
 0x4e9   : > { %v1946_v62 = vmul.f32 %v1941_v48, %v1941_v48  ;;  %v1945_v0 = vmul.f32 0.0078125, %v1944_v23  ;;  %v1948_v11 = vsub.f32 %v4379_v9, %v1941_v48 }
 0x4eb   : > { %v1947_v30 = vsub.f32 %v1945_v0, %v1946_v62 }
 0x4ed   : > { %v1949_v4 = vadd.f32 1e-05, %v1947_v30 }
 0x4ef   : > { %3388 = vrsqrt.f32 %v1949_v4 }
 0x4f9   : > { %v3389_v14 = vpop.eup %3388 }
 0x4fa   : > { %v1951_v5 = vmul.f32 %v3389_v14, %v1948_v11 }
 0x4fc   : > { %v1958_v17 = vmul.f32 %v2882_v55, %v1951_v5 }
 0x4fe   : > { %v1965_v18 = vadd.f32 %v2883_v15, %v1958_v17 }
 0x500   : > { %v1966_v22 = vpack.c.bf16 %v1965_v18, %v1965_v18 }
 0x502   : > { %2214 = vmatmul.mubr.bf16.vlgmr.msra.gmra.mrb[28].mxu0 %v1966_v22  ;;  %2255 = vmatmul.mubr.bf16.vlgmr.msra.gmra.mrb[12].mxu1 %v1966_v22 }
 0x503   : > { %3013 = vmatpush3.bf16.msra.mxu0 %v3320_v25  ;;  %3035 = vmatpush3.bf16.msra.mxu1 %v3321_v16 }
 0x504   : > { %3014 = vmatprep.subr.bf16.mxu0 %v3322_v33  ;;  %3036 = vmatprep.subr.bf16.mxu1 %v3323_v6 }
 0x507   : > { %3015 = vmatpush3.bf16.msra.mxu0 %v3324_v28  ;;  %3037 = vmatpush3.bf16.msra.mxu1 %v3325_v36 }
 0x508   : > { %3016 = vmatprep.subr.bf16.mxu0 %v3326_v38  ;;  %3038 = vmatprep.subr.bf16.mxu1 %v3327_v42 }
 0x50b   : > { %3017 = vmatpush3.bf16.msra.mxu0 %v3328_v45  ;;  %3039 = vmatpush3.bf16.msra.mxu1 %v3329_v21 }
 0x50c   : > { %3018 = vmatprep.subr.bf16.mxu0 %v3330_v47  ;;  %3040 = vmatprep.subr.bf16.mxu1 %v3331_v3 }
 0x50f   : > { %3019 = vmatpush3.bf16.msra.mxu0 %v3332_v49  ;;  %3041 = vmatpush3.bf16.msra.mxu1 %v3333_v31 }
 0x510   : > { %3020 = vmatprep.subr.bf16.mxu0 %v3334_v37  ;;  %3042 = vmatprep.subr.bf16.mxu1 %v3335_v50 }
 0x513   : > { %3021 = vmatpush3.bf16.msra.mxu0 %v3336_v52  ;;  %3043 = vmatpush3.bf16.msra.mxu1 %v3337_v27 }
 0x514   : > { %3022 = vmatprep.subr.bf16.mxu0 %v3338_v29  ;;  %3044 = vmatprep.subr.bf16.mxu1 %v3339_v19 }
 0x517   : > { %3023 = vmatpush3.bf16.msra.mxu0 %v3340_v35  ;;  %3045 = vmatpush3.bf16.msra.mxu1 %v3341_v56 }
 0x518   : > { %3024 = vmatprep.subr.bf16.mxu0 %v3342_v32  ;;  %3046 = vmatprep.subr.bf16.mxu1 %v3343_v40 }
 0x51b   : > { %3025 = vmatpush3.bf16.msra.mxu0 %v3344_v57  ;;  %3047 = vmatpush3.bf16.msra.mxu1 %v3345_v7 }
 0x51c   : > { %3026 = vmatprep.subr.bf16.mxu0 %v3346_v1  ;;  %3048 = vmatprep.subr.bf16.mxu1 %v3347_v59 }
 0x51f   : > { %3027 = vmatpush3.bf16.msra.mxu0 %v3348_v60  ;;  %3049 = vmatpush3.bf16.msra.mxu1 %v3349_v12  ;;  %v2916_v12 = vld [vmem:[%s4511_s23] ss:$0 sm:$0xff]  ;;  %s3513_s23 = scalar_lea.vmem %s4413_s22, 128 }
 0x520   : > { %p3514_p3 = scmp.ne.s32.totalorder %s4413_s22, %s3513_s23  ;;  %p3521_p1 = scmp.lt.s32.totalorder %s3519_s24, %s3513_s23 }
 0x522   : > { %p3515_p7 = pnand %p3514_p3, %p3837_p5  ;;  %p3522_p4 = por %p3521_p1, %p3520_p2 }
 0x524   : > { %p3516_p12 = pneg %p3515_p7 }
 0x526   : > { %p3523_p0 = pnand %p3522_p4, %p3516_p12 }
 0x5d5   : > { %v2215_v63 = vpop.f32.mrb[28].mxu0  ;;  %v2256_v51 = vpop.f32.mrb[12].mxu1 }
 0x5d6   : > { %v2216_v20 = vadd.f32 %v2215_v63, %v2004_v54  ;;  %v2257_v44 = vadd.f32 %v2256_v51, %v2012_v46  ;;  %v2217_v8 = vpop.f32.mrb[29].mxu0  ;;  %v2258_v10 = vpop.f32.mrb[13].mxu1  ;;  %v2949_v51 = vld [vmem:[%s4512_s21] ss:$0 sm:$0xff] }
 0x5d7   : > { %v2218_v26 = vadd.f32 %v2217_v8, %v2008_v39  ;;  %v2259_v48 = vadd.f32 %v2258_v10, %v2016_v2  ;;  %v2219_v23 = vpop.f32.mrb[30].mxu0  ;;  %v2260_v62 = vpop.f32.mrb[14].mxu1 }
 0x5d8   : > { %v2263_v0 = vmul.f32 %v2216_v20, %v2216_v20  ;;  %v2265_v30 = vmul.f32 %v2257_v44, %v2257_v44  ;;  %v2220_v4 = vpop.f32.mrb[31].mxu0  ;;  %v2261_v11 = vpop.f32.mrb[15].mxu1 }
 0x5d9   : > { %v2264_v61 = vmul.f32 %v2218_v26, %v2218_v26  ;;  %v2266_v14 = vmul.f32 %v2259_v48, %v2259_v48 }
 0x5da   : > { %v2267_v41 = vmul.f32 %v2263_v0, %v2216_v20  ;;  %v2269_v55 = vmul.f32 %v2265_v30, %v2257_v44 }
 0x5db   : > { %v2268_v5 = vmul.f32 %v2264_v61, %v2218_v26  ;;  %v2270_v15 = vmul.f32 %v2266_v14, %v2259_v48 }
 0x5dc   : > { %v2271_v17 = vmul.f32 0.044715, %v2267_v41  ;;  %v2273_v18 = vmul.f32 0.044715, %v2269_v55 }
 0x5dd   : > { %v2272_v22 = vmul.f32 0.044715, %v2268_v5  ;;  %v2274_v53 = vmul.f32 0.044715, %v2270_v15 }
 0x5de   : > { %v2275_v34 = vadd.f32 %v2271_v17, %v2216_v20  ;;  %v2277_v25 = vadd.f32 %v2273_v18, %v2257_v44 }
 0x5df   : > { %v2276_v16 = vadd.f32 %v2272_v22, %v2218_v26  ;;  %v2278_v33 = vadd.f32 %v2274_v53, %v2259_v48 }
 0x5e0   : > { %v2279_v6 = vmul.f32 0.7978846, %v2275_v34  ;;  %v2281_v28 = vmul.f32 0.7978846, %v2277_v25 }
 0x5e1   : > { %v2280_v36 = vmul.f32 0.7978846, %v2276_v16  ;;  %v2282_v38 = vmul.f32 0.7978846, %v2278_v33 }
 0x5e2   : > { %3390 = vtanh.f32 %v2279_v6 }
 0x5e3   : > { %3392 = vtanh.f32 %v2281_v28 }
 0x5e4   : > { %3394 = vtanh.f32 %v2280_v36 }
 0x5e5   : > { %3396 = vtanh.f32 %v2282_v38 }
 0x5ec   : > { %v3391_v42 = vpop.eup %3390 }
 0x5ed   : > { %v3393_v45 = vpop.eup %3392  ;;  %v2287_v21 = vadd.f32 1.0, %v3391_v42 }
 0x5ee   : > { %v3395_v47 = vpop.eup %3394  ;;  %v2289_v3 = vadd.f32 1.0, %v3393_v45 }
 0x5ef   : > { %v3397_v49 = vpop.eup %3396  ;;  %v2288_v31 = vadd.f32 1.0, %v3395_v47  ;;  %v2291_v37 = vmul.f32 0.5, %v2287_v21 }
 0x5f0   : > { %v2290_v50 = vadd.f32 1.0, %v3397_v49  ;;  %v2293_v52 = vmul.f32 0.5, %v2289_v3 }
 0x5f1   : > { %v2292_v27 = vmul.f32 0.5, %v2288_v31  ;;  %v2295_v19 = vmul.f32 %v2291_v37, %v2216_v20 }
 0x5f2   : > { %v2294_v29 = vmul.f32 0.5, %v2290_v50  ;;  %v2297_v56 = vmul.f32 %v2293_v52, %v2257_v44 }
 0x5f3   : > { %v2296_v35 = vmul.f32 %v2292_v27, %v2218_v26  ;;  %v2299_v7 = vpack.c.bf16 %v2295_v19, %v2295_v19 }
 0x5f4   : > { %v2298_v32 = vmul.f32 %v2294_v29, %v2259_v48  ;;  %v2301_v1 = vpack.c.bf16 %v2297_v56, %v2297_v56 }
 0x5f5   : > { %v2300_v40 = vpack.c.bf16 %v2296_v35, %v2296_v35 }
 0x5f6   : > { %v2302_v57 = vpack.c.bf16 %v2298_v32, %v2298_v32 }
 0x5f7   : > { %2598 = vmatprep.mubr.bf16.mxu0 %v2300_v40 }
 0x5f8   : > { %2638 = vmatprep.mubr.bf16.mxu1 %v2302_v57  ;;  %2599 = vmatmul.mubr.bf16.vlgmr.msra.gmra.mrb[32].mxu0 %v2299_v7 }
 0x5f9   : > { %2639 = vmatmul.mubr.bf16.vlgmr.msra.gmra.mrb[16].mxu1 %v2301_v1 }
 0x6cb   : > { %v3028_v59 = vpop.f32.mrb[32].mxu0 }
 0x6cc   : > { %v3050_v60 = vpop.f32.mrb[16].mxu1  ;;  %v3029_v13 = vpop.f32.mrb[33].mxu0 }
 0x6cd   : > { %v3030_v24 = vadd.f32 %v3029_v13, %v3028_v59  ;;  %v3051_v58 = vpop.f32.mrb[17].mxu1  ;;  %v3031_v43 = vpop.f32.mrb[34].mxu0 }
 0x6ce   : > { %v3052_v54 = vadd.f32 %v3051_v58, %v3050_v60  ;;  %v3053_v46 = vpop.f32.mrb[18].mxu1  ;;  %v3032_v39 = vpop.f32.mrb[35].mxu0 }
 0x6cf   : > { %v2601_v2 = vadd.f32 %v3030_v24, %v2916_v12  ;;  %v3054_v63 = vpop.f32.mrb[19].mxu1 }
 0x6d1   : > { %v2641_v20 = vadd.f32 %v3052_v54, %v2601_v2 }
 0x6d3   : > { %v2653_v44 = vmul.f32 %v2949_v51, %v2641_v20 }
 0x6d5   : > { %v2654_v8 = vadd.f32 %v2653_v44, %v4379_v9 }
 0x6d7   : > { %2655 = vst [vmem:[%s623_s0] sm:$0xff] %v2654_v8 }
 0x6d8   : > { %3526 = shalt.err (!%p3523_p0)
}
 0x6d9   : > { %s3527_s14 = scalar_lea.hbm %s4411_s20, 128  ;;  %s3531_s18 = scalar_lea.hbm %s4513_s9, 256 }
 0x6da   : > { %p3528_p9 = scmp.ne.s32.totalorder %s4411_s20, %s3527_s14  ;;  %p3532_p13 = scmp.lt.u32.totalorder %s4411_s20, %s4513_s9 }
 0x6db   : > { %p3533_p6 = scmp.lt.u32.totalorder %s3531_s18, %s3527_s14  ;;  %p3535_p3 = scmp.lt.u32.totalorder %s3527_s14, %s4411_s20 }
 0x6dc   : > { %p3529_p11 = pnand %p3528_p9, %p3837_p5 }
 0x6dd   : > { %p3534_p10 = por %p3533_p6, %p3532_p13 }
 0x6de   : > { %p3530_p8 = pneg %p3529_p11 }
 0x6df   : > { %p3536_p7 = por %p3535_p3, %p3534_p10 }
 0x6e1   : > { %p3537_p12 = pnand %p3536_p7, %p3530_p8 }
 0x6e3   : > { %3540 = shalt.err (!%p3537_p12)
}
 0x6e4   : > { %3154 = dma.vmem_to_hbm [thread:$0]  (%p3837_p5), %s4413_s22, 128, %s4411_s20, %s2657_s10  }
 0x6e5 PF: > { %s4514_s17 = sld [smem:[#allocation15_spill]]  ;;  %s4515_s23 = sld [smem:[#allocation16_spill]] }
 0x6e6   : > { %p4517_p1 = scmp.ge.s32.totalorder %s3587_s27, 2 }
 0x6eb   : > { %s2682_s28 = sand.u32 1, %s4514_s17   ;;  %p4516_p2 = scmp.ne.s32.totalorder %s4515_s23, 0 }
 0x6ec   : > { %s2683_s16 = scalar_lea.sflag [#allocation4], %s2682_s28 }
 0x6ed   : > { %p3171_p4 = pnand %p4517_p1, %p4516_p2 }
 0x6ef   : > { %3570 = dma.done.wait (!%p3171_p4), %s2683_s16, 128  }
 0x6f0   : > { %3572 = vsyncadd (!%p3171_p4), %s2683_s16, 4294967168  ;;  %p32_p0 = scmp.ge.s32.totalorder %s3823_s12, 4   ;;  %s4518_s24 = smov %s3579_s25 }
 0x6f1   : > { %s4519_s25 = smov %s3583_s26  ;;  %s4520_s26 = smov %s3833_s30 }
 0x6f2   : > { %s4521_s27 = smov %s3823_s12  ;;  %34 = sbr.rel (!%p32_p0) target bundleno = 17 (0x11), region = 148 }
 0x6f9   :  { %2688 = vsyncpa [#allocation3], 1 }
 0x6fa   :  { %2690 = vsyncpa [#allocation3 + $0x1], 1 }
 0x6fb   :  { %2691 = vsyncpa [#allocation6], 1 }
 0x6fc   :  { %2692 = vsyncpa [#allocation9], 1 }
 0x6fd   :  { %2693 = vsyncpa [#allocation4], 1 }
 0x6fe   :  { %2695 = vsyncpa [#allocation4 + $0x1], 1 }

</bundles_post_ra>
